<compile_context>
chip_gen: v7x
topology: tpu7x:2x2x1
jax: 0.10.0
libtpu: 0.0.40
codegen_flags: <defaults>
</compile_context>

<pallas_src>
import numpy as np

import jax
import jax.numpy as jnp
from jax.experimental import pallas as pl
from jax.experimental.pallas import tpu as pltpu

IMAGE_H = 16          # image_height in the torch module
IMAGE_W = 16          # image_width  in the torch module
NUM_META = 2          # num_metadata_features
NUM_CLASSES = 2       # fc_output has 2 outputs
HEAD_PAD = 128        # lane-dense padded head output width (sliced afterwards)
MAX_BATCH_TILE = 32   # images per grid step (conv1 matmul M = 16*32 = 512)
C1, C2, C3 = 32, 64, 128


# ---------------------------------------------------------------------------
# Fused kernel
# ---------------------------------------------------------------------------
def _conv_relu_pool(xrows, w_ref, b_ref, H, Cout):
    """Row-Toeplitz 3x3 conv + bias + ReLU + 2x2/2 maxpool.

    xrows: (H+2, B, W*Cin) f32.  Rows are H-padded (first/last row zero); the
    lane axis packs (w, c) with w major.  The W zero padding of the conv is
    folded into the Toeplitz weight (out-of-range taps simply have no weight
    rows), so the im2col is: three major-axis row windows concatenated along
    lanes -> one MXU matmul.  No sublane-offset slices or padded scratches.
    """
    B = xrows.shape[1]
    col = jnp.concatenate([xrows[ky:ky + H] for ky in range(3)], axis=-1)
    col = col.reshape(H * B, col.shape[-1]).astype(jnp.bfloat16)
    y = jnp.dot(col, w_ref[...], preferred_element_type=jnp.float32)
    y = jnp.maximum(y + b_ref[...], 0.0)               # (H*B, W*Cout), f32
    Lo = y.shape[-1]                                    # W * Cout
    y = y.reshape(H, B, Lo)
    # 2x2 maxpool: W-pool = max with the Cout-shifted lanes (valid results sit
    # at even-w lane chunks), H-pool = max of adjacent row pairs, then compact
    # the even-w chunks back to a dense (w, c) packing.  No (..., 2, C)
    # sublane-padded intermediates.
    m = jnp.maximum(y[..., :Lo - Cout], y[..., Cout:])            # (H,B,Lo-Cout)
    m = m.reshape(H // 2, 2, B, Lo - Cout)
    m = jnp.maximum(m[:, 0], m[:, 1])                             # (H/2,B,Lo-Cout)
    w_half = Lo // Cout // 2
    p = jnp.concatenate(
        [m[..., 2 * k * Cout: 2 * k * Cout + Cout] for k in range(w_half)],
        axis=-1)                                                  # (H/2,B,W/2*Cout)
    return p


def _hpad(p):
    """Add zero rows above/below along the leading (major) H axis."""
    z = jnp.zeros((1,) + p.shape[1:], p.dtype)
    return jnp.concatenate([z, p, z], axis=0)


def fused_model_kernel(img_ref, meta_ref,
                       w1_ref, b1_ref, w2_ref, b2_ref, w3_ref, b3_ref,
                       wf1_ref, bf1_ref, wm_ref, bm_ref,
                       wo1_ref, wo2_ref, bo_ref,
                       out_ref):
    bf16, f32 = jnp.bfloat16, jnp.float32

    # conv1: input already H-padded and (w, c)-lane-packed by the host.
    p1 = _conv_relu_pool(img_ref[...], w1_ref, b1_ref, IMAGE_H, C1)      # (8,B,256)
    p2 = _conv_relu_pool(_hpad(p1), w2_ref, b2_ref, IMAGE_H // 2, C2)    # (4,B,256)
    p3 = _conv_relu_pool(_hpad(p2), w3_ref, b3_ref, IMAGE_H // 4, C3)    # (2,B,256)

    # Flatten to (B, 512) in (h, w, c) order; fc1 weights are pre-permuted so
    # this matches PyTorch's NCHW flatten semantics.
    feat = jnp.concatenate([p3[0], p3[1]], axis=-1)

    h1 = jnp.maximum(
        jnp.dot(feat.astype(bf16), wf1_ref[...], preferred_element_type=f32)
        + bf1_ref[...], 0.0)
    # TODO(synk): nn.Dropout(p=0.5) is inference-mode identity (no RNG mask).
    hm = jnp.maximum(
        jnp.dot(meta_ref[...].astype(bf16), wm_ref[...],
                preferred_element_type=f32) + bm_ref[...], 0.0)
    # cat(h1, hm) @ Wo == h1 @ Wo[:128] + hm @ Wo[128:]  (columns padded to 128)
    out = (jnp.dot(h1.astype(bf16), wo1_ref[...], preferred_element_type=f32)
           + jnp.dot(hm.astype(bf16), wo2_ref[...], preferred_element_type=f32)
           + bo_ref[...])
    out_ref[...] = out.astype(out_ref.dtype)


# ---------------------------------------------------------------------------
# Wrapper
# ---------------------------------------------------------------------------
def _rep_spec(arr):
    nd = arr.ndim
    return pl.BlockSpec(arr.shape, lambda i, _nd=nd: (0,) * _nd)


def _round_up(x, m):
    return (x + m - 1) // m * m


def _batch_tiling(n):
    # Multiple-of-8 tile (batch sits on sublanes), capped at MAX_BATCH_TILE,
    # and always >=2 grid steps so ("parallel",) can shard across both v7x TCs.
    tile = min(MAX_BATCH_TILE, max(8, _round_up((n + 1) // 2, 8)))
    n_pad = max(_round_up(n, tile), 2 * tile)
    return tile, n_pad


@jax.jit
def multi_input_model_forward(kparams, img_nchw, meta):
    """img_nchw: (N, 3, H, W) float32 (PyTorch layout); meta: (N, NUM_META)."""
    n = img_nchw.shape[0]
    tile, n_pad = _batch_tiling(n)

    # Lane-dense image layout: (H+2, N, W*3) — H leading (major) axis, batch
    # on sublanes, (w, c) packed on lanes; H halo rows pre-zeroed here.
    x = jnp.transpose(img_nchw.astype(jnp.float32), (0, 2, 3, 1))   # NHWC
    x = x.reshape(n, IMAGE_H, IMAGE_W * 3)
    x = jnp.pad(x, ((0, n_pad - n), (1, 1), (0, 0)))
    x = jnp.transpose(x, (1, 0, 2))                                 # (18, n_pad, 48)

    meta = jnp.pad(meta.astype(jnp.float32), ((0, n_pad - n), (0, 0)))

    weights = [kparams[k] for k in
               ("w1", "b1", "w2", "b2", "w3", "b3",
                "wf1", "bf1", "wm", "bm", "wo1", "wo2", "bo")]

    out = pl.pallas_call(
        fused_model_kernel,
        out_shape=jax.ShapeDtypeStruct((n_pad, HEAD_PAD), jnp.float32),
        grid=(n_pad // tile,),
        in_specs=(
            [pl.BlockSpec((IMAGE_H + 2, tile, IMAGE_W * 3),
                          lambda i: (0, i, 0)),
             pl.BlockSpec((tile, NUM_META), lambda i: (i, 0))]
            # Weight blocks use constant index maps: loaded once, not
            # re-fetched per grid step.  All weights ~1.9 MiB bf16 total.
            + [_rep_spec(w) for w in weights]),
        out_specs=pl.BlockSpec((tile, HEAD_PAD), lambda i: (i, 0)),
        compiler_params=pltpu.CompilerParams(
            dimension_semantics=("parallel",),
            # ~10 MiB actually used; 40 MiB cap stays well under v7x 64 MiB/TC.
            vmem_limit_bytes=40 * 1024 * 1024),
    )(x, meta, *weights)

    return out[:n, :NUM_CLASSES]


# ---------------------------------------------------------------------------
# Parameters: synthetic torch-layout init + host-side conversion to kernel form
# ---------------------------------------------------------------------------
def init_params(key):
    """Deterministic synthetic parameters in PyTorch layouts."""
    ks = jax.random.split(key, 12)

    def u(k, shape, fan_in):
        bound = 1.0 / float(fan_in) ** 0.5
        return jax.random.uniform(k, shape, jnp.float32, -bound, bound)

    fc1_in = 128 * (IMAGE_H // 8) * (IMAGE_W // 8)
    return dict(
        conv1_w=u(ks[0], (32, 3, 3, 3), 3 * 9),        # (Cout, Cin, kH, kW)
        conv1_b=u(ks[1], (32,), 3 * 9),
        conv2_w=u(ks[2], (64, 32, 3, 3), 32 * 9),
        conv2_b=u(ks[3], (64,), 32 * 9),
        conv3_w=u(ks[4], (128, 64, 3, 3), 64 * 9),
        conv3_b=u(ks[5], (128,), 64 * 9),
        fc1_w=u(ks[6], (128, fc1_in), fc1_in),         # (out, in), torch Linear
        fc1_b=u(ks[7], (128,), fc1_in),
        fc_meta_w=u(ks[8], (64, NUM_META), NUM_META),
        fc_meta_b=u(ks[9], (64,), NUM_META),
        fc_out_w=u(ks[10], (NUM_CLASSES, 128 + 64), 128 + 64),
        fc_out_b=u(ks[11], (NUM_CLASSES,), 128 + 64),
    )


def _toeplitz_conv_weight(w_oihw, w_in):
    """torch (Cout,Cin,3,3) conv weight -> (3*W*Cin, W*Cout) row-Toeplitz matrix.

    Row index = ky*(W*Cin) + wi*Cin + ci   (matches the kernel's col layout)
    Col index = wo*Cout + co               (matches the (w, c) output packing)
    Out-of-range taps (the conv's W zero padding) simply have no rows -> exact.
    """
    w = np.asarray(w_oihw, np.float32)
    cout, cin = w.shape[0], w.shape[1]
    t = np.zeros((3, w_in, cin, w_in, cout), np.float32)
    taps = w.transpose(2, 3, 1, 0)                     # (ky, kx, Cin, Cout)
    for ky in range(3):
        for kx in range(3):
            for wo in range(w_in):
                wi = wo + kx - 1
                if 0 <= wi < w_in:
                    t[ky, wi, :, wo, :] = taps[ky, kx]
    return jnp.asarray(t.reshape(3 * w_in * cin, w_in * cout), jnp.bfloat16)


def prepare_params(p):
    """Convert torch-layout params to the kernel's layouts (one-time, host)."""
    def bias_row(b, w_out):   # per-channel bias tiled over w -> (1, W*Cout) f32
        return jnp.tile(jnp.asarray(b, jnp.float32), w_out)[None, :]

    # fc1: permute rows from torch's (c, h, w) flatten order to the kernel's
    # (h, w, c) flatten order.
    c, hc, wc = C3, IMAGE_H // 8, IMAGE_W // 8
    fc1_w = jnp.transpose(p["fc1_w"])                          # (512, 128)
    fc1_w = (fc1_w.reshape(c, hc, wc, 128)
             .transpose(1, 2, 0, 3).reshape(hc * wc * c, 128))
    # fc_output: split into the two concat halves and pad columns to 128 lanes.
    wo = jnp.transpose(p["fc_out_w"])                          # (192, 2)
    wo1 = jnp.zeros((128, HEAD_PAD), jnp.float32).at[:, :NUM_CLASSES].set(wo[:128])
    wo2 = jnp.zeros((64, HEAD_PAD), jnp.float32).at[:, :NUM_CLASSES].set(wo[128:])
    bo = jnp.zeros((1, HEAD_PAD), jnp.float32).at[0, :NUM_CLASSES].set(p["fc_out_b"])

    bf16 = jnp.bfloat16
    return dict(
        w1=_toeplitz_conv_weight(p["conv1_w"], IMAGE_W),       # (144, 512) bf16
        b1=bias_row(p["conv1_b"], IMAGE_W),
        w2=_toeplitz_conv_weight(p["conv2_w"], IMAGE_W // 2),  # (768, 512) bf16
        b2=bias_row(p["conv2_b"], IMAGE_W // 2),
        w3=_toeplitz_conv_weight(p["conv3_w"], IMAGE_W // 4),  # (768, 512) bf16
        b3=bias_row(p["conv3_b"], IMAGE_W // 4),
        wf1=fc1_w.astype(bf16), bf1=p["fc1_b"].reshape(1, -1),
        wm=jnp.transpose(p["fc_meta_w"]).astype(bf16),
        bm=p["fc_meta_b"].reshape(1, -1),
        wo1=wo1.astype(bf16), wo2=wo2.astype(bf16), bo=bo,
    )


# ---------------------------------------------------------------------------
# Pure-JAX reference (mirrors the PyTorch module) for a correctness check
# ---------------------------------------------------------------------------
def reference_forward(p, img_nchw, meta):
    def conv(x, w, b):
        y = jax.lax.conv_general_dilated(
            x, w, window_strides=(1, 1), padding=((1, 1), (1, 1)),
            dimension_numbers=("NCHW", "OIHW", "NCHW"))
        return jax.nn.relu(y + b[None, :, None, None])

    def pool(x):
        return jax.lax.reduce_window(x, -jnp.inf, jax.lax.max,
                                     (1, 1, 2, 2), (1, 1, 2, 2), "VALID")

    x = pool(conv(img_nchw, p["conv1_w"], p["conv1_b"]))
    x = pool(conv(x, p["conv2_w"], p["conv2_b"]))
    x = pool(conv(x, p["conv3_w"], p["conv3_b"]))
    flat = x.reshape(x.shape[0], -1)                 # torch NCHW flatten order
    h1 = jax.nn.relu(flat @ p["fc1_w"].T + p["fc1_b"])
    hm = jax.nn.relu(meta @ p["fc_meta_w"].T + p["fc_meta_b"])
    comb = jnp.concatenate([h1, hm], axis=1)
    return comb @ p["fc_out_w"].T + p["fc_out_b"]


if __name__ == "__main__":
    key = jax.random.PRNGKey(0)
    k_param, k_img, k_meta = jax.random.split(key, 3)

    torch_params = init_params(k_param)
    kparams = prepare_params(torch_params)

    img = jax.random.normal(k_img, (2, 3, IMAGE_H, IMAGE_W), jnp.float32)
    meta = jax.random.normal(k_meta, (2, NUM_META), jnp.float32)

    out = multi_input_model_forward(kparams, img, meta)
    jax.block_until_ready(out)
    assert out.shape == (2, NUM_CLASSES)

    ref = reference_forward(torch_params, img, meta)
    # bf16 matmul operands (f32 accumulation) => loosened tolerance vs f32 ref.
    assert bool(jnp.allclose(out, ref, rtol=5e-2, atol=5e-2)), (
        "Pallas output does not match the pure-JAX reference")

    print("KERNEL_OK")
</pallas_src>

<mosaic_0001>
module attributes {stable_mosaic.version = 11 : i64} {
  func.func @fused_model_kernel(%arg0: i32, %arg1: memref<18x8x48xf32, #tpu.memory_space<vmem>>, %arg2: memref<8x2xf32, #tpu.memory_space<vmem>>, %arg3: memref<144x512xbf16, #tpu.memory_space<vmem>>, %arg4: memref<1x512xf32, #tpu.memory_space<vmem>>, %arg5: memref<768x512xbf16, #tpu.memory_space<vmem>>, %arg6: memref<1x512xf32, #tpu.memory_space<vmem>>, %arg7: memref<768x512xbf16, #tpu.memory_space<vmem>>, %arg8: memref<1x512xf32, #tpu.memory_space<vmem>>, %arg9: memref<512x128xbf16, #tpu.memory_space<vmem>>, %arg10: memref<1x128xf32, #tpu.memory_space<vmem>>, %arg11: memref<2x64xbf16, #tpu.memory_space<vmem>>, %arg12: memref<1x64xf32, #tpu.memory_space<vmem>>, %arg13: memref<128x128xbf16, #tpu.memory_space<vmem>>, %arg14: memref<64x128xbf16, #tpu.memory_space<vmem>>, %arg15: memref<1x128xf32, #tpu.memory_space<vmem>>, %arg16: memref<8x128xf32, #tpu.memory_space<vmem>>) attributes {dimension_semantics = [#tpu.dimension_semantics<parallel>], iteration_bounds = array<i64: 2>, scalar_prefetch = 0 : i64, scratch_operands = 0 : i64, tpu.core_type = #tpu.core_type<tc>, window_params = [{transform_indices = @transform_0, window_bounds = array<i64: 18, 8, 48>}, {transform_indices = @transform_1, window_bounds = array<i64: 8, 2>}, {pipeline_mode = #tpu.pipeline_mode<synchronous>, transform_indices = @transform_2, window_bounds = array<i64: 144, 512>}, {pipeline_mode = #tpu.pipeline_mode<synchronous>, transform_indices = @transform_3, window_bounds = array<i64: 1, 512>}, {pipeline_mode = #tpu.pipeline_mode<synchronous>, transform_indices = @transform_4, window_bounds = array<i64: 768, 512>}, {pipeline_mode = #tpu.pipeline_mode<synchronous>, transform_indices = @transform_5, window_bounds = array<i64: 1, 512>}, {pipeline_mode = #tpu.pipeline_mode<synchronous>, transform_indices = @transform_6, window_bounds = array<i64: 768, 512>}, {pipeline_mode = #tpu.pipeline_mode<synchronous>, transform_indices = @transform_7, window_bounds = array<i64: 1, 512>}, {pipeline_mode = #tpu.pipeline_mode<synchronous>, transform_indices = @transform_8, window_bounds = array<i64: 512, 128>}, {pipeline_mode = #tpu.pipeline_mode<synchronous>, transform_indices = @transform_9, window_bounds = array<i64: 1, 128>}, {pipeline_mode = #tpu.pipeline_mode<synchronous>, transform_indices = @transform_10, window_bounds = array<i64: 2, 64>}, {pipeline_mode = #tpu.pipeline_mode<synchronous>, transform_indices = @transform_11, window_bounds = array<i64: 1, 64>}, {pipeline_mode = #tpu.pipeline_mode<synchronous>, transform_indices = @transform_12, window_bounds = array<i64: 128, 128>}, {pipeline_mode = #tpu.pipeline_mode<synchronous>, transform_indices = @transform_13, window_bounds = array<i64: 64, 128>}, {pipeline_mode = #tpu.pipeline_mode<synchronous>, transform_indices = @transform_14, window_bounds = array<i64: 1, 128>}, {transform_indices = @transform_15, window_bounds = array<i64: 8, 128>}]} {
    %c0 = arith.constant 0 : index
    %c0_0 = arith.constant 0 : index
    %c0_1 = arith.constant 0 : index
    %0 = vector.load %arg1[%c0, %c0_0, %c0_1] : memref<18x8x48xf32, #tpu.memory_space<vmem>>, vector<18x8x48xf32>
    %1 = vector.extract_strided_slice %0 {offsets = [0, 0, 0], sizes = [16, 8, 48], strides = [1, 1, 1]} : vector<18x8x48xf32> to vector<16x8x48xf32>
    %2 = vector.extract_strided_slice %0 {offsets = [1, 0, 0], sizes = [16, 8, 48], strides = [1, 1, 1]} : vector<18x8x48xf32> to vector<16x8x48xf32>
    %3 = vector.extract_strided_slice %0 {offsets = [2, 0, 0], sizes = [16, 8, 48], strides = [1, 1, 1]} : vector<18x8x48xf32> to vector<16x8x48xf32>
    %4 = tpu.concatenate %1, %2, %3 in 2 : vector<16x8x48xf32>, vector<16x8x48xf32>, vector<16x8x48xf32> -> vector<16x8x144xf32>
    %5 = vector.shape_cast %4 : vector<16x8x144xf32> to vector<128x144xf32>
    %6 = arith.truncf %5 : vector<128x144xf32> to vector<128x144xbf16>
    %c0_2 = arith.constant 0 : index
    %c0_3 = arith.constant 0 : index
    %7 = vector.load %arg3[%c0_2, %c0_3] : memref<144x512xbf16, #tpu.memory_space<vmem>>, vector<144x512xbf16>
    %cst = arith.constant dense<0.000000e+00> : vector<128x512xf32>
    %8 = tpu.matmul %6, %7, %cst {dimension_numbers = #tpu.dot_dimension_numbers<[1], [0], [0], [1], [0, 0, 1, 1], [], []>} : vector<128x144xbf16>, vector<144x512xbf16>, vector<128x512xf32> -> vector<128x512xf32>
    %c0_4 = arith.constant 0 : index
    %c0_5 = arith.constant 0 : index
    %9 = vector.load %arg4[%c0_4, %c0_5] : memref<1x512xf32, #tpu.memory_space<vmem>>, vector<1x512xf32>
    %10 = vector.broadcast %9 : vector<1x512xf32> to vector<128x512xf32>
    %11 = arith.addf %8, %10 : vector<128x512xf32>
    %cst_6 = arith.constant 0.000000e+00 : f32
    %12 = vector.broadcast %cst_6 : f32 to vector<128x512xf32>
    %13 = arith.maximumf %11, %12 : vector<128x512xf32>
    %14 = vector.shape_cast %13 : vector<128x512xf32> to vector<16x8x512xf32>
    %15 = vector.extract_strided_slice %14 {offsets = [0, 0, 0], sizes = [16, 8, 480], strides = [1, 1, 1]} : vector<16x8x512xf32> to vector<16x8x480xf32>
    %16 = vector.extract_strided_slice %14 {offsets = [0, 0, 32], sizes = [16, 8, 480], strides = [1, 1, 1]} : vector<16x8x512xf32> to vector<16x8x480xf32>
    %17 = arith.maximumf %15, %16 : vector<16x8x480xf32>
    %18 = vector.shape_cast %17 : vector<16x8x480xf32> to vector<8x2x8x480xf32>
    %19 = vector.extract_strided_slice %18 {offsets = [0, 0, 0, 0], sizes = [8, 1, 8, 480], strides = [1, 1, 1, 1]} : vector<8x2x8x480xf32> to vector<8x1x8x480xf32>
    %20 = vector.shape_cast %19 : vector<8x1x8x480xf32> to vector<8x8x480xf32>
    %21 = vector.extract_strided_slice %18 {offsets = [0, 1, 0, 0], sizes = [8, 1, 8, 480], strides = [1, 1, 1, 1]} : vector<8x2x8x480xf32> to vector<8x1x8x480xf32>
    %22 = vector.shape_cast %21 : vector<8x1x8x480xf32> to vector<8x8x480xf32>
    %23 = arith.maximumf %20, %22 : vector<8x8x480xf32>
    %24 = vector.extract_strided_slice %23 {offsets = [0, 0, 0], sizes = [8, 8, 32], strides = [1, 1, 1]} : vector<8x8x480xf32> to vector<8x8x32xf32>
    %25 = vector.extract_strided_slice %23 {offsets = [0, 0, 64], sizes = [8, 8, 32], strides = [1, 1, 1]} : vector<8x8x480xf32> to vector<8x8x32xf32>
    %26 = vector.extract_strided_slice %23 {offsets = [0, 0, 128], sizes = [8, 8, 32], strides = [1, 1, 1]} : vector<8x8x480xf32> to vector<8x8x32xf32>
    %27 = vector.extract_strided_slice %23 {offsets = [0, 0, 192], sizes = [8, 8, 32], strides = [1, 1, 1]} : vector<8x8x480xf32> to vector<8x8x32xf32>
    %28 = vector.extract_strided_slice %23 {offsets = [0, 0, 256], sizes = [8, 8, 32], strides = [1, 1, 1]} : vector<8x8x480xf32> to vector<8x8x32xf32>
    %29 = vector.extract_strided_slice %23 {offsets = [0, 0, 320], sizes = [8, 8, 32], strides = [1, 1, 1]} : vector<8x8x480xf32> to vector<8x8x32xf32>
    %30 = vector.extract_strided_slice %23 {offsets = [0, 0, 384], sizes = [8, 8, 32], strides = [1, 1, 1]} : vector<8x8x480xf32> to vector<8x8x32xf32>
    %31 = vector.extract_strided_slice %23 {offsets = [0, 0, 448], sizes = [8, 8, 32], strides = [1, 1, 1]} : vector<8x8x480xf32> to vector<8x8x32xf32>
    %32 = tpu.concatenate %24, %25, %26, %27, %28, %29, %30, %31 in 2 : vector<8x8x32xf32>, vector<8x8x32xf32>, vector<8x8x32xf32>, vector<8x8x32xf32>, vector<8x8x32xf32>, vector<8x8x32xf32>, vector<8x8x32xf32>, vector<8x8x32xf32> -> vector<8x8x256xf32>
    %cst_7 = arith.constant 0.000000e+00 : f32
    %33 = vector.broadcast %cst_7 : f32 to vector<1x8x256xf32>
    %34 = tpu.concatenate %33, %32, %33 in 0 : vector<1x8x256xf32>, vector<8x8x256xf32>, vector<1x8x256xf32> -> vector<10x8x256xf32>
    %35 = vector.extract_strided_slice %34 {offsets = [0, 0, 0], sizes = [8, 8, 256], strides = [1, 1, 1]} : vector<10x8x256xf32> to vector<8x8x256xf32>
    %36 = vector.extract_strided_slice %34 {offsets = [1, 0, 0], sizes = [8, 8, 256], strides = [1, 1, 1]} : vector<10x8x256xf32> to vector<8x8x256xf32>
    %37 = vector.extract_strided_slice %34 {offsets = [2, 0, 0], sizes = [8, 8, 256], strides = [1, 1, 1]} : vector<10x8x256xf32> to vector<8x8x256xf32>
    %38 = tpu.concatenate %35, %36, %37 in 2 : vector<8x8x256xf32>, vector<8x8x256xf32>, vector<8x8x256xf32> -> vector<8x8x768xf32>
    %39 = vector.shape_cast %38 : vector<8x8x768xf32> to vector<64x768xf32>
    %40 = arith.truncf %39 : vector<64x768xf32> to vector<64x768xbf16>
    %c0_8 = arith.constant 0 : index
    %c0_9 = arith.constant 0 : index
    %41 = vector.load %arg5[%c0_8, %c0_9] : memref<768x512xbf16, #tpu.memory_space<vmem>>, vector<768x512xbf16>
    %cst_10 = arith.constant dense<0.000000e+00> : vector<64x512xf32>
    %42 = tpu.matmul %40, %41, %cst_10 {dimension_numbers = #tpu.dot_dimension_numbers<[1], [0], [0], [1], [0, 0, 1, 1], [], []>} : vector<64x768xbf16>, vector<768x512xbf16>, vector<64x512xf32> -> vector<64x512xf32>
    %c0_11 = arith.constant 0 : index
    %c0_12 = arith.constant 0 : index
    %43 = vector.load %arg6[%c0_11, %c0_12] : memref<1x512xf32, #tpu.memory_space<vmem>>, vector<1x512xf32>
    %44 = vector.broadcast %43 : vector<1x512xf32> to vector<64x512xf32>
    %45 = arith.addf %42, %44 : vector<64x512xf32>
    %cst_13 = arith.constant 0.000000e+00 : f32
    %46 = vector.broadcast %cst_13 : f32 to vector<64x512xf32>
    %47 = arith.maximumf %45, %46 : vector<64x512xf32>
    %48 = vector.shape_cast %47 : vector<64x512xf32> to vector<8x8x512xf32>
    %49 = vector.extract_strided_slice %48 {offsets = [0, 0, 0], sizes = [8, 8, 448], strides = [1, 1, 1]} : vector<8x8x512xf32> to vector<8x8x448xf32>
    %50 = vector.extract_strided_slice %48 {offsets = [0, 0, 64], sizes = [8, 8, 448], strides = [1, 1, 1]} : vector<8x8x512xf32> to vector<8x8x448xf32>
    %51 = arith.maximumf %49, %50 : vector<8x8x448xf32>
    %52 = vector.shape_cast %51 : vector<8x8x448xf32> to vector<4x2x8x448xf32>
    %53 = vector.extract_strided_slice %52 {offsets = [0, 0, 0, 0], sizes = [4, 1, 8, 448], strides = [1, 1, 1, 1]} : vector<4x2x8x448xf32> to vector<4x1x8x448xf32>
    %54 = vector.shape_cast %53 : vector<4x1x8x448xf32> to vector<4x8x448xf32>
    %55 = vector.extract_strided_slice %52 {offsets = [0, 1, 0, 0], sizes = [4, 1, 8, 448], strides = [1, 1, 1, 1]} : vector<4x2x8x448xf32> to vector<4x1x8x448xf32>
    %56 = vector.shape_cast %55 : vector<4x1x8x448xf32> to vector<4x8x448xf32>
    %57 = arith.maximumf %54, %56 : vector<4x8x448xf32>
    %58 = vector.extract_strided_slice %57 {offsets = [0, 0, 0], sizes = [4, 8, 64], strides = [1, 1, 1]} : vector<4x8x448xf32> to vector<4x8x64xf32>
    %59 = vector.extract_strided_slice %57 {offsets = [0, 0, 128], sizes = [4, 8, 64], strides = [1, 1, 1]} : vector<4x8x448xf32> to vector<4x8x64xf32>
    %60 = vector.extract_strided_slice %57 {offsets = [0, 0, 256], sizes = [4, 8, 64], strides = [1, 1, 1]} : vector<4x8x448xf32> to vector<4x8x64xf32>
    %61 = vector.extract_strided_slice %57 {offsets = [0, 0, 384], sizes = [4, 8, 64], strides = [1, 1, 1]} : vector<4x8x448xf32> to vector<4x8x64xf32>
    %62 = tpu.concatenate %58, %59, %60, %61 in 2 : vector<4x8x64xf32>, vector<4x8x64xf32>, vector<4x8x64xf32>, vector<4x8x64xf32> -> vector<4x8x256xf32>
    %cst_14 = arith.constant 0.000000e+00 : f32
    %63 = vector.broadcast %cst_14 : f32 to vector<1x8x256xf32>
    %64 = tpu.concatenate %63, %62, %63 in 0 : vector<1x8x256xf32>, vector<4x8x256xf32>, vector<1x8x256xf32> -> vector<6x8x256xf32>
    %65 = vector.extract_strided_slice %64 {offsets = [0, 0, 0], sizes = [4, 8, 256], strides = [1, 1, 1]} : vector<6x8x256xf32> to vector<4x8x256xf32>
    %66 = vector.extract_strided_slice %64 {offsets = [1, 0, 0], sizes = [4, 8, 256], strides = [1, 1, 1]} : vector<6x8x256xf32> to vector<4x8x256xf32>
    %67 = vector.extract_strided_slice %64 {offsets = [2, 0, 0], sizes = [4, 8, 256], strides = [1, 1, 1]} : vector<6x8x256xf32> to vector<4x8x256xf32>
    %68 = tpu.concatenate %65, %66, %67 in 2 : vector<4x8x256xf32>, vector<4x8x256xf32>, vector<4x8x256xf32> -> vector<4x8x768xf32>
    %69 = vector.shape_cast %68 : vector<4x8x768xf32> to vector<32x768xf32>
    %70 = arith.truncf %69 : vector<32x768xf32> to vector<32x768xbf16>
    %c0_15 = arith.constant 0 : index
    %c0_16 = arith.constant 0 : index
    %71 = vector.load %arg7[%c0_15, %c0_16] : memref<768x512xbf16, #tpu.memory_space<vmem>>, vector<768x512xbf16>
    %cst_17 = arith.constant dense<0.000000e+00> : vector<32x512xf32>
    %72 = tpu.matmul %70, %71, %cst_17 {dimension_numbers = #tpu.dot_dimension_numbers<[1], [0], [0], [1], [0, 0, 1, 1], [], []>} : vector<32x768xbf16>, vector<768x512xbf16>, vector<32x512xf32> -> vector<32x512xf32>
    %c0_18 = arith.constant 0 : index
    %c0_19 = arith.constant 0 : index
    %73 = vector.load %arg8[%c0_18, %c0_19] : memref<1x512xf32, #tpu.memory_space<vmem>>, vector<1x512xf32>
    %74 = vector.broadcast %73 : vector<1x512xf32> to vector<32x512xf32>
    %75 = arith.addf %72, %74 : vector<32x512xf32>
    %cst_20 = arith.constant 0.000000e+00 : f32
    %76 = vector.broadcast %cst_20 : f32 to vector<32x512xf32>
    %77 = arith.maximumf %75, %76 : vector<32x512xf32>
    %78 = vector.shape_cast %77 : vector<32x512xf32> to vector<4x8x512xf32>
    %79 = vector.extract_strided_slice %78 {offsets = [0, 0, 0], sizes = [4, 8, 384], strides = [1, 1, 1]} : vector<4x8x512xf32> to vector<4x8x384xf32>
    %80 = vector.extract_strided_slice %78 {offsets = [0, 0, 128], sizes = [4, 8, 384], strides = [1, 1, 1]} : vector<4x8x512xf32> to vector<4x8x384xf32>
    %81 = arith.maximumf %79, %80 : vector<4x8x384xf32>
    %82 = vector.shape_cast %81 : vector<4x8x384xf32> to vector<2x2x8x384xf32>
    %83 = vector.extract_strided_slice %82 {offsets = [0, 0, 0, 0], sizes = [2, 1, 8, 384], strides = [1, 1, 1, 1]} : vector<2x2x8x384xf32> to vector<2x1x8x384xf32>
    %84 = vector.shape_cast %83 : vector<2x1x8x384xf32> to vector<2x8x384xf32>
    %85 = vector.extract_strided_slice %82 {offsets = [0, 1, 0, 0], sizes = [2, 1, 8, 384], strides = [1, 1, 1, 1]} : vector<2x2x8x384xf32> to vector<2x1x8x384xf32>
    %86 = vector.shape_cast %85 : vector<2x1x8x384xf32> to vector<2x8x384xf32>
    %87 = arith.maximumf %84, %86 : vector<2x8x384xf32>
    %88 = vector.extract_strided_slice %87 {offsets = [0, 0, 0], sizes = [2, 8, 128], strides = [1, 1, 1]} : vector<2x8x384xf32> to vector<2x8x128xf32>
    %89 = vector.extract_strided_slice %87 {offsets = [0, 0, 256], sizes = [2, 8, 128], strides = [1, 1, 1]} : vector<2x8x384xf32> to vector<2x8x128xf32>
    %90 = tpu.concatenate %88, %89 in 2 : vector<2x8x128xf32>, vector<2x8x128xf32> -> vector<2x8x256xf32>
    %91 = vector.extract_strided_slice %90 {offsets = [0, 0, 0], sizes = [1, 8, 256], strides = [1, 1, 1]} : vector<2x8x256xf32> to vector<1x8x256xf32>
    %92 = vector.shape_cast %91 : vector<1x8x256xf32> to vector<8x256xf32>
    %93 = vector.extract_strided_slice %90 {offsets = [1, 0, 0], sizes = [1, 8, 256], strides = [1, 1, 1]} : vector<2x8x256xf32> to vector<1x8x256xf32>
    %94 = vector.shape_cast %93 : vector<1x8x256xf32> to vector<8x256xf32>
    %95 = tpu.concatenate %92, %94 in 1 : vector<8x256xf32>, vector<8x256xf32> -> vector<8x512xf32>
    %96 = arith.truncf %95 : vector<8x512xf32> to vector<8x512xbf16>
    %c0_21 = arith.constant 0 : index
    %c0_22 = arith.constant 0 : index
    %97 = vector.load %arg9[%c0_21, %c0_22] : memref<512x128xbf16, #tpu.memory_space<vmem>>, vector<512x128xbf16>
    %cst_23 = arith.constant dense<0.000000e+00> : vector<8x128xf32>
    %98 = tpu.matmul %96, %97, %cst_23 {dimension_numbers = #tpu.dot_dimension_numbers<[1], [0], [0], [1], [0, 0, 1, 1], [], []>} : vector<8x512xbf16>, vector<512x128xbf16>, vector<8x128xf32> -> vector<8x128xf32>
    %c0_24 = arith.constant 0 : index
    %c0_25 = arith.constant 0 : index
    %99 = vector.load %arg10[%c0_24, %c0_25] : memref<1x128xf32, #tpu.memory_space<vmem>>, vector<1x128xf32>
    %100 = vector.broadcast %99 : vector<1x128xf32> to vector<8x128xf32>
    %101 = arith.addf %98, %100 : vector<8x128xf32>
    %cst_26 = arith.constant 0.000000e+00 : f32
    %102 = vector.broadcast %cst_26 : f32 to vector<8x128xf32>
    %103 = arith.maximumf %101, %102 : vector<8x128xf32>
    %c0_27 = arith.constant 0 : index
    %c0_28 = arith.constant 0 : index
    %104 = vector.load %arg2[%c0_27, %c0_28] : memref<8x2xf32, #tpu.memory_space<vmem>>, vector<8x2xf32>
    %105 = arith.truncf %104 : vector<8x2xf32> to vector<8x2xbf16>
    %c0_29 = arith.constant 0 : index
    %c0_30 = arith.constant 0 : index
    %106 = vector.load %arg11[%c0_29, %c0_30] : memref<2x64xbf16, #tpu.memory_space<vmem>>, vector<2x64xbf16>
    %cst_31 = arith.constant dense<0.000000e+00> : vector<8x64xf32>
    %107 = tpu.matmul %105, %106, %cst_31 {dimension_numbers = #tpu.dot_dimension_numbers<[1], [0], [0], [1], [0, 0, 1, 1], [], []>} : vector<8x2xbf16>, vector<2x64xbf16>, vector<8x64xf32> -> vector<8x64xf32>
    %c0_32 = arith.constant 0 : index
    %c0_33 = arith.constant 0 : index
    %108 = vector.load %arg12[%c0_32, %c0_33] : memref<1x64xf32, #tpu.memory_space<vmem>>, vector<1x64xf32>
    %109 = vector.broadcast %108 : vector<1x64xf32> to vector<8x64xf32>
    %110 = arith.addf %107, %109 : vector<8x64xf32>
    %cst_34 = arith.constant 0.000000e+00 : f32
    %111 = vector.broadcast %cst_34 : f32 to vector<8x64xf32>
    %112 = arith.maximumf %110, %111 : vector<8x64xf32>
    %113 = arith.truncf %103 : vector<8x128xf32> to vector<8x128xbf16>
    %c0_35 = arith.constant 0 : index
    %c0_36 = arith.constant 0 : index
    %114 = vector.load %arg13[%c0_35, %c0_36] : memref<128x128xbf16, #tpu.memory_space<vmem>>, vector<128x128xbf16>
    %cst_37 = arith.constant dense<0.000000e+00> : vector<8x128xf32>
    %115 = tpu.matmul %113, %114, %cst_37 {dimension_numbers = #tpu.dot_dimension_numbers<[1], [0], [0], [1], [0, 0, 1, 1], [], []>} : vector<8x128xbf16>, vector<128x128xbf16>, vector<8x128xf32> -> vector<8x128xf32>
    %116 = arith.truncf %112 : vector<8x64xf32> to vector<8x64xbf16>
    %c0_38 = arith.constant 0 : index
    %c0_39 = arith.constant 0 : index
    %117 = vector.load %arg14[%c0_38, %c0_39] : memref<64x128xbf16, #tpu.memory_space<vmem>>, vector<64x128xbf16>
    %cst_40 = arith.constant dense<0.000000e+00> : vector<8x128xf32>
    %118 = tpu.matmul %116, %117, %cst_40 {dimension_numbers = #tpu.dot_dimension_numbers<[1], [0], [0], [1], [0, 0, 1, 1], [], []>} : vector<8x64xbf16>, vector<64x128xbf16>, vector<8x128xf32> -> vector<8x128xf32>
    %119 = arith.addf %115, %118 : vector<8x128xf32>
    %c0_41 = arith.constant 0 : index
    %c0_42 = arith.constant 0 : index
    %120 = vector.load %arg15[%c0_41, %c0_42] : memref<1x128xf32, #tpu.memory_space<vmem>>, vector<1x128xf32>
    %121 = vector.broadcast %120 : vector<1x128xf32> to vector<8x128xf32>
    %122 = arith.addf %119, %121 : vector<8x128xf32>
    %c0_43 = arith.constant 0 : index
    %c0_44 = arith.constant 0 : index
    %123 = vector.load %arg16[%c0_43, %c0_44] : memref<8x128xf32, #tpu.memory_space<vmem>>, vector<8x128xf32>
    tpu.vector_store %arg16[%c0_43, %c0_44], %122 {strides = array<i32>} : memref<8x128xf32, #tpu.memory_space<vmem>>, vector<8x128xf32>,
    return
  }
  func.func @transform_0(%arg0: i32) -> (i32, i32, i32) {
    %c0_i32 = arith.constant 0 : i32
    %c0_i32_0 = arith.constant 0 : i32
    %c0_i32_1 = arith.constant 0 : i32
    return %c0_i32, %arg0, %c0_i32_0 : i32, i32, i32
  }
  func.func @transform_1(%arg0: i32) -> (i32, i32) {
    %c0_i32 = arith.constant 0 : i32
    %c0_i32_0 = arith.constant 0 : i32
    return %arg0, %c0_i32 : i32, i32
  }
  func.func @transform_2(%arg0: i32) -> (i32, i32) {
    %c0_i32 = arith.constant 0 : i32
    %c0_i32_0 = arith.constant 0 : i32
    %c0_i32_1 = arith.constant 0 : i32
    return %c0_i32, %c0_i32_0 : i32, i32
  }
  func.func @transform_3(%arg0: i32) -> (i32, i32) {
    %c0_i32 = arith.constant 0 : i32
    %c0_i32_0 = arith.constant 0 : i32
    %c0_i32_1 = arith.constant 0 : i32
    return %c0_i32, %c0_i32_0 : i32, i32
  }
  func.func @transform_4(%arg0: i32) -> (i32, i32) {
    %c0_i32 = arith.constant 0 : i32
    %c0_i32_0 = arith.constant 0 : i32
    %c0_i32_1 = arith.constant 0 : i32
    return %c0_i32, %c0_i32_0 : i32, i32
  }
  func.func @transform_5(%arg0: i32) -> (i32, i32) {
    %c0_i32 = arith.constant 0 : i32
    %c0_i32_0 = arith.constant 0 : i32
    %c0_i32_1 = arith.constant 0 : i32
    return %c0_i32, %c0_i32_0 : i32, i32
  }
  func.func @transform_6(%arg0: i32) -> (i32, i32) {
    %c0_i32 = arith.constant 0 : i32
    %c0_i32_0 = arith.constant 0 : i32
    %c0_i32_1 = arith.constant 0 : i32
    return %c0_i32, %c0_i32_0 : i32, i32
  }
  func.func @transform_7(%arg0: i32) -> (i32, i32) {
    %c0_i32 = arith.constant 0 : i32
    %c0_i32_0 = arith.constant 0 : i32
    %c0_i32_1 = arith.constant 0 : i32
    return %c0_i32, %c0_i32_0 : i32, i32
  }
  func.func @transform_8(%arg0: i32) -> (i32, i32) {
    %c0_i32 = arith.constant 0 : i32
    %c0_i32_0 = arith.constant 0 : i32
    %c0_i32_1 = arith.constant 0 : i32
    return %c0_i32, %c0_i32_0 : i32, i32
  }
  func.func @transform_9(%arg0: i32) -> (i32, i32) {
    %c0_i32 = arith.constant 0 : i32
    %c0_i32_0 = arith.constant 0 : i32
    %c0_i32_1 = arith.constant 0 : i32
    return %c0_i32, %c0_i32_0 : i32, i32
  }
  func.func @transform_10(%arg0: i32) -> (i32, i32) {
    %c0_i32 = arith.constant 0 : i32
    %c0_i32_0 = arith.constant 0 : i32
    %c0_i32_1 = arith.constant 0 : i32
    return %c0_i32, %c0_i32_0 : i32, i32
  }
  func.func @transform_11(%arg0: i32) -> (i32, i32) {
    %c0_i32 = arith.constant 0 : i32
    %c0_i32_0 = arith.constant 0 : i32
    %c0_i32_1 = arith.constant 0 : i32
    return %c0_i32, %c0_i32_0 : i32, i32
  }
  func.func @transform_12(%arg0: i32) -> (i32, i32) {
    %c0_i32 = arith.constant 0 : i32
    %c0_i32_0 = arith.constant 0 : i32
    %c0_i32_1 = arith.constant 0 : i32
    return %c0_i32, %c0_i32_0 : i32, i32
  }
  func.func @transform_13(%arg0: i32) -> (i32, i32) {
    %c0_i32 = arith.constant 0 : i32
    %c0_i32_0 = arith.constant 0 : i32
    %c0_i32_1 = arith.constant 0 : i32
    return %c0_i32, %c0_i32_0 : i32, i32
  }
  func.func @transform_14(%arg0: i32) -> (i32, i32) {
    %c0_i32 = arith.constant 0 : i32
    %c0_i32_0 = arith.constant 0 : i32
    %c0_i32_1 = arith.constant 0 : i32
    return %c0_i32, %c0_i32_0 : i32, i32
  }
  func.func @transform_15(%arg0: i32) -> (i32, i32) {
    %c0_i32 = arith.constant 0 : i32
    %c0_i32_0 = arith.constant 0 : i32
    return %arg0, %c0_i32 : i32, i32
  }
}

</mosaic_0001>

<bundles_post_ra>
// kernel: multi_input_model_forward.1
= control target key start
LH: loop header
LB: loop body
LE: loop exit
PB: predicated region body
PF: predicated region fallthrough
CT: control target
= control target key end

     0   :  { %s10158_s0 = inlined_call_operand.vmem [shape: f32[18,16,48], index: 0, kind: input, shape index: {}]   ;;  %s10159_s1 = inlined_call_operand.vmem [shape: f32[16,2], index: 1, kind: input, shape index: {}]   ;;  %s10160_s2 = inlined_call_operand.vmem [shape: bf16[144,512], index: 2, kind: input, shape index: {}]   ;;  %s10161_s3 = inlined_call_operand.vmem [shape: f32[1,512], index: 3, kind: input, shape index: {}]   ;;  %s10162_s4 = inlined_call_operand.hbm [shape: bf16[768,512], index: 4, kind: input, shape index: {}]   ;;  %s10163_s5 = inlined_call_operand.vmem [shape: f32[1,512], index: 5, kind: input, shape index: {}]   ;;  %s10164_s6 = inlined_call_operand.hbm [shape: bf16[768,512], index: 6, kind: input, shape index: {}]   ;;  %s10165_s7 = inlined_call_operand.vmem [shape: f32[1,512], index: 7, kind: input, shape index: {}]   ;;  %s10166_s8 = inlined_call_operand.vmem [shape: bf16[512,128], index: 8, kind: input, shape index: {}]   ;;  %s10167_s9 = inlined_call_operand.vmem [shape: f32[1,128], index: 9, kind: input, shape index: {}]   ;;  %s10168_s10 = inlined_call_operand.vmem [shape: bf16[2,64], index: 10, kind: input, shape index: {}]   ;;  %s10169_s11 = inlined_call_operand.vmem [shape: f32[1,64], index: 11, kind: input, shape index: {}]   ;;  %s10170_s12 = inlined_call_operand.vmem [shape: bf16[128,128], index: 12, kind: input, shape index: {}]   ;;  %s10171_s13 = inlined_call_operand.vmem [shape: bf16[64,128], index: 13, kind: input, shape index: {}]   ;;  %s10172_s14 = inlined_call_operand.vmem [shape: f32[1,128], index: 14, kind: input, shape index: {}]   ;;  %s10173_s15 = inlined_call_operand.vmem [shape: f32[16,128], index: 15, kind: output, shape index: {}]  }
   0x1   :  { %10291 = sst [smem:[#allocation40_spill]] %s10167_s9 }
   0x2   :  { %10292 = sst [smem:[#allocation41_spill]] %s10169_s11 }
   0x3   :  { %10293 = sst [smem:[#allocation42_spill]] %s10171_s13 }
   0x4   :  { %10294 = sst [smem:[#allocation43_spill]] %s10172_s14 }
   0x5   :  { %10295 = sst [smem:[#allocation44_spill]] %s10173_s15 }
   0x6   :  { %20 = vsyncpa [#allocation4], 0 }
   0x7   :  { %21 = vsyncpa [#allocation6], 0  ;;  %s8243_s18 = smov 0   ;;  %s8245_s19 = smov 0  }
   0x8   :  { %s8247_s20 = smov 0  }
   0x9 LB: > { %s8259_s21 = sadd.s32 4294967295, %s8151_s20   ;;  %s8262_s22 = sadd.s32 1, %s8151_s20   ;;  %s8151_s20 = sphi %s8247_s20, %s10469_s20   ;;  %s8147_s19 = sphi %s8245_s19, %s10472_s19   ;;  %s8143_s18 = sphi %s8243_s18, %s10471_s18  }
   0xa   : > { %10296 = sst [smem:[#allocation9_spill]] %s8262_s22  ;;  %s31_s23 = ssub.s32 %s8151_s20, %s8262_s22 }
   0xb   : > { %s34_s24 = sadd.s32 1, %s8147_s19  ;;  %p32_p0 = scmp.eq.s32.totalorder %s31_s23, 0 }
   0xc   : > { %p41_p1 = scmp.ne.s32.totalorder %s8147_s19, %s8143_s18  ;;  %p42_p2 = scmp.eq.s32.totalorder %s8151_s20, 0 }
   0xd   : > { %p6127_p3 = scmp.ge.s32.totalorder %s8151_s20, 1  ;;  %p383_p5 = scmp.lt.s32.totalorder %s8151_s20, 3 }
   0xe   : > { %s8272_s25 = scalar_select %p32_p0, %s8147_s19, %s34_s24  }
   0xf   : > { %p8274_p4 = por %p42_p2, %p41_p1  ;;  %p10176_p6 = scmp.eq.s32.totalorder %s8259_s21, 0 }
  0x10   : > { %10297 = sst [smem:[#allocation10_spill]] %s8272_s25  ;;  %p8280_p7 = pnand %p6127_p3, %p383_p5 }
  0x11   : > { %s10298_s26 = scalar_select %p8274_p4, 1, 0 }
  0x12   : > { %s10299_s27 = scalar_select %p8280_p7, 1, 0 }
  0x13   : > { %s8153_s28 = smov [#allocation3]   ;;  %p6876_p8 = pneg %p8280_p7 }
  0x14   : > { %s401_s29 = sshll.u32 %s8153_s28, 4  ;;  %s8154_s16 = smov [#allocation5]   ;;  %s402_s29 = int_to_ptr.vmem [resolvable:$true] %s401_s29 }
  0x15   : > { %p8288_p9 = pnand %p10176_p6, %p6876_p8  ;;  %s417_s17 = sshll.u32 %s8154_s16, 4  ;;  %s8292_s17 = int_to_ptr.vmem [resolvable:$true] %s417_s17 }
  0x16   : > { %s8065_s25 = scalar_lea.hbm %s10162_s4, 24576 }
  0x17   : > { %p8066_p10 = scmp.ne.s32.totalorder %s10162_s4, %s8065_s25  ;;  %p8067_p11 = pneg %p8288_p9 }
  0x18   : > { %p8072_p0 = scmp.lt.u32.totalorder %s8065_s25, %s10162_s4 }
  0x19   : > { %p8068_p12 = pnand %p8067_p11, %p8066_p10 }
  0x1b   : > { %p8069_p13 = pneg %p8068_p12 }
  0x1d   : > { %p8074_p1 = pnand %p8072_p0, %p8069_p13 }
  0x1f   : > { %8077 = shalt.err (!%p8074_p1)
}
  0x20   : > { %s8078_s16 = scalar_lea.vmem %s402_s29, 24576  ;;  %p8086_p8 = scmp.lt.s32.totalorder %s402_s29, %s402_s29 }
  0x21   : > { %p8079_p2 = scmp.ne.s32.totalorder %s402_s29, %s8078_s16  ;;  %p8087_p6 = scmp.lt.s32.totalorder %s8078_s16, %s8078_s16 }
  0x23   : > { %p8081_p3 = pnand %p8079_p2, %p8067_p11  ;;  %p8088_p7 = por %p8087_p6, %p8086_p8 }
  0x25   : > { %p8082_p5 = pneg %p8081_p3 }
  0x27   : > { %p8089_p4 = pnand %p8088_p7, %p8082_p5 }
  0x29   : > { %8092 = shalt.err (!%p8089_p4)
}
  0x2a   : > { %s8155_s22 = smov 256   ;;  %s8156_s23 = smov 16  }
  0x2b   : > { %6879 = dma.hbm_to_vmem [thread:$0]  (!%p8288_p9), %s10162_s4, 24576, %s402_s29, [#allocation4], %s8155_s22, %s8155_s22, %s8156_s23  }
  0x2c   : > { %s8093_s28 = scalar_lea.hbm %s10164_s6, 24576 }
  0x2d   : > { %p8094_p10 = scmp.ne.s32.totalorder %s10164_s6, %s8093_s28  ;;  %p8100_p7 = scmp.lt.u32.totalorder %s8093_s28, %s10164_s6 }
  0x2f   : > { %p8096_p4 = pnand %p8094_p10, %p8067_p11 }
  0x31   : > { %p8097_p6 = pneg %p8096_p4 }
  0x33   : > { %p8102_p12 = pnand %p8100_p7, %p8097_p6 }
  0x35   : > { %8105 = shalt.err (!%p8102_p12)
}
  0x36   : > { %s8106_s29 = scalar_lea.vmem %s8292_s17, 24576  ;;  %p8114_p2 = scmp.lt.s32.totalorder %s8292_s17, %s8292_s17 }
  0x37   : > { %p8107_p13 = scmp.ne.s32.totalorder %s8292_s17, %s8106_s29  ;;  %p8115_p3 = scmp.lt.s32.totalorder %s8106_s29, %s8106_s29 }
  0x39   : > { %p8109_p0 = pnand %p8107_p13, %p8067_p11  ;;  %p8116_p5 = por %p8115_p3, %p8114_p2 }
  0x3b   : > { %p8110_p1 = pneg %p8109_p0 }
  0x3d   : > { %p8117_p8 = pnand %p8116_p5, %p8110_p1 }
  0x3f   : > { %8120 = shalt.err (!%p8117_p8)
}
  0x40   : > { %6882 = dma.hbm_to_vmem [thread:$0]  (!%p8288_p9), %s10164_s6, 24576, %s8292_s17, [#allocation6], %s8155_s22, %s8155_s22, %s8156_s23  }
  0x41   : > { %p6130_p10 = scmp.ge.s32.totalorder %s8151_s20, 2 }
  0x42   : > { %p10301_p4 = scmp.ne.s32.totalorder (!%p6130_p10), %s10298_s26, 0 }
  0x43   : > { %451 = sbr.rel (%p6130_p10) target bundleno = 87 (0x57), region = 68 }
  0x4a   : > { %454 = sbr.rel (!%p10301_p4) target bundleno = 87 (0x57), region = 72  ;;  %s456_s13 = sand.u32 (%p10301_p4), 1, %s8147_s19  }
  0x4b   : > { %s6131_s14 = sshll.u32 (%p10301_p4), %s8151_s20, 3  ;;  %s6866_s15 = smul.u32 (%p10301_p4), 144, %s456_s13 }
  0x4c   : > { %s8349_s30 = scalar_lea.vmem (%p10301_p4), %s10158_s0, %s6131_s14 }
  0x4d   : > { %v522_v0 = vld [vmem:[%s8349_s30] sm:$0xff] (%p10301_p4)  ;;  %v524_v1 = vld [vmem:[%s8349_s30 + $0x10] sm:$0xff] (%p10301_p4)  ;;  %s458_s20 = scalar_lea.vmem (%p10301_p4), [#allocation2], %s6866_s15 }
  0x4e   : > { %v526_v2 = vld [vmem:[%s8349_s30 + $0x20] sm:$0xff] (%p10301_p4)  ;;  %v528_v3 = vld [vmem:[%s8349_s30 + $0x30] sm:$0xff] (%p10301_p4)  ;;  %523 = vst [vmem:[%s458_s20] sm:$0xff] (%p10301_p4), %v522_v0  ;;  %525 = vst [vmem:[%s458_s20 + $0x8] sm:$0xff] (%p10301_p4), %v524_v1 }
  0x4f   : > { %v530_v4 = vld [vmem:[%s8349_s30 + $0x40] sm:$0xff] (%p10301_p4)  ;;  %v532_v5 = vld [vmem:[%s8349_s30 + $0x50] sm:$0xff] (%p10301_p4)  ;;  %527 = vst [vmem:[%s458_s20 + $0x10] sm:$0xff] (%p10301_p4), %v526_v2  ;;  %529 = vst [vmem:[%s458_s20 + $0x18] sm:$0xff] (%p10301_p4), %v528_v3 }
  0x50   : > { %531 = vst [vmem:[%s458_s20 + $0x20] sm:$0xff] (%p10301_p4), %v530_v4  ;;  %533 = vst [vmem:[%s458_s20 + $0x28] sm:$0xff] (%p10301_p4), %v532_v5  ;;  %v534_v6 = vld [vmem:[%s8349_s30 + $0x60] sm:$0xff] (%p10301_p4)  ;;  %v536_v7 = vld [vmem:[%s8349_s30 + $0x70] sm:$0xff] (%p10301_p4) }
  0x51   : > { %v538_v8 = vld [vmem:[%s8349_s30 + $0x80] sm:$0xff]  ;;  %535 = vst [vmem:[%s458_s20 + $0x30] sm:$0xff] %v534_v6  ;;  %537 = vst [vmem:[%s458_s20 + $0x38] sm:$0xff] %v536_v7  ;;  %v540_v9 = vld [vmem:[%s8349_s30 + $0x90] sm:$0xff] }
  0x52   : > { %539 = vst [vmem:[%s458_s20 + $0x40] sm:$0xff] %v538_v8  ;;  %v542_v10 = vld [vmem:[%s8349_s30 + $0xa0] sm:$0xff]  ;;  %v544_v11 = vld [vmem:[%s8349_s30 + $0xb0] sm:$0xff]  ;;  %541 = vst [vmem:[%s458_s20 + $0x48] sm:$0xff] %v540_v9 }
  0x53   : > { %543 = vst [vmem:[%s458_s20 + $0x50] sm:$0xff] %v542_v10  ;;  %545 = vst [vmem:[%s458_s20 + $0x58] sm:$0xff] %v544_v11  ;;  %v546_v12 = vld [vmem:[%s8349_s30 + $0xc0] sm:$0xff]  ;;  %v548_v13 = vld [vmem:[%s8349_s30 + $0xd0] sm:$0xff] }
  0x54   : > { %v550_v14 = vld [vmem:[%s8349_s30 + $0xe0] sm:$0xff]  ;;  %547 = vst [vmem:[%s458_s20 + $0x60] sm:$0xff] %v546_v12  ;;  %549 = vst [vmem:[%s458_s20 + $0x68] sm:$0xff] %v548_v13  ;;  %v552_v15 = vld [vmem:[%s8349_s30 + $0xf0] sm:$0xff] }
  0x55   : > { %551 = vst [vmem:[%s458_s20 + $0x70] sm:$0xff] %v550_v14  ;;  %v554_v16 = vld [vmem:[%s8349_s30 + $0x100] sm:$0xff]  ;;  %v556_v17 = vld [vmem:[%s8349_s30 + $0x110] sm:$0xff]  ;;  %553 = vst [vmem:[%s458_s20 + $0x78] sm:$0xff] %v552_v15 }
  0x56   : > { %555 = vst [vmem:[%s458_s20 + $0x80] sm:$0xff] %v554_v16  ;;  %557 = vst [vmem:[%s458_s20 + $0x88] sm:$0xff] %v556_v17 }
  0x57 PF: > { %p10302_p9 = scmp.ne.s32.totalorder %s10299_s27, 0 }
  0x59   : > { %573 = sbr.rel (%p10302_p9) target bundleno = 2142 (0x85e), region = 114 }
  0x60   : > { %s576_s26 = sand.u32 1, %s8143_s18   ;;  %p10303_p11 = scmp.eq.s32.totalorder %s8259_s21, 0 }
  0x61   : > { %s6867_s17 = smul.u32 144, %s576_s26 }
  0x63   : > { %s8372_s22 = scalar_lea.vmem [#allocation2], %s6867_s17 }
  0x64   : > { %8134 = dma.done.wait (%p10303_p11), [#allocation4], 24576   ;;  %p10304_p6 = pmov %p10303_p11 }
  0x66   : > { %8136 = vsyncadd (%p10304_p6), [#allocation4], 4294942720  ;;  %p10305_p7 = pmov %p10304_p6 }
  0x67   : > { %p10306_p12 = pmov %p10304_p6 }
  0x68   : > { %8138 = dma.done.wait (%p10305_p7), [#allocation6], 24576  }
  0x69   : > { %8140 = vsyncadd (%p10306_p12), [#allocation6], 4294942720  ;;  %v8383_v18 = vld [vmem:[%s8372_s22 + $0x8] sm:$0xff]  ;;  %v8386_v19 = vld [vmem:[%s8372_s22 + $0x10] sm:$0xff]  ;;  %s8157_s18 = smov 48   ;;  %s8158_s29 = smov 96  }
  0x6a   : > { %v8389_v20 = vld [vmem:[%s8372_s22 + $0x18] sm:$0xff]  ;;  %v6921_v21 = vpack.i.bf16 %v8386_v19, %v8383_v18  ;;  %v8394_v22 = vld [vmem:[%s8372_s22 + $0x20] sm:$0xff]  ;;  %v8397_v23 = vld [vmem:[%s8372_s22 + $0x28] sm:$0xff]  ;;  %vm774_vm0 = vcmask 392192   ;;  %vm791_vm1 = vcmask 785408   ;;  %vm1062_vm2 = vcmask 130048  }
  0x6b   : > { %v6931_v24 = vpack.i.bf16 %v8394_v22, %v8389_v20  ;;  %v6926_v25 = vpack.i.bf16 %v8389_v20, %v8386_v19  ;;  %v6936_v26 = vpack.i.bf16 %v8397_v23, %v8394_v22  ;;  %v649_v27 = vld [vmem:[%s8372_s22 + $0x30] sm:$0xff]  ;;  %v650_v28 = vld [vmem:[%s8372_s22 + $0x38] sm:$0xff]  ;;  %v651_v30 = vld [vmem:[%s8372_s22 + $0x40] sm:$0xff]  ;;  %s8159_s20 = smov 64   ;;  %s8160_s26 = smov 32   ;;  %vm1953_vm3 = vcmask 261120  }
  0x6c   : > { %6922 = vrot.lane.b32.xlu0 %v6921_v21, %s8157_s18  ;;  %v7381_v29 = vld [vmem:[%s10160_s2 + $0x4] ss:$16 sps:$4 sm:$0xff]   ;;  %v7383_v31 = vld [vmem:[%s10160_s2 + $0xc] ss:$16 sps:$4 sm:$0xff]   ;;  %v6941_v32 = vpack.i.bf16 %v649_v27, %v8397_v23  ;;  %v7385_v34 = vld [vmem:[%s10160_s2] ss:$16 sps:$4 sm:$0xff]   ;;  %v6946_v36 = vpack.i.bf16 %v650_v28, %v649_v27  ;;  %v6951_v42 = vpack.i.bf16 %v651_v30, %v650_v28 }
  0x6d   : > { %6932 = vrot.lane.b32.xlu1 %v6931_v24, %s8157_s18  ;;  %v652_v33 = vld [vmem:[%s8372_s22 + $0x48] sm:$0xff]  ;;  %1087 = vmatprep.subr.bf16.mxu0 %v7381_v29  ;;  %v7387_v37 = vld [vmem:[%s10160_s2 + $0x24] ss:$16 sps:$4 sm:$0xff]   ;;  %v7391_v39 = vld [vmem:[%s10160_s2 + $0x20] ss:$16 sps:$4 sm:$0xff]   ;;  %vm1962_vm4 = vcmask 523264  }
  0x6e   : > { %v7386_v35 = vld [vmem:[%s10160_s2 + $0x8] ss:$16 sps:$4 sm:$0xff]   ;;  %1200 = vmatprep.subr.bf16.mxu1 %v7383_v31  ;;  %1088 = vmatpush1.bf16.msra.mxu0 %v7385_v34  ;;  %v7389_v38 = vld [vmem:[%s10160_s2 + $0x2c] ss:$16 sps:$4 sm:$0xff]   ;;  %v653_v40 = vld [vmem:[%s8372_s22 + $0x50] sm:$0xff]  ;;  %v6956_v45 = vpack.i.bf16 %v652_v33, %v651_v30  ;;  %p634_p13 = scmp.lt.s32.totalorder %s8259_s21, 1 }
  0x6f   : > { %1201 = vmatpush1.bf16.msra.mxu1 %v7386_v35  ;;  %1089 = vmatprep.subr.bf16.mxu0 %v7387_v37  ;;  %v7392_v41 = vld [vmem:[%s10160_s2 + $0x28] ss:$16 sps:$4 sm:$0xff]   ;;  %v7393_v44 = vld [vmem:[%s10160_s2 + $0x44] ss:$16 sps:$4 sm:$0xff]   ;;  %v7395_v46 = vld [vmem:[%s10160_s2 + $0x4c] ss:$16 sps:$4 sm:$0xff]   ;;  %v6961_v51 = vpack.i.bf16 %v653_v40, %v652_v33 }
  0x70   : > { %6927 = vrot.lane.b32.xlu0 %v6926_v25, %s8158_s29  ;;  %v654_v43 = vld [vmem:[%s8372_s22 + $0x58] sm:$0xff]  ;;  %1202 = vmatprep.subr.bf16.mxu1 %v7389_v38  ;;  %v7397_v47 = vld [vmem:[%s10160_s2 + $0x40] ss:$16 sps:$4 sm:$0xff]   ;;  %v7399_v49 = vld [vmem:[%s10160_s2 + $0x64] ss:$16 sps:$4 sm:$0xff]   ;;  %s10474_s21 = smov (!%p634_p13, %s8259_s21), 1 }
  0x71   : > { %6937 = vrot.lane.b32.xlu1 %v6936_v26, %s8158_s29  ;;  %v7398_v48 = vld [vmem:[%s10160_s2 + $0x48] ss:$16 sps:$4 sm:$0xff]   ;;  %v7401_v50 = vld [vmem:[%s10160_s2 + $0x6c] ss:$16 sps:$4 sm:$0xff]   ;;  %v655_v52 = vld [vmem:[%s8372_s22 + $0x60] sm:$0xff]  ;;  %v6966_v54 = vpack.i.bf16 %v654_v43, %v653_v40  ;;  %vm8162_vm5 = vmmov 0  }
  0x72   : > { %1090 = vmatpush1.bf16.msra.mxu0 %v7391_v39  ;;  %v656_v53 = vld [vmem:[%s8372_s22 + $0x68] sm:$0xff]  ;;  %v7403_v55 = vld [vmem:[%s10160_s2 + $0x60] ss:$16 sps:$4 sm:$0xff]   ;;  %v7405_v57 = vld [vmem:[%s10160_s2 + $0x84] ss:$16 sps:$4 sm:$0xff]   ;;  %v6971_v59 = vpack.i.bf16 %v655_v52, %v654_v43  ;;  %vm5797_vm6 = vcmask 1040384  }
  0x73   : > { %1203 = vmatpush1.bf16.msra.mxu1 %v7392_v41  ;;  %1091 = vmatprep.subr.bf16.mxu0 %v7393_v44  ;;  %v7404_v56 = vld [vmem:[%s10160_s2 + $0x68] ss:$16 sps:$4 sm:$0xff]   ;;  %v7407_v58 = vld [vmem:[%s10160_s2 + $0x8c] ss:$16 sps:$4 sm:$0xff]   ;;  %v657_v60 = vld [vmem:[%s8372_s22 + $0x70] sm:$0xff]  ;;  %v6976_v61 = vpack.i.bf16 %v656_v53, %v655_v52  ;;  %s6135_s27 = sshll.u32 %s10474_s21, 3 }
  0x74   : > { %6942 = vrot.lane.b32.xlu0 %v6941_v32, %s8157_s18  ;;  %1204 = vmatprep.subr.bf16.mxu1 %v7395_v46  ;;  %v658_v62 = vld [vmem:[%s8372_s22 + $0x78] sm:$0xff]  ;;  %v7409_v63 = vld [vmem:[%s10160_s2 + $0x80] ss:$16 sps:$4 sm:$0xff]   ;;  %v7411_v1 = vld [vmem:[%s10160_s2 + $0xa4] ss:$16 sps:$4 sm:$0xff]   ;;  %v6981_v3 = vpack.i.bf16 %v657_v60, %v656_v53  ;;  %s637_s16 = scalar_lea.vmem %s10159_s1, %s6135_s27  ;;  %vm5793_vm7 = vcmask 15360  }
  0x75   : > { %6947 = vrot.lane.b32.xlu1 %v6946_v36, %s8158_s29  ;;  %v7410_v0 = vld [vmem:[%s10160_s2 + $0x88] ss:$16 sps:$4 sm:$0xff]   ;;  %v7413_v2 = vld [vmem:[%s10160_s2 + $0xac] ss:$16 sps:$4 sm:$0xff]   ;;  %v6986_v4 = vpack.i.bf16 %v658_v62, %v657_v60  ;;  %v7415_v5 = vld [vmem:[%s10160_s2 + $0xa0] ss:$16 sps:$4 sm:$0xff]  }
  0x76   : > { %1092 = vmatpush1.bf16.msra.mxu0 %v7397_v47  ;;  %v7416_v6 = vld [vmem:[%s10160_s2 + $0xa8] ss:$16 sps:$4 sm:$0xff]   ;;  %v7417_v7 = vld [vmem:[%s10160_s2 + $0xc4] ss:$16 sps:$4 sm:$0xff]   ;;  %v7419_v8 = vld [vmem:[%s10160_s2 + $0xcc] ss:$16 sps:$4 sm:$0xff]  }
  0x77   : > { %1205 = vmatpush1.bf16.msra.mxu1 %v7398_v48  ;;  %1093 = vmatprep.subr.bf16.mxu0 %v7399_v49  ;;  %v7421_v9 = vld [vmem:[%s10160_s2 + $0xc0] ss:$16 sps:$4 sm:$0xff]   ;;  %v7422_v10 = vld [vmem:[%s10160_s2 + $0xc8] ss:$16 sps:$4 sm:$0xff]   ;;  %v7423_v11 = vld [vmem:[%s10160_s2 + $0xe4] ss:$16 sps:$4 sm:$0xff]  }
  0x78   : > { %6952 = vrot.lane.b32.xlu0 %v6951_v42, %s8157_s18  ;;  %1206 = vmatprep.subr.bf16.mxu1 %v7401_v50  ;;  %v7425_v12 = vld [vmem:[%s10160_s2 + $0xec] ss:$16 sps:$4 sm:$0xff]   ;;  %v659_v13 = vld [vmem:[%s8372_s22 + $0x80] sm:$0xff]  ;;  %v7428_v21 = vld [vmem:[%s10160_s2 + $0xe8] ss:$16 sps:$4 sm:$0xff]   ;;  %s10465_s30 = sld [smem:[#allocation40_spill]] }
  0x79   : > { %6957 = vrot.lane.b32.xlu1 %v6956_v45, %s8158_s29  ;;  %v660_v14 = vld [vmem:[%s8372_s22 + $0x88] sm:$0xff]  ;;  %v6991_v15 = vpack.i.bf16 %v659_v13, %v658_v62  ;;  %v7427_v17 = vld [vmem:[%s10160_s2 + $0xe0] ss:$16 sps:$4 sm:$0xff]   ;;  %v7429_v24 = vld [vmem:[%s10160_s2 + $0x104] ss:$16 sps:$4 sm:$0xff]   ;;  %s10467_s23 = sld [smem:[#allocation43_spill]] }
  0x7a   : > { %1094 = vmatpush1.bf16.msra.mxu0 %v7403_v55  ;;  %v6996_v16 = vpack.i.bf16 %v660_v14, %v659_v13  ;;  %v7431_v25 = vld [vmem:[%s10160_s2 + $0x10c] ss:$16 sps:$4 sm:$0xff]   ;;  %v7433_v26 = vld [vmem:[%s10160_s2 + $0x100] ss:$16 sps:$4 sm:$0xff]   ;;  %v7434_v27 = vld [vmem:[%s10160_s2 + $0x108] ss:$16 sps:$4 sm:$0xff]  }
  0x7b   : > { %1207 = vmatpush1.bf16.msra.mxu1 %v7404_v56  ;;  %1095 = vmatprep.subr.bf16.mxu0 %v7405_v57  ;;  %v643_v29 = vld [vmem:[%s8372_s22] sm:$0xff]  ;;  %s10468_s9 = sld [smem:[#allocation44_spill]] }
  0x7c   : > { %6962 = vrot.lane.b32.xlu0 %v6961_v51, %s8157_s18  ;;  %1208 = vmatprep.subr.bf16.mxu1 %v7407_v58 }
  0x7d   : > { %6967 = vrot.lane.b32.xlu1 %v6966_v54, %s8158_s29 }
  0x7e   : > { %1096 = vmatpush1.bf16.msra.mxu0 %v7409_v63 }
  0x7f   : > { %1209 = vmatpush1.bf16.msra.mxu1 %v7410_v0  ;;  %1097 = vmatprep.subr.bf16.mxu0 %v7411_v1 }
  0x80   : > { %6972 = vrot.lane.b32.xlu0 %v6971_v59, %s8157_s18  ;;  %1210 = vmatprep.subr.bf16.mxu1 %v7413_v2 }
  0x81   : > { %6977 = vrot.lane.b32.xlu1 %v6976_v61, %s8158_s29  ;;  %s641_s11 = scalar_lea.vmem %s10468_s9, %s6135_s27 }
  0x82   : > { %1098 = vmatpush1.bf16.msra.mxu0 %v7415_v5  ;;  %v8056_v5 = vld [vmem:[%s8372_s22 + $0x30] sm:$0xff] }
  0x83   : > { %1211 = vmatpush1.bf16.msra.mxu1 %v7416_v6  ;;  %1099 = vmatprep.subr.bf16.mxu0 %v7417_v7 }
  0x84   : > { %6982 = vrot.lane.b32.xlu0 %v6981_v3, %s8157_s18  ;;  %1212 = vmatprep.subr.bf16.mxu1 %v7419_v8 }
  0x85   : > { %6987 = vrot.lane.b32.xlu1 %v6986_v4, %s8158_s29 }
  0x86   : > { %1100 = vmatpush1.bf16.msra.mxu0 %v7421_v9 }
  0x87   : > { %1213 = vmatpush1.bf16.msra.mxu1 %v7422_v10  ;;  %1101 = vmatprep.subr.bf16.mxu0 %v7423_v11 }
  0x88   : > { %6992 = vrot.lane.b32.xlu0 %v6991_v15, %s8157_s18  ;;  %1214 = vmatprep.subr.bf16.mxu1 %v7425_v12 }
  0x89   : > { %6997 = vrot.lane.b32.xlu1 %v6996_v16, %s8158_s29 }
  0x8a   : > { %1102 = vmatpush1.bf16.msra.mxu0 %v7427_v17  ;;  %v8057_v17 = vld [vmem:[%s8372_s22 + $0x48] sm:$0xff] }
  0x8b   : > { %1215 = vmatpush1.bf16.msra.mxu1 %v7428_v21  ;;  %1103 = vmatprep.subr.bf16.mxu0 %v7429_v24  ;;  %v8058_v24 = vld [vmem:[%s8372_s22 + $0x40] sm:$0xff] }
  0x8c   : > { %1216 = vmatprep.subr.bf16.mxu1 %v7431_v25 }
  0x8e   : > { %1104 = vmatpush1.bf16.msra.mxu0 %v7433_v26 }
  0x8f   : > { %1217 = vmatpush1.bf16.msra.mxu1 %v7434_v27 }
  0xde   : > { %v6923_v28 = vpop.permute.xlu0 %6922 }
  0xdf   : > { %v6933_v30 = vpop.permute.xlu1 %6932  ;;  %v6925_v31 = vunpack.i.h.bf16 %v6923_v28  ;;  %v6924_v32 = vunpack.i.l.bf16 %v6923_v28 }
  0xe0   : > { %v6935_v34 = vunpack.i.h.bf16 %v6933_v30  ;;  %v6934_v35 = vunpack.i.l.bf16 %v6933_v30 }
  0xe1   : > { %v776_v39 = vsel %vm774_vm0, %v8383_v18, %v6925_v31  ;;  %v775_v40 = vsel %vm774_vm0, %v643_v29, %v6924_v32 }
  0xe2   : > { %v6928_v33 = vpop.permute.xlu0 %6927  ;;  %v778_v46 = vsel %vm774_vm0, %v8389_v20, %v6935_v34  ;;  %v777_v47 = vsel %vm774_vm0, %v8386_v19, %v6934_v35 }
  0xe3   : > { %v6930_v36 = vunpack.i.h.bf16 %v6928_v33  ;;  %v6929_v37 = vunpack.i.l.bf16 %v6928_v33  ;;  %v6938_v38 = vpop.permute.xlu1 %6937 }
  0xe4   : > { %v6940_v41 = vunpack.i.h.bf16 %v6938_v38  ;;  %v6939_v42 = vunpack.i.l.bf16 %v6938_v38  ;;  %v8060_v38 = vld [vmem:[%s8372_s22 + $0x50] sm:$0xff] }
  0xe5   : > { %v809_v43 = vpack.c.bf16 %v6930_v36, %v6929_v37  ;;  %v792_v44 = vsel %vm791_vm1, %v775_v40, %v6929_v37  ;;  %v793_v45 = vsel %vm791_vm1, %v776_v39, %v6930_v36  ;;  %v8059_v36 = vld [vmem:[%s8372_s22 + $0x58] sm:$0xff] }
  0xe6   : > { %v808_v48 = vpack.c.bf16 %v793_v45, %v792_v44  ;;  %v811_v49 = vpack.c.bf16 %v6940_v41, %v6939_v42  ;;  %v6943_v18 = vpop.permute.xlu0 %6942  ;;  %v794_v51 = vsel %vm791_vm1, %v777_v47, %v6939_v42  ;;  %v795_v52 = vsel %vm791_vm1, %v778_v46, %v6940_v41 }
  0xe7   : > { %6173 = vmatprep.mubr.msk.bf16.mxu0 %vm1062_vm2, %v809_v43  ;;  %6181 = vmatprep.mubr.msk.bf16.mxu1 %vm1062_vm2, %v809_v43  ;;  %v6948_v50 = vpop.permute.xlu1 %6947  ;;  %v6945_v19 = vunpack.i.h.bf16 %v6943_v18  ;;  %v6944_v54 = vunpack.i.l.bf16 %v6943_v18  ;;  %v810_v55 = vpack.c.bf16 %v795_v52, %v794_v51  ;;  %v8061_v18 = vld [vmem:[%s8372_s22 + $0x68] sm:$0xff]  ;;  %v8062_v51 = vld [vmem:[%s8372_s22 + $0x60] sm:$0xff] }
  0xe8   : > { %1120 = vmatmul.mubr.bf16.vlgmr.msra.gmra.mrb[0].mxu0 %v808_v48  ;;  %1233 = vmatmul.mubr.bf16.vlgmr.msra.gmra.mrb[0].mxu1 %v808_v48  ;;  %v6950_v20 = vunpack.i.h.bf16 %v6948_v50  ;;  %v6949_v53 = vunpack.i.l.bf16 %v6948_v50 }
  0xe9   : > { %6182 = vmatprep.mubr.msk.bf16.mxu1 %vm1062_vm2, %v811_v49  ;;  %6174 = vmatprep.mubr.msk.bf16.mxu0 %vm1062_vm2, %v811_v49  ;;  %v780_v57 = vsel %vm774_vm0, %v8397_v23, %v6945_v19  ;;  %v779_v58 = vsel %vm774_vm0, %v8394_v22, %v6944_v54  ;;  %v8055_v22 = vld [vmem:[%s8372_s22 + $0x38] sm:$0xff] }
  0xea   : > { %v813_v56 = vpack.c.bf16 %v6950_v20, %v6949_v53  ;;  %v6953_v60 = vpop.permute.xlu0 %6952  ;;  %v796_v61 = vsel %vm791_vm1, %v779_v58, %v6949_v53  ;;  %v797_v62 = vsel %vm791_vm1, %v780_v57, %v6950_v20 }
  0xeb   : > { %v6958_v59 = vpop.permute.xlu1 %6957  ;;  %v6955_v23 = vunpack.i.h.bf16 %v6953_v60  ;;  %v6954_v1 = vunpack.i.l.bf16 %v6953_v60  ;;  %v812_v2 = vpack.c.bf16 %v797_v62, %v796_v61  ;;  %v8063_v61 = vld [vmem:[%s8372_s22 + $0x78] sm:$0xff] }
  0xec   : > { %v6960_v63 = vunpack.i.h.bf16 %v6958_v59  ;;  %v6959_v0 = vunpack.i.l.bf16 %v6958_v59 }
  0xed   : > { %v782_v4 = vsel %vm774_vm0, %v8055_v22, %v6955_v23  ;;  %v781_v6 = vsel %vm774_vm0, %v8056_v5, %v6954_v1 }
  0xee   : > { %v815_v3 = vpack.c.bf16 %v6960_v63, %v6959_v0  ;;  %v6963_v8 = vpop.permute.xlu0 %6962  ;;  %v798_v9 = vsel %vm791_vm1, %v781_v6, %v6959_v0  ;;  %v799_v10 = vsel %vm791_vm1, %v782_v4, %v6960_v63  ;;  %v8064_v63 = vld [vmem:[%s8372_s22 + $0x70] sm:$0xff] }
  0xef   : > { %v6968_v7 = vpop.permute.xlu1 %6967  ;;  %v6965_v13 = vunpack.i.h.bf16 %v6963_v8  ;;  %v6964_v14 = vunpack.i.l.bf16 %v6963_v8  ;;  %v814_v15 = vpack.c.bf16 %v799_v10, %v798_v9  ;;  %v860_v6 = vld [vmem:[%s10161_s3] sm:$0xf] }
  0xf0   : > { %1243 = vmatmul.mubr.bf16.gmra.mrb[4].mxu1 %v810_v55  ;;  %1130 = vmatmul.mubr.bf16.gmra.mrb[4].mxu0 %v810_v55  ;;  %v6970_v11 = vunpack.i.h.bf16 %v6968_v7  ;;  %v6969_v12 = vunpack.i.l.bf16 %v6968_v7 }
  0xf1   : > { %6183 = vmatprep.mubr.msk.bf16.mxu1 %vm1062_vm2, %v813_v56  ;;  %6175 = vmatprep.mubr.msk.bf16.mxu0 %vm1062_vm2, %v813_v56  ;;  %v784_v21 = vsel %vm774_vm0, %v8057_v17, %v6965_v13  ;;  %v783_v25 = vsel %vm774_vm0, %v8058_v24, %v6964_v14 }
  0xf2   : > { %v817_v16 = vpack.c.bf16 %v6970_v11, %v6969_v12  ;;  %v6973_v27 = vpop.permute.xlu0 %6972  ;;  %v800_v28 = vsel %vm791_vm1, %v783_v25, %v6969_v12  ;;  %v801_v29 = vsel %vm791_vm1, %v784_v21, %v6970_v11 }
  0xf3   : > { %v6978_v26 = vpop.permute.xlu1 %6977  ;;  %v6975_v32 = vunpack.i.h.bf16 %v6973_v27  ;;  %v6974_v33 = vunpack.i.l.bf16 %v6973_v27  ;;  %v816_v34 = vpack.c.bf16 %v801_v29, %v800_v28 }
  0xf4   : > { %v6980_v30 = vunpack.i.h.bf16 %v6978_v26  ;;  %v6979_v31 = vunpack.i.l.bf16 %v6978_v26 }
  0xf5   : > { %v786_v37 = vsel %vm774_vm0, %v8059_v36, %v6975_v32  ;;  %v785_v39 = vsel %vm774_vm0, %v8060_v38, %v6974_v33 }
  0xf6   : > { %v819_v35 = vpack.c.bf16 %v6980_v30, %v6979_v31  ;;  %v6983_v41 = vpop.permute.xlu0 %6982  ;;  %v802_v42 = vsel %vm791_vm1, %v785_v39, %v6979_v31  ;;  %v803_v43 = vsel %vm791_vm1, %v786_v37, %v6980_v30 }
  0xf7   : > { %v6988_v40 = vpop.permute.xlu1 %6987  ;;  %v6985_v46 = vunpack.i.h.bf16 %v6983_v41  ;;  %v6984_v47 = vunpack.i.l.bf16 %v6983_v41  ;;  %v818_v48 = vpack.c.bf16 %v803_v43, %v802_v42 }
  0xf8   : > { %1253 = vmatmul.mubr.bf16.gmra.mrb[8].mxu1 %v812_v2  ;;  %1140 = vmatmul.mubr.bf16.gmra.mrb[8].mxu0 %v812_v2  ;;  %v6990_v44 = vunpack.i.h.bf16 %v6988_v40  ;;  %v6989_v45 = vunpack.i.l.bf16 %v6988_v40 }
  0xf9   : > { %6184 = vmatprep.mubr.msk.bf16.mxu1 %vm1062_vm2, %v815_v3  ;;  %6176 = vmatprep.mubr.msk.bf16.mxu0 %vm1062_vm2, %v815_v3  ;;  %v788_v50 = vsel %vm774_vm0, %v8061_v18, %v6985_v46  ;;  %v787_v52 = vsel %vm774_vm0, %v8062_v51, %v6984_v47  ;;  %v862_v3 = vlaneseq }
  0xfa   : > { %v821_v49 = vpack.c.bf16 %v6990_v44, %v6989_v45  ;;  %v6993_v53 = vpop.permute.xlu0 %6992  ;;  %v804_v19 = vsel %vm791_vm1, %v787_v52, %v6989_v45  ;;  %v805_v54 = vsel %vm791_vm1, %v788_v50, %v6990_v44 }
  0xfb   : > { %v6998_v20 = vpop.permute.xlu1 %6997  ;;  %v6995_v57 = vunpack.i.h.bf16 %v6993_v53  ;;  %v6994_v58 = vunpack.i.l.bf16 %v6993_v53  ;;  %v820_v59 = vpack.c.bf16 %v805_v54, %v804_v19  ;;  %v863_v22 = vshrl.u32 %v862_v3, 7 }
  0xfc   : > { %v7000_v55 = vunpack.i.h.bf16 %v6998_v20  ;;  %v6999_v56 = vunpack.i.l.bf16 %v6998_v20 }
  0xfd   : > { %v790_v62 = vsel %vm774_vm0, %v8063_v61, %v6995_v57  ;;  %v789_v0 = vsel %vm774_vm0, %v8064_v63, %v6994_v58  ;;  %v8606_v4 = vsub.s32 0, %v863_v22  ;;  %v8608_v5 = vsub.s32 2, %v863_v22 }
  0xfe   : > { %v823_v60 = vpack.c.bf16 %v7000_v55, %v6999_v56  ;;  %v806_v23 = vsel %vm791_vm1, %v789_v0, %v6999_v56  ;;  %v807_v1 = vsel %vm791_vm1, %v790_v62, %v7000_v55  ;;  %v8613_v7 = vsub.s32 1, %v863_v22 }
  0xff   : > { %v822_v2 = vpack.c.bf16 %v807_v1, %v806_v23  ;;  %10307 = vst [vmem:[#allocation11_spill] sm:$0xff] %v8606_v4  ;;  %10308 = vst [vmem:[#allocation12_spill] sm:$0xff] %v8608_v5  ;;  %v8615_v8 = vsub.s32 3, %v863_v22  ;;  %v8618_v9 = vrot.slane %v860_v6, %v8606_v4  ;;  %v8621_v10 = vrot.slane %v860_v6, %v8608_v5 }
 0x100   : > { %1263 = vmatmul.mubr.bf16.gmra.mrb[12].mxu1 %v814_v15  ;;  %1150 = vmatmul.mubr.bf16.gmra.mrb[12].mxu0 %v814_v15  ;;  %10309 = vst [vmem:[#allocation13_spill] sm:$0xff] %v8613_v7  ;;  %v8624_v11 = vrot.slane %v860_v6, %v8613_v7 }
 0x101   : > { %6185 = vmatprep.mubr.msk.bf16.mxu1 %vm1062_vm2, %v817_v16  ;;  %6177 = vmatprep.mubr.msk.bf16.mxu0 %vm1062_vm2, %v817_v16  ;;  %10310 = vst [vmem:[#allocation14_spill] sm:$0xff] %v8615_v8  ;;  %v8627_v12 = vrot.slane %v860_v6, %v8615_v8 }
 0x108   : > { %1273 = vmatmul.mubr.bf16.gmra.mrb[16].mxu1 %v816_v34  ;;  %1160 = vmatmul.mubr.bf16.gmra.mrb[16].mxu0 %v816_v34 }
 0x109   : > { %6186 = vmatprep.mubr.msk.bf16.mxu1 %vm1062_vm2, %v819_v35  ;;  %6178 = vmatprep.mubr.msk.bf16.mxu0 %vm1062_vm2, %v819_v35 }
 0x110   : > { %1283 = vmatmul.mubr.bf16.gmra.mrb[20].mxu1 %v818_v48  ;;  %1170 = vmatmul.mubr.bf16.gmra.mrb[20].mxu0 %v818_v48 }
 0x111   : > { %6187 = vmatprep.mubr.msk.bf16.mxu1 %vm1062_vm2, %v821_v49  ;;  %6179 = vmatprep.mubr.msk.bf16.mxu0 %vm1062_vm2, %v821_v49 }
 0x118   : > { %1293 = vmatmul.mubr.bf16.gmra.mrb[24].mxu1 %v820_v59  ;;  %1180 = vmatmul.mubr.bf16.gmra.mrb[24].mxu0 %v820_v59 }
 0x119   : > { %6180 = vmatprep.mubr.msk.bf16.mxu0 %vm1062_vm2, %v823_v60  ;;  %6188 = vmatprep.mubr.msk.bf16.mxu1 %vm1062_vm2, %v823_v60 }
 0x120   : > { %1190 = vmatmul.mubr.bf16.gmra.mrb[28].mxu0 %v822_v2  ;;  %1303 = vmatmul.mubr.bf16.gmra.mrb[28].mxu1 %v822_v2 }
 0x1bb   : > { %v1121_v13 = vpop.f32.mrb[0].mxu0  ;;  %v1234_v14 = vpop.f32.mrb[0].mxu1 }
 0x1bc   : > { %v8630_v15 = vadd.f32 %v1121_v13, %v8618_v9  ;;  %v8633_v16 = vadd.f32 %v1234_v14, %v8621_v10  ;;  %v1123_v17 = vpop.f32.mrb[1].mxu0  ;;  %v1236_v21 = vpop.f32.mrb[1].mxu1 }
 0x1bd   : > { %v8636_v24 = vadd.f32 %v1123_v17, %v8624_v11  ;;  %v8639_v25 = vadd.f32 %v1236_v21, %v8627_v12  ;;  %v1125_v26 = vpop.f32.mrb[2].mxu0  ;;  %v1238_v27 = vpop.f32.mrb[2].mxu1 }
 0x1be   : > { %v10201_v28 = vmax.f32 %v8633_v16, 0.0  ;;  %v8643_v29 = vadd.f32 %v1125_v26, %v8618_v9  ;;  %v8646_v30 = vadd.f32 %v1238_v27, %v8621_v10  ;;  %v1127_v31 = vpop.f32.mrb[3].mxu0  ;;  %v1240_v32 = vpop.f32.mrb[3].mxu1  ;;  %v10205_v36 = vmax.f32 %v8630_v15, 0.0 }
 0x1bf   : > { %v10211_v33 = vmax.f32 %v8639_v25, 0.0  ;;  %v8650_v34 = vadd.f32 %v1127_v31, %v8624_v11  ;;  %v8653_v35 = vadd.f32 %v1240_v32, %v8627_v12  ;;  %v10210_v37 = vmax.f32 %v8636_v24, 0.0 }
 0x1c0   : > { %v10206_v38 = vmax.f32 %v8646_v30, 0.0  ;;  %v10204_v40 = vmax.f32 %v8643_v29, 0.0 }
 0x1c1   : > { %v7001_v39 = vpack.i.bf16 %v10211_v33, %v10201_v28  ;;  %v10207_v41 = vmax.f32 %v8650_v34, 0.0  ;;  %v10216_v42 = vmax.f32 %v8653_v35, 0.0  ;;  %v7006_v18 = vpack.i.bf16 %v10210_v37, %v10205_v36 }
 0x1c3   : > { %v7011_v43 = vpack.i.bf16 %v10216_v42, %v10206_v38  ;;  %v1244_v44 = vpop.f32.mrb[4].mxu1  ;;  %7002 = vrot.lane.b32.xlu0 %v7001_v39, %s8158_s29  ;;  %v1131_v45 = vpop.f32.mrb[4].mxu0  ;;  %v7016_v50 = vpack.i.bf16 %v10207_v41, %v10204_v40 }
 0x1c4   : > { %v8671_v46 = vadd.f32 %v1244_v44, %v8621_v10  ;;  %v1246_v47 = vpop.f32.mrb[5].mxu1  ;;  %v8674_v48 = vadd.f32 %v1131_v45, %v8618_v9  ;;  %v1133_v49 = vpop.f32.mrb[5].mxu0 }
 0x1c5   : > { %v8685_v51 = vadd.f32 %v1246_v47, %v8627_v12  ;;  %v1248_v52 = vpop.f32.mrb[6].mxu1  ;;  %7012 = vrot.lane.b32.xlu1 %v7011_v43, %s8158_s29  ;;  %v8689_v20 = vadd.f32 %v1133_v49, %v8624_v11  ;;  %v1135_v53 = vpop.f32.mrb[6].mxu0 }
 0x1c6   : > { %v10181_v19 = vmax.f32 %v8671_v46, 0.0  ;;  %v8693_v54 = vadd.f32 %v1248_v52, %v8621_v10  ;;  %v1250_v55 = vpop.f32.mrb[7].mxu1  ;;  %v10184_v56 = vmax.f32 %v8674_v48, 0.0  ;;  %v8697_v57 = vadd.f32 %v1135_v53, %v8618_v9  ;;  %v1137_v58 = vpop.f32.mrb[7].mxu0 }
 0x1c7   : > { %v10200_v59 = vmax.f32 %v8685_v51, 0.0  ;;  %v8701_v60 = vadd.f32 %v1250_v55, %v8627_v12  ;;  %7007 = vrot.lane.b32.xlu0 %v7006_v18, %s8158_s29  ;;  %v10179_v61 = vmax.f32 %v8689_v20, 0.0  ;;  %v8706_v62 = vadd.f32 %v1137_v58, %v8624_v11 }
 0x1c8   : > { %v10185_v63 = vmax.f32 %v8693_v54, 0.0  ;;  %v10190_v1 = vmax.f32 %v8697_v57, 0.0 }
 0x1c9   : > { %v7021_v0 = vpack.i.bf16 %v10200_v59, %v10181_v19  ;;  %v10195_v23 = vmax.f32 %v8701_v60, 0.0  ;;  %7017 = vrot.lane.b32.xlu1 %v7016_v50, %s8158_s29  ;;  %v10180_v2 = vmax.f32 %v8706_v62, 0.0  ;;  %v7026_v22 = vpack.i.bf16 %v10179_v61, %v10184_v56 }
 0x1cb   : > { %v7031_v3 = vpack.i.bf16 %v10195_v23, %v10185_v63  ;;  %v1254_v6 = vpop.f32.mrb[8].mxu1  ;;  %7022 = vrot.lane.b32.xlu0 %v7021_v0, %s8158_s29  ;;  %v1141_v13 = vpop.f32.mrb[8].mxu0  ;;  %v7036_v27 = vpack.i.bf16 %v10180_v2, %v10190_v1 }
 0x1cc   : > { %v8727_v14 = vadd.f32 %v1254_v6, %v8621_v10  ;;  %v1256_v17 = vpop.f32.mrb[9].mxu1  ;;  %v8730_v21 = vadd.f32 %v1141_v13, %v8618_v9  ;;  %v1143_v26 = vpop.f32.mrb[9].mxu0 }
 0x1cd   : > { %v8737_v31 = vadd.f32 %v1256_v17, %v8627_v12  ;;  %v1258_v32 = vpop.f32.mrb[10].mxu1  ;;  %7032 = vrot.lane.b32.xlu1 %v7031_v3, %s8158_s29  ;;  %v8741_v39 = vadd.f32 %v1143_v26, %v8624_v11  ;;  %v1145_v43 = vpop.f32.mrb[10].mxu0 }
 0x1ce   : > { %v10183_v44 = vmax.f32 %v8727_v14, 0.0  ;;  %v8745_v45 = vadd.f32 %v1258_v32, %v8621_v10  ;;  %v1260_v47 = vpop.f32.mrb[11].mxu1  ;;  %v10188_v49 = vmax.f32 %v8730_v21, 0.0  ;;  %v8749_v18 = vadd.f32 %v1145_v43, %v8618_v9  ;;  %v1147_v50 = vpop.f32.mrb[11].mxu0 }
 0x1cf   : > { %v10194_v52 = vmax.f32 %v8737_v31, 0.0  ;;  %v8753_v53 = vadd.f32 %v1260_v47, %v8627_v12  ;;  %7027 = vrot.lane.b32.xlu0 %v7026_v22, %s8158_s29  ;;  %v10182_v55 = vmax.f32 %v8741_v39, 0.0  ;;  %v8758_v58 = vadd.f32 %v1147_v50, %v8624_v11 }
 0x1d0   : > { %v10189_v0 = vmax.f32 %v8745_v45, 0.0  ;;  %v10187_v13 = vmax.f32 %v8749_v18, 0.0 }
 0x1d1   : > { %v7041_v3 = vpack.i.bf16 %v10194_v52, %v10183_v44  ;;  %v10191_v6 = vmax.f32 %v8753_v53, 0.0  ;;  %7037 = vrot.lane.b32.xlu1 %v7036_v27, %s8158_s29  ;;  %v10186_v22 = vmax.f32 %v8758_v58, 0.0  ;;  %v7046_v26 = vpack.i.bf16 %v10182_v55, %v10188_v49 }
 0x1d3   : > { %v7051_v17 = vpack.i.bf16 %v10191_v6, %v10189_v0  ;;  %v1264_v32 = vpop.f32.mrb[12].mxu1  ;;  %7042 = vrot.lane.b32.xlu0 %v7041_v3, %s8158_s29  ;;  %v1151_v43 = vpop.f32.mrb[12].mxu0  ;;  %v7056_v2 = vpack.i.bf16 %v10186_v22, %v10187_v13 }
 0x1d4   : > { %v8779_v47 = vadd.f32 %v1264_v32, %v8621_v10  ;;  %v1266_v27 = vpop.f32.mrb[13].mxu1  ;;  %v8782_v50 = vadd.f32 %v1151_v43, %v8618_v9  ;;  %v1153_v61 = vpop.f32.mrb[13].mxu0 }
 0x1d5   : > { %v8789_v19 = vadd.f32 %v1266_v27, %v8627_v12  ;;  %v1268_v55 = vpop.f32.mrb[14].mxu1  ;;  %7052 = vrot.lane.b32.xlu1 %v7051_v17, %s8158_s29  ;;  %v8793_v3 = vadd.f32 %v1153_v61, %v8624_v11  ;;  %v1155_v32 = vpop.f32.mrb[14].mxu0 }
 0x1d6   : > { %v10192_v44 = vmax.f32 %v8779_v47, 0.0  ;;  %v8797_v43 = vadd.f32 %v1268_v55, %v8621_v10  ;;  %v1270_v56 = vpop.f32.mrb[15].mxu1  ;;  %v10199_v63 = vmax.f32 %v8782_v50, 0.0  ;;  %v8801_v22 = vadd.f32 %v1155_v32, %v8618_v9  ;;  %v1157_v27 = vpop.f32.mrb[15].mxu0 }
 0x1d7   : > { %10311 = vst [vmem:[#allocation15_spill] sm:$0xff] %v8793_v3  ;;  %v10193_v13 = vmax.f32 %v8789_v19, 0.0  ;;  %v8805_v17 = vadd.f32 %v1270_v56, %v8627_v12  ;;  %7047 = vrot.lane.b32.xlu0 %v7046_v26, %s8158_s29  ;;  %v10198_v61 = vmax.f32 %v8793_v3, 0.0  ;;  %v8810_v49 = vadd.f32 %v1157_v27, %v8624_v11 }
 0x1d8   : > { %10312 = vst [vmem:[#allocation16_spill] sm:$0xff] %v8801_v22  ;;  %v10196_v55 = vmax.f32 %v8797_v43, 0.0  ;;  %v10203_v1 = vmax.f32 %v8801_v22, 0.0 }
 0x1d9   : > { %10313 = vst [vmem:[#allocation17_spill] sm:$0xff] %v8810_v49  ;;  %v7061_v32 = vpack.i.bf16 %v10193_v13, %v10192_v44  ;;  %v10197_v0 = vmax.f32 %v8805_v17, 0.0  ;;  %7057 = vrot.lane.b32.xlu1 %v7056_v2, %s8158_s29  ;;  %v10202_v56 = vmax.f32 %v8810_v49, 0.0  ;;  %v7066_v27 = vpack.i.bf16 %v10198_v61, %v10199_v63 }
 0x1db   : > { %v7071_v26 = vpack.i.bf16 %v10197_v0, %v10196_v55  ;;  %v1274_v6 = vpop.f32.mrb[16].mxu1  ;;  %7062 = vrot.lane.b32.xlu0 %v7061_v32, %s8158_s29  ;;  %v1161_v44 = vpop.f32.mrb[16].mxu0  ;;  %v7076_v55 = vpack.i.bf16 %v10202_v56, %v10203_v1 }
 0x1dc   : > { %v8831_v13 = vadd.f32 %v1274_v6, %v8621_v10  ;;  %v1276_v2 = vpop.f32.mrb[17].mxu1  ;;  %v8834_v52 = vadd.f32 %v1161_v44, %v8618_v9  ;;  %v1163_v23 = vpop.f32.mrb[17].mxu0 }
 0x1dd   : > { %v8841_v0 = vadd.f32 %v1276_v2, %v8627_v12  ;;  %v1278_v61 = vpop.f32.mrb[18].mxu1  ;;  %7072 = vrot.lane.b32.xlu1 %v7071_v26, %s8158_s29  ;;  %v8845_v32 = vadd.f32 %v1163_v23, %v8624_v11  ;;  %v1165_v6 = vpop.f32.mrb[18].mxu0 }
 0x1de   : > { %10314 = vst [vmem:[#allocation18_spill] sm:$0xff] %v8831_v13  ;;  %10315 = vst [vmem:[#allocation19_spill] sm:$0xff] %v8834_v52  ;;  %v10208_v63 = vmax.f32 %v8831_v13, 0.0  ;;  %v8849_v44 = vadd.f32 %v1278_v61, %v8621_v10  ;;  %v1280_v59 = vpop.f32.mrb[19].mxu1  ;;  %v10215_v28 = vmax.f32 %v8834_v52, 0.0  ;;  %v8853_v56 = vadd.f32 %v1165_v6, %v8618_v9  ;;  %v1167_v2 = vpop.f32.mrb[19].mxu0 }
 0x1df   : > { %10316 = vst [vmem:[#allocation20_spill] sm:$0xff] %v8845_v32  ;;  %v10209_v1 = vmax.f32 %v8841_v0, 0.0  ;;  %v8857_v26 = vadd.f32 %v1280_v59, %v8627_v12  ;;  %7067 = vrot.lane.b32.xlu0 %v7066_v27, %s8158_s29  ;;  %v10214_v23 = vmax.f32 %v8845_v32, 0.0  ;;  %v8862_v40 = vadd.f32 %v1167_v2, %v8624_v11  ;;  %v7521_v32 = vld [vmem:[#allocation3 + $0x1c4] ss:$16 sps:$4 sm:$0xff]  }
 0x1e0   : > { %10317 = vst [vmem:[#allocation21_spill] sm:$0xff] %v8853_v56  ;;  %v10212_v61 = vmax.f32 %v8849_v44, 0.0  ;;  %v10220_v38 = vmax.f32 %v8853_v56, 0.0  ;;  %v7522_v13 = vld [vmem:[#allocation3 + $0x1c8] ss:$16 sps:$4 sm:$0xff]  }
 0x1e1   : > { %10318 = vst [vmem:[#allocation22_spill] sm:$0xff] %v8862_v40  ;;  %v7081_v6 = vpack.i.bf16 %v10209_v1, %v10208_v63  ;;  %v10213_v36 = vmax.f32 %v8857_v26, 0.0  ;;  %7077 = vrot.lane.b32.xlu1 %v7076_v55, %s8158_s29  ;;  %v10219_v59 = vmax.f32 %v8862_v40, 0.0  ;;  %v7086_v2 = vpack.i.bf16 %v10214_v23, %v10215_v28  ;;  %v7530_v52 = vld [vmem:[#allocation3 + $0x1ec] ss:$16 sps:$4 sm:$0xff]  }
 0x1e3   : > { %v7091_v27 = vpack.i.bf16 %v10213_v36, %v10212_v61  ;;  %v1284_v41 = vpop.f32.mrb[20].mxu1  ;;  %7082 = vrot.lane.b32.xlu0 %v7081_v6, %s8158_s29  ;;  %v1171_v63 = vpop.f32.mrb[20].mxu0  ;;  %v7096_v61 = vpack.i.bf16 %v10219_v59, %v10220_v38 }
 0x1e4   : > { %v8883_v1 = vadd.f32 %v1284_v41, %v8621_v10  ;;  %v1286_v55 = vpop.f32.mrb[21].mxu1  ;;  %v8886_v37 = vadd.f32 %v1171_v63, %v8618_v9  ;;  %v1173_v33 = vpop.f32.mrb[21].mxu0 }
 0x1e5   : > { %v8893_v36 = vadd.f32 %v1286_v55, %v8627_v12  ;;  %v1288_v23 = vpop.f32.mrb[22].mxu1  ;;  %7092 = vrot.lane.b32.xlu1 %v7091_v27, %s8158_s29  ;;  %v8897_v6 = vadd.f32 %v1173_v33, %v8624_v11  ;;  %v1175_v41 = vpop.f32.mrb[22].mxu0 }
 0x1e6   : > { %10319 = vst [vmem:[#allocation23_spill] sm:$0xff] %v8883_v1  ;;  %10320 = vst [vmem:[#allocation24_spill] sm:$0xff] %v8886_v37  ;;  %v8901_v63 = vadd.f32 %v1288_v23, %v8621_v10  ;;  %v1290_v42 = vpop.f32.mrb[23].mxu1  ;;  %v8905_v59 = vadd.f32 %v1175_v41, %v8618_v9  ;;  %v1177_v55 = vpop.f32.mrb[23].mxu0  ;;  %v10327_v4 = vmax.f32 %v8883_v1, 0.0 }
 0x1e7   : > { %10321 = vst [vmem:[#allocation25_spill] sm:$0xff] %v8893_v36  ;;  %10322 = vst [vmem:[#allocation26_spill] sm:$0xff] %v8897_v6  ;;  %v10228_v38 = vmax.f32 %v8893_v36, 0.0  ;;  %v8909_v27 = vadd.f32 %v1290_v42, %v8627_v12  ;;  %7087 = vrot.lane.b32.xlu0 %v7086_v2, %s8158_s29  ;;  %v10233_v33 = vmax.f32 %v8897_v6, 0.0  ;;  %v8914_v28 = vadd.f32 %v1177_v55, %v8624_v11 }
 0x1e8   : > { %10323 = vst [vmem:[#allocation27_spill] sm:$0xff] %v8901_v63  ;;  %10324 = vst [vmem:[#allocation28_spill] sm:$0xff] %v8905_v59  ;;  %v10230_v23 = vmax.f32 %v8901_v63, 0.0  ;;  %v10328_v55 = vmax.f32 %v8886_v37, 0.0  ;;  %v10331_v63 = vmax.f32 %v8905_v59, 0.0 }
 0x1e9   : > { %10325 = vst [vmem:[#allocation29_spill] sm:$0xff] %v8909_v27  ;;  %10326 = vst [vmem:[#allocation30_spill] sm:$0xff] %v8914_v28  ;;  %v7101_v41 = vpack.i.bf16 %v10228_v38, %v10327_v4  ;;  %v10231_v8 = vmax.f32 %v8909_v27, 0.0  ;;  %7097 = vrot.lane.b32.xlu1 %v7096_v61, %s8158_s29 }
 0x1ea   : > { %v7106_v5 = vpack.i.bf16 %v10233_v33, %v10328_v55 }
 0x1eb   : > { %v7111_v2 = vpack.i.bf16 %v10231_v8, %v10230_v23  ;;  %v1294_v1 = vpop.f32.mrb[24].mxu1  ;;  %7102 = vrot.lane.b32.xlu0 %v7101_v41, %s8158_s29  ;;  %v1181_v4 = vpop.f32.mrb[24].mxu0  ;;  %v10332_v23 = vmax.f32 %v8914_v28, 0.0 }
 0x1ec   : > { %v8935_v38 = vadd.f32 %v1294_v1, %v8621_v10  ;;  %v1296_v61 = vpop.f32.mrb[25].mxu1  ;;  %v8938_v42 = vadd.f32 %v1181_v4, %v8618_v9  ;;  %v1183_v7 = vpop.f32.mrb[25].mxu0 }
 0x1ed   : > { %v7116_v8 = vpack.i.bf16 %v10332_v23, %v10331_v63  ;;  %v8945_v6 = vadd.f32 %v1296_v61, %v8627_v12  ;;  %v1298_v55 = vpop.f32.mrb[26].mxu1  ;;  %7112 = vrot.lane.b32.xlu1 %v7111_v2, %s8158_s29  ;;  %v8949_v41 = vadd.f32 %v1183_v7, %v8624_v11  ;;  %v1185_v1 = vpop.f32.mrb[26].mxu0 }
 0x1ee   : > { %10329 = vst [vmem:[#allocation31_spill] sm:$0xff] %v8935_v38  ;;  %10330 = vst [vmem:[#allocation32_spill] sm:$0xff] %v8938_v42  ;;  %v8953_v4 = vadd.f32 %v1298_v55, %v8621_v10  ;;  %v1300_v37 = vpop.f32.mrb[27].mxu1  ;;  %v8957_v63 = vadd.f32 %v1185_v1, %v8618_v9  ;;  %v1187_v23 = vpop.f32.mrb[27].mxu0  ;;  %v10339_v59 = vmax.f32 %v8935_v38, 0.0 }
 0x1ef   : > { %10333 = vst [vmem:[#allocation33_spill] sm:$0xff] %v8945_v6  ;;  %10334 = vst [vmem:[#allocation34_spill] sm:$0xff] %v8949_v41  ;;  %v10239_v61 = vmax.f32 %v8945_v6, 0.0  ;;  %v8961_v2 = vadd.f32 %v1300_v37, %v8627_v12  ;;  %7107 = vrot.lane.b32.xlu0 %v7106_v5, %s8158_s29  ;;  %v10244_v7 = vmax.f32 %v8949_v41, 0.0  ;;  %v8966_v33 = vadd.f32 %v1187_v23, %v8624_v11 }
 0x1f0   : > { %10335 = vst [vmem:[#allocation35_spill] sm:$0xff] %v8953_v4  ;;  %10336 = vst [vmem:[#allocation36_spill] sm:$0xff] %v8957_v63  ;;  %v10242_v55 = vmax.f32 %v8953_v4, 0.0  ;;  %v10340_v23 = vmax.f32 %v8938_v42, 0.0 }
 0x1f1   : > { %10337 = vst [vmem:[#allocation37_spill] sm:$0xff] %v8961_v2  ;;  %10338 = vst [vmem:[#allocation38_spill] sm:$0xff] %v8966_v33  ;;  %v7121_v1 = vpack.i.bf16 %v10239_v61, %v10339_v59  ;;  %v10243_v28 = vmax.f32 %v8961_v2, 0.0  ;;  %7117 = vrot.lane.b32.xlu1 %v7116_v8, %s8158_s29  ;;  %v10341_v2 = vmax.f32 %v8957_v63, 0.0 }
 0x1f2   : > { %v7126_v38 = vpack.i.bf16 %v10244_v7, %v10340_v23 }
 0x1f3   : > { %v7131_v37 = vpack.i.bf16 %v10243_v28, %v10242_v55  ;;  %7122 = vrot.lane.b32.xlu0 %v7121_v1, %s8158_s29  ;;  %v1191_v59 = vpop.f32.mrb[28].mxu0  ;;  %v1304_v61 = vpop.f32.mrb[28].mxu1  ;;  %v10342_v55 = vmax.f32 %v8966_v33, 0.0  ;;  %v7458_v33 = vld [vmem:[#allocation3 + $0x6c] ss:$16 sps:$4 sm:$0xff]  }
 0x1f4   : > { %v8987_v27 = vadd.f32 %v1191_v59, %v8618_v9  ;;  %v8990_v8 = vadd.f32 %v1304_v61, %v8621_v10  ;;  %v1193_v5 = vpop.f32.mrb[29].mxu0  ;;  %v1306_v4 = vpop.f32.mrb[29].mxu1 }
 0x1f5   : > { %v7136_v28 = vpack.i.bf16 %v10342_v55, %v10341_v2  ;;  %7132 = vrot.lane.b32.xlu1 %v7131_v37, %s8158_s29  ;;  %v8998_v23 = vadd.f32 %v1193_v5, %v8624_v11  ;;  %v9001_v1 = vadd.f32 %v1306_v4, %v8627_v12  ;;  %v1195_v59 = vpop.f32.mrb[30].mxu0  ;;  %v1308_v7 = vpop.f32.mrb[30].mxu1  ;;  %v7435_v4 = vld [vmem:[#allocation3] ss:$16 sps:$4 sm:$0xff]   ;;  %v7437_v5 = vld [vmem:[#allocation3 + $0x4] ss:$16 sps:$4 sm:$0xff]  }
 0x1f6   : > { %v9004_v61 = vadd.f32 %v1195_v59, %v8618_v9  ;;  %v9007_v41 = vadd.f32 %v1308_v7, %v8621_v10  ;;  %v1197_v63 = vpop.f32.mrb[31].mxu0  ;;  %v1310_v42 = vpop.f32.mrb[31].mxu1  ;;  %v7438_v37 = vld [vmem:[#allocation3 + $0x8] ss:$16 sps:$4 sm:$0xff]   ;;  %v7440_v9 = vld [vmem:[#allocation3 + $0xc] ss:$16 sps:$4 sm:$0xff]   ;;  %3195 = vmatprep.subr.bf16.mxu0 %v7437_v5 }
 0x1f7   : > { %10343 = vst [vmem:[#allocation39_spill] sm:$0xff] %v9001_v1  ;;  %7127 = vrot.lane.b32.xlu0 %v7126_v38, %s8158_s29  ;;  %v9011_v2 = vadd.f32 %v1197_v63, %v8624_v11  ;;  %v9014_v55 = vadd.f32 %v1310_v42, %v8627_v12  ;;  %v7443_v59 = vld [vmem:[#allocation3 + $0x24] ss:$16 sps:$4 sm:$0xff]   ;;  %v7446_v10 = vld [vmem:[#allocation3 + $0x2c] ss:$16 sps:$4 sm:$0xff]   ;;  %3414 = vmatprep.subr.bf16.mxu1 %v7440_v9 }
 0x1f8   : > { %3196 = vmatpush1.bf16.msra.mxu0 %v7435_v4  ;;  %v7441_v7 = vld [vmem:[#allocation3 + $0x20] ss:$16 sps:$4 sm:$0xff]   ;;  %3415 = vmatpush1.bf16.msra.mxu1 %v7438_v37  ;;  %v7444_v38 = vld [vmem:[#allocation3 + $0x28] ss:$16 sps:$4 sm:$0xff]   ;;  %v7449_v11 = vld [vmem:[#allocation3 + $0x44] ss:$16 sps:$4 sm:$0xff]  }
 0x1f9   : > { %7137 = vrot.lane.b32.xlu1 %v7136_v28, %s8158_s29  ;;  %3197 = vmatprep.subr.bf16.mxu0 %v7443_v59  ;;  %v7452_v63 = vld [vmem:[#allocation3 + $0x4c] ss:$16 sps:$4 sm:$0xff]   ;;  %v7447_v12 = vld [vmem:[#allocation3 + $0x40] ss:$16 sps:$4 sm:$0xff]   ;;  %v7450_v28 = vld [vmem:[#allocation3 + $0x48] ss:$16 sps:$4 sm:$0xff]  }
 0x1fa   : > { %3416 = vmatprep.subr.bf16.mxu1 %v7446_v10  ;;  %v7455_v42 = vld [vmem:[#allocation3 + $0x64] ss:$16 sps:$4 sm:$0xff]   ;;  %v7453_v5 = vld [vmem:[#allocation3 + $0x60] ss:$16 sps:$4 sm:$0xff]   ;;  %v7456_v4 = vld [vmem:[#allocation3 + $0x68] ss:$16 sps:$4 sm:$0xff]  }
 0x1fb   : > { %v7461_v9 = vld [vmem:[#allocation3 + $0x84] ss:$16 sps:$4 sm:$0xff]   ;;  %v7464_v37 = vld [vmem:[#allocation3 + $0x8c] ss:$16 sps:$4 sm:$0xff]   ;;  %v7459_v59 = vld [vmem:[#allocation3 + $0x80] ss:$16 sps:$4 sm:$0xff]  }
 0x1fc   : > { %3198 = vmatpush1.bf16.msra.mxu0 %v7441_v7  ;;  %3417 = vmatpush1.bf16.msra.mxu1 %v7444_v38  ;;  %v7462_v10 = vld [vmem:[#allocation3 + $0x88] ss:$16 sps:$4 sm:$0xff]   ;;  %v7467_v7 = vld [vmem:[#allocation3 + $0xa4] ss:$16 sps:$4 sm:$0xff]   ;;  %v7470_v38 = vld [vmem:[#allocation3 + $0xac] ss:$16 sps:$4 sm:$0xff]  }
 0x1fd   : > { %3199 = vmatprep.subr.bf16.mxu0 %v7449_v11  ;;  %3418 = vmatprep.subr.bf16.mxu1 %v7452_v63  ;;  %v7465_v11 = vld [vmem:[#allocation3 + $0xa0] ss:$16 sps:$4 sm:$0xff]   ;;  %v7468_v63 = vld [vmem:[#allocation3 + $0xa8] ss:$16 sps:$4 sm:$0xff]  }
 0x200   : > { %3200 = vmatpush1.bf16.msra.mxu0 %v7447_v12  ;;  %3419 = vmatpush1.bf16.msra.mxu1 %v7450_v28  ;;  %v7473_v12 = vld [vmem:[#allocation3 + $0xc4] ss:$16 sps:$4 sm:$0xff]   ;;  %v7476_v28 = vld [vmem:[#allocation3 + $0xcc] ss:$16 sps:$4 sm:$0xff]  }
 0x201   : > { %3201 = vmatprep.subr.bf16.mxu0 %v7455_v42  ;;  %3420 = vmatprep.subr.bf16.mxu1 %v7458_v33  ;;  %v7471_v42 = vld [vmem:[#allocation3 + $0xc0] ss:$16 sps:$4 sm:$0xff]   ;;  %v7474_v33 = vld [vmem:[#allocation3 + $0xc8] ss:$16 sps:$4 sm:$0xff]  }
 0x204   : > { %3202 = vmatpush1.bf16.msra.mxu0 %v7453_v5  ;;  %3421 = vmatpush1.bf16.msra.mxu1 %v7456_v4  ;;  %v7479_v5 = vld [vmem:[#allocation3 + $0xe4] ss:$16 sps:$4 sm:$0xff]   ;;  %v7482_v4 = vld [vmem:[#allocation3 + $0xec] ss:$16 sps:$4 sm:$0xff]  }
 0x205   : > { %3203 = vmatprep.subr.bf16.mxu0 %v7461_v9  ;;  %3422 = vmatprep.subr.bf16.mxu1 %v7464_v37  ;;  %v7477_v9 = vld [vmem:[#allocation3 + $0xe0] ss:$16 sps:$4 sm:$0xff]   ;;  %v7480_v37 = vld [vmem:[#allocation3 + $0xe8] ss:$16 sps:$4 sm:$0xff]  }
 0x208   : > { %3204 = vmatpush1.bf16.msra.mxu0 %v7459_v59  ;;  %3423 = vmatpush1.bf16.msra.mxu1 %v7462_v10  ;;  %v7485_v59 = vld [vmem:[#allocation3 + $0x104] ss:$16 sps:$4 sm:$0xff]   ;;  %v7488_v10 = vld [vmem:[#allocation3 + $0x10c] ss:$16 sps:$4 sm:$0xff]  }
 0x209   : > { %3205 = vmatprep.subr.bf16.mxu0 %v7467_v7  ;;  %3424 = vmatprep.subr.bf16.mxu1 %v7470_v38  ;;  %v7483_v7 = vld [vmem:[#allocation3 + $0x100] ss:$16 sps:$4 sm:$0xff]   ;;  %v7486_v38 = vld [vmem:[#allocation3 + $0x108] ss:$16 sps:$4 sm:$0xff]  }
 0x20c   : > { %3206 = vmatpush1.bf16.msra.mxu0 %v7465_v11  ;;  %3425 = vmatpush1.bf16.msra.mxu1 %v7468_v63  ;;  %v7491_v11 = vld [vmem:[#allocation3 + $0x124] ss:$16 sps:$4 sm:$0xff]   ;;  %v7494_v63 = vld [vmem:[#allocation3 + $0x12c] ss:$16 sps:$4 sm:$0xff]  }
 0x20d   : > { %3207 = vmatprep.subr.bf16.mxu0 %v7473_v12  ;;  %3426 = vmatprep.subr.bf16.mxu1 %v7476_v28  ;;  %v7489_v12 = vld [vmem:[#allocation3 + $0x120] ss:$16 sps:$4 sm:$0xff]   ;;  %v7492_v28 = vld [vmem:[#allocation3 + $0x128] ss:$16 sps:$4 sm:$0xff]  }
 0x210   : > { %3208 = vmatpush1.bf16.msra.mxu0 %v7471_v42  ;;  %3427 = vmatpush1.bf16.msra.mxu1 %v7474_v33  ;;  %v7497_v42 = vld [vmem:[#allocation3 + $0x144] ss:$16 sps:$4 sm:$0xff]   ;;  %v7500_v33 = vld [vmem:[#allocation3 + $0x14c] ss:$16 sps:$4 sm:$0xff]  }
 0x211   : > { %3209 = vmatprep.subr.bf16.mxu0 %v7479_v5  ;;  %3428 = vmatprep.subr.bf16.mxu1 %v7482_v4  ;;  %v7495_v5 = vld [vmem:[#allocation3 + $0x140] ss:$16 sps:$4 sm:$0xff]   ;;  %v7498_v4 = vld [vmem:[#allocation3 + $0x148] ss:$16 sps:$4 sm:$0xff]  }
 0x214   : > { %3210 = vmatpush1.bf16.msra.mxu0 %v7477_v9  ;;  %3429 = vmatpush1.bf16.msra.mxu1 %v7480_v37  ;;  %v7503_v9 = vld [vmem:[#allocation3 + $0x164] ss:$16 sps:$4 sm:$0xff]   ;;  %v7506_v37 = vld [vmem:[#allocation3 + $0x16c] ss:$16 sps:$4 sm:$0xff]  }
 0x215   : > { %3211 = vmatprep.subr.bf16.mxu0 %v7485_v59  ;;  %3430 = vmatprep.subr.bf16.mxu1 %v7488_v10  ;;  %v7501_v59 = vld [vmem:[#allocation3 + $0x160] ss:$16 sps:$4 sm:$0xff]   ;;  %v7504_v10 = vld [vmem:[#allocation3 + $0x168] ss:$16 sps:$4 sm:$0xff]  }
 0x218   : > { %3212 = vmatpush1.bf16.msra.mxu0 %v7483_v7  ;;  %3431 = vmatpush1.bf16.msra.mxu1 %v7486_v38  ;;  %v7509_v7 = vld [vmem:[#allocation3 + $0x184] ss:$16 sps:$4 sm:$0xff]   ;;  %v7512_v38 = vld [vmem:[#allocation3 + $0x18c] ss:$16 sps:$4 sm:$0xff]  }
 0x219   : > { %3213 = vmatprep.subr.bf16.mxu0 %v7491_v11  ;;  %3432 = vmatprep.subr.bf16.mxu1 %v7494_v63  ;;  %v7507_v11 = vld [vmem:[#allocation3 + $0x180] ss:$16 sps:$4 sm:$0xff]   ;;  %v7510_v63 = vld [vmem:[#allocation3 + $0x188] ss:$16 sps:$4 sm:$0xff]  }
 0x21c   : > { %3214 = vmatpush1.bf16.msra.mxu0 %v7489_v12  ;;  %3433 = vmatpush1.bf16.msra.mxu1 %v7492_v28  ;;  %v7515_v12 = vld [vmem:[#allocation3 + $0x1a4] ss:$16 sps:$4 sm:$0xff]   ;;  %v7518_v28 = vld [vmem:[#allocation3 + $0x1ac] ss:$16 sps:$4 sm:$0xff]  }
 0x21d   : > { %3215 = vmatprep.subr.bf16.mxu0 %v7497_v42  ;;  %3434 = vmatprep.subr.bf16.mxu1 %v7500_v33  ;;  %v7513_v42 = vld [vmem:[#allocation3 + $0x1a0] ss:$16 sps:$4 sm:$0xff]   ;;  %v7516_v33 = vld [vmem:[#allocation3 + $0x1a8] ss:$16 sps:$4 sm:$0xff]  }
 0x220   : > { %3216 = vmatpush1.bf16.msra.mxu0 %v7495_v5  ;;  %3435 = vmatpush1.bf16.msra.mxu1 %v7498_v4 }
 0x221   : > { %3217 = vmatprep.subr.bf16.mxu0 %v7503_v9  ;;  %3436 = vmatprep.subr.bf16.mxu1 %v7506_v37 }
 0x224   : > { %3218 = vmatpush1.bf16.msra.mxu0 %v7501_v59  ;;  %3437 = vmatpush1.bf16.msra.mxu1 %v7504_v10 }
 0x225   : > { %3219 = vmatprep.subr.bf16.mxu0 %v7509_v7  ;;  %3438 = vmatprep.subr.bf16.mxu1 %v7512_v38  ;;  %v7524_v38 = vld [vmem:[#allocation3 + $0x1cc] ss:$16 sps:$4 sm:$0xff]  }
 0x228   : > { %3220 = vmatpush1.bf16.msra.mxu0 %v7507_v11  ;;  %3439 = vmatpush1.bf16.msra.mxu1 %v7510_v63  ;;  %v7519_v11 = vld [vmem:[#allocation3 + $0x1c0] ss:$16 sps:$4 sm:$0xff]  }
 0x229   : > { %3221 = vmatprep.subr.bf16.mxu0 %v7515_v12  ;;  %3440 = vmatprep.subr.bf16.mxu1 %v7518_v28  ;;  %v10344_v28 = vmax.f32 %v8653_v35, 0.0 }
 0x22c   : > { %3222 = vmatpush1.bf16.msra.mxu0 %v7513_v42  ;;  %3441 = vmatpush1.bf16.msra.mxu1 %v7516_v33 }
 0x22d   : > { %3223 = vmatprep.subr.bf16.mxu0 %v7521_v32  ;;  %3442 = vmatprep.subr.bf16.mxu1 %v7524_v38  ;;  %v7527_v38 = vld [vmem:[#allocation3 + $0x1e4] ss:$16 sps:$4 sm:$0xff]   ;;  %v10349_v32 = vmax.f32 %v8630_v15, 0.0  ;;  %v10351_v15 = vmax.f32 %v8633_v16, 0.0 }
 0x230   : > { %3224 = vmatpush1.bf16.msra.mxu0 %v7519_v11  ;;  %3443 = vmatpush1.bf16.msra.mxu1 %v7522_v13  ;;  %v7528_v11 = vld [vmem:[#allocation3 + $0x1e8] ss:$16 sps:$4 sm:$0xff]  }
 0x231   : > { %3225 = vmatprep.subr.bf16.mxu0 %v7527_v38  ;;  %3444 = vmatprep.subr.bf16.mxu1 %v7530_v52  ;;  %v7533_v52 = vld [vmem:[#allocation3 + $0x204] ss:$16 sps:$4 sm:$0xff]  }
 0x234   : > { %3445 = vmatpush1.bf16.msra.mxu1 %v7528_v11 }
 0x235   : > { %v7003_v5 = vpop.permute.xlu0 %7002 }
 0x236   : > { %v7005_v6 = vunpack.i.h.bf16 %v7003_v5  ;;  %v7004_v10 = vunpack.i.l.bf16 %v7003_v5 }
 0x237   : > { %v7013_v4 = vpop.permute.xlu1 %7012 }
 0x238   : > { %v7015_v9 = vunpack.i.h.bf16 %v7013_v4  ;;  %v7014_v37 = vunpack.i.l.bf16 %v7013_v4  ;;  %v1571_v35 = vsel %vm791_vm1, %v7004_v10, %v7005_v6 }
 0x239   : > { %v7008_v59 = vpop.permute.xlu0 %7007 }
 0x23a   : > { %v7010_v7 = vunpack.i.h.bf16 %v7008_v59  ;;  %v7009_v36 = vunpack.i.l.bf16 %v7008_v59  ;;  %v1688_v42 = vmax.f32 %v10344_v28, %v7015_v9  ;;  %v1574_v33 = vsel %vm791_vm1, %v7014_v37, %v7015_v9 }
 0x23b   : > { %v7018_v40 = vpop.permute.xlu1 %7017  ;;  %v10345_v59 = vmax.f32 %v8639_v25, 0.0  ;;  %v10346_v9 = vmax.f32 %v8636_v24, 0.0  ;;  %v7525_v25 = vld [vmem:[#allocation3 + $0x1e0] ss:$16 sps:$4 sm:$0xff]   ;;  %v10264_v24 = vmax.f32 %v8990_v8, 0.0 }
 0x23c   : > { %v1570_v63 = vsel %vm791_vm1, %v7010_v7, %v7004_v10  ;;  %v7020_v12 = vunpack.i.h.bf16 %v7018_v40  ;;  %v1569_v4 = vsel %vm791_vm1, %v7009_v36, %v7010_v7  ;;  %v7019_v5 = vunpack.i.l.bf16 %v7018_v40  ;;  %3226 = vmatpush1.bf16.msra.mxu0 %v7525_v25 }
 0x23d   : > { %v9022_v49 = vpop.permute.xlu0 %7022  ;;  %v1684_v3 = vmax.f32 %v10345_v59, %v7005_v6  ;;  %v1682_v28 = vmax.f32 %v10346_v9, %v1570_v63  ;;  %v10347_v36 = vmax.f32 %v8650_v34, 0.0  ;;  %v1681_v22 = vmax.f32 %v10349_v32, %v1569_v4  ;;  %3268 = vmatprep.subr.bf16.mxu0 %v7533_v52 }
 0x23e   : > { %v1573_v56 = vsel %vm791_vm1, %v7020_v12, %v7014_v37  ;;  %v1572_v7 = vsel %vm791_vm1, %v7019_v5, %v7020_v12  ;;  %v10348_v37 = vmax.f32 %v8646_v30, 0.0  ;;  %v10350_v6 = vmax.f32 %v8643_v29, 0.0 }
 0x23f   : > { %v1686_v40 = vmax.f32 %v10347_v36, %v1573_v56  ;;  %v9034_v13 = vpop.permute.xlu1 %7032  ;;  %v1748_v34 = vmax.f32 %v1684_v3, %v1688_v42  ;;  %v10260_v56 = vmax.f32 %v8998_v23, 0.0  ;;  %v10259_v63 = vmax.f32 %v9001_v1, 0.0  ;;  %v7536_v3 = vld [vmem:[#allocation3 + $0x20c] ss:$16 sps:$4 sm:$0xff]  }
 0x240   : > { %v1687_v59 = vmax.f32 %v10348_v37, %v1574_v33  ;;  %v1685_v10 = vmax.f32 %v10350_v6, %v1572_v7  ;;  %v1683_v30 = vmax.f32 %v10351_v15, %v1571_v35  ;;  %v10263_v29 = vmax.f32 %v9004_v61, 0.0  ;;  %3487 = vmatprep.subr.bf16.mxu1 %v7536_v3 }
 0x241   : > { %v9045_v12 = vpop.permute.xlu0 %7027  ;;  %v1746_v5 = vmax.f32 %v1682_v28, %v1686_v40  ;;  %v10261_v33 = vmax.f32 %v9011_v2, 0.0  ;;  %v10265_v42 = vmax.f32 %v9007_v41, 0.0  ;;  %v7025_v9 = vunpack.i.h.bf16 %v9022_v49 }
 0x242   : > { %v9051_v4 = vmax.f32 %v1681_v22, %v1685_v10  ;;  %v7035_v28 = vunpack.i.h.bf16 %v9034_v13  ;;  %v10262_v36 = vmax.f32 %v9014_v55, 0.0  ;;  %v9057_v16 = vmax.f32 %v1683_v30, %v1687_v59 }
 0x243   : > { %v7038_v32 = vpop.permute.xlu1 %7037  ;;  %v7146_v38 = vpack.i.bf16 %v1746_v5, %v1748_v34  ;;  %v7156_v22 = vpack.i.bf16 %v10259_v63, %v10264_v24  ;;  %v10352_v40 = vmax.f32 %v8987_v27, 0.0  ;;  %v7171_v25 = vpack.i.bf16 %v10261_v33, %v10263_v29 }
 0x244   : > { %v7141_v11 = vpack.i.bf16 %v9051_v4, %v9057_v16  ;;  %v7024_v37 = vunpack.i.l.bf16 %v9022_v49  ;;  %v7040_v59 = vunpack.i.h.bf16 %v7038_v32  ;;  %v7039_v6 = vunpack.i.l.bf16 %v7038_v32 }
 0x245   : > { %v7043_v35 = vpop.permute.xlu0 %7042  ;;  %7147 = vrot.lane.b32.xlu1 %v7146_v38, %s8159_s20  ;;  %v9068_v7 = vpack.i.bf16 %v10260_v56, %v10352_v40  ;;  %v10353_v5 = vmax.f32 %v8685_v51, 0.0  ;;  %v10354_v30 = vmax.f32 %v8701_v60, 0.0  ;;  %v7034_v3 = vunpack.i.l.bf16 %v9034_v13 }
 0x246   : > { %v7045_v10 = vunpack.i.h.bf16 %v7043_v35  ;;  %v7161_v40 = vpack.i.bf16 %v10262_v36, %v10265_v42  ;;  %7142 = vrot.lane.b32.xlu0 %v7141_v11, %s8158_s29  ;;  %v7030_v49 = vunpack.i.h.bf16 %v9045_v12  ;;  %v7029_v32 = vunpack.i.l.bf16 %v9045_v12 }
 0x247   : > { %v7053_v34 = vpop.permute.xlu1 %7052  ;;  %v1692_v15 = vmax.f32 %v10353_v5, %v7025_v9  ;;  %v1696_v52 = vmax.f32 %v10354_v30, %v7035_v28  ;;  %v7044_v60 = vunpack.i.l.bf16 %v7043_v35  ;;  %v1577_v13 = vsel %vm791_vm1, %v7024_v37, %v7025_v9 }
 0x248   : > { %v7055_v63 = vunpack.i.h.bf16 %v7053_v34  ;;  %v7054_v56 = vunpack.i.l.bf16 %v7053_v34  ;;  %v1578_v33 = vsel %vm791_vm1, %v7039_v6, %v7040_v59  ;;  %v10355_v36 = vmax.f32 %v8737_v31, 0.0 }
 0x249   : > { %v7048_v51 = vpop.permute.xlu0 %7047  ;;  %7157 = vrot.lane.b32.xlu1 %v7156_v22, %s8158_s29  ;;  %v10356_v11 = vmax.f32 %v8753_v53, 0.0  ;;  %v1580_v12 = vsel %vm791_vm1, %v7034_v3, %v7035_v28  ;;  %v1752_v34 = vmax.f32 %v1692_v15, %v1696_v52  ;;  %v1575_v9 = vsel %vm791_vm1, %v7029_v32, %v7030_v49 }
 0x24a   : > { %v7050_v5 = vunpack.i.h.bf16 %v7048_v51  ;;  %v7049_v30 = vunpack.i.l.bf16 %v7048_v51  ;;  %v1700_v29 = vmax.f32 %v10355_v36, %v7045_v10  ;;  %v1586_v1 = vsel %vm791_vm1, %v7054_v56, %v7055_v63  ;;  %7152 = vrot.lane.b32.xlu0 %v7146_v38, %s8160_s26 }
 0x24b   : > { %v1704_v24 = vmax.f32 %v10356_v11, %v7055_v63  ;;  %v7058_v42 = vpop.permute.xlu1 %7057  ;;  %v1576_v53 = vsel %vm791_vm1, %v7030_v49, %v7024_v37  ;;  %v1579_v28 = vsel %vm791_vm1, %v7040_v59, %v7034_v3  ;;  %v10357_v63 = vmax.f32 %v8697_v57, 0.0 }
 0x24c   : > { %v7060_v22 = vunpack.i.h.bf16 %v7058_v42  ;;  %v1581_v6 = vsel %vm791_vm1, %v7049_v30, %v7050_v5  ;;  %v7059_v31 = vunpack.i.l.bf16 %v7058_v42  ;;  %v1583_v38 = vsel %vm791_vm1, %v7044_v60, %v7045_v10 }
 0x24d   : > { %v1756_v35 = vmax.f32 %v1700_v29, %v1704_v24  ;;  %v9101_v36 = vpop.permute.xlu0 %7062  ;;  %7172 = vrot.lane.b32.xlu1 %v7171_v25, %s8158_s29  ;;  %v1693_v15 = vmax.f32 %v10357_v63, %v1578_v33  ;;  %v10358_v52 = vmax.f32 %v8745_v45, 0.0  ;;  %v10359_v25 = vmax.f32 %v8730_v21, 0.0 }
 0x24e   : > { %v1584_v24 = vsel %vm791_vm1, %v7059_v31, %v7060_v22  ;;  %v1585_v29 = vsel %vm791_vm1, %v7060_v22, %v7054_v56  ;;  %v10360_v59 = vmax.f32 %v8749_v18, 0.0  ;;  %v7065_v57 = vunpack.i.h.bf16 %v9101_v36  ;;  %7162 = vrot.lane.b32.xlu0 %v7161_v40, %s8158_s29 }
 0x24f   : > { %v1703_v32 = vmax.f32 %v10358_v52, %v1586_v1  ;;  %v9113_v42 = vpop.permute.xlu1 %7072  ;;  %v7176_v51 = vpack.i.bf16 %v1756_v35, %v1752_v34  ;;  %v1697_v37 = vmax.f32 %v10359_v25, %v1581_v6  ;;  %v7064_v33 = vunpack.i.l.bf16 %v9101_v36 }
 0x250   : > { %v1701_v3 = vmax.f32 %v10360_v59, %v1584_v24  ;;  %v10361_v45 = vmax.f32 %v8693_v54, 0.0  ;;  %v10362_v56 = vmax.f32 %v8674_v48, 0.0  ;;  %v10363_v49 = vmax.f32 %v8727_v14, 0.0 }
 0x251   : > { %v1582_v21 = vsel %vm791_vm1, %v7050_v5, %v7044_v60  ;;  %v7068_v11 = vpop.permute.xlu0 %7067  ;;  %7177 = vrot.lane.b32.xlu1 %v7176_v51, %s8159_s20  ;;  %v10364_v18 = vmax.f32 %v8671_v46, 0.0  ;;  %v10365_v22 = vmax.f32 %v8706_v62, 0.0  ;;  %v10366_v54 = vmax.f32 %v8758_v58, 0.0 }
 0x252   : > { %v1695_v1 = vmax.f32 %v10361_v45, %v1580_v12  ;;  %v1689_v10 = vmax.f32 %v10362_v56, %v1575_v9  ;;  %v1699_v30 = vmax.f32 %v10363_v49, %v1583_v38  ;;  %v9136_v35 = vmax.f32 %v1697_v37, %v1701_v3  ;;  %7167 = vrot.lane.b32.xlu0 %v9068_v7, %s8158_s29 }
 0x253   : > { %v1691_v34 = vmax.f32 %v10364_v18, %v1577_v13  ;;  %v1694_v40 = vmax.f32 %v10365_v22, %v1579_v28  ;;  %v1702_v12 = vmax.f32 %v10366_v54, %v1585_v29  ;;  %v10367_v48 = vmax.f32 %v8689_v20, 0.0  ;;  %v7078_v9 = vpop.permute.xlu1 %7077 }
 0x254   : > { %v9140_v6 = vmax.f32 %v1689_v10, %v1693_v15  ;;  %v9142_v60 = vmax.f32 %v1699_v30, %v1703_v32  ;;  %v10368_v5 = vmax.f32 %v8741_v39, 0.0  ;;  %v1589_v13 = vsel %vm791_vm1, %v7064_v33, %v7065_v57 }
 0x255   : > { %v1690_v14 = vmax.f32 %v10367_v48, %v1576_v53  ;;  %v7075_v62 = vunpack.i.h.bf16 %v9113_v42  ;;  %v7074_v58 = vunpack.i.l.bf16 %v9113_v42  ;;  %v7083_v31 = vpop.permute.xlu0 %7082  ;;  %7182 = vrot.lane.b32.xlu1 %v7176_v51, %s8160_s26  ;;  %v9152_v20 = vmax.f32 %v1691_v34, %v1695_v1 }
 0x256   : > { %v1698_v46 = vmax.f32 %v10368_v5, %v1582_v21  ;;  %v7191_v36 = vpack.i.bf16 %v9136_v35, %v9140_v6  ;;  %v10369_v28 = vmax.f32 %v8789_v19, 0.0  ;;  %v10370_v15 = vmax.f32 %v8779_v47, 0.0 }
 0x257   : > { %v1750_v53 = vmax.f32 %v1690_v14, %v1694_v40  ;;  %v7085_v52 = vunpack.i.h.bf16 %v7083_v31  ;;  %v7093_v32 = vpop.permute.xlu1 %7092  ;;  %v7186_v7 = vpack.i.bf16 %v9142_v60, %v9152_v20  ;;  %v10371_v24 = vmax.f32 %v8805_v17, 0.0 }
 0x258   : > { %v1754_v39 = vmax.f32 %v1698_v46, %v1702_v12  ;;  %v1708_v63 = vmax.f32 %v10369_v28, %v7065_v57  ;;  %v9160_v38 = vmax.f32 %v10370_v15, %v1589_v13  ;;  %v1592_v42 = vsel %vm791_vm1, %v7074_v58, %v7075_v62  ;;  %7192 = vrot.lane.b32.xlu0 %v7191_v36, %s8158_s29 }
 0x259   : > { %v1712_v29 = vmax.f32 %v10371_v24, %v7075_v62  ;;  %v7070_v51 = vunpack.i.h.bf16 %v7068_v11  ;;  %v7069_v25 = vunpack.i.l.bf16 %v7068_v11  ;;  %v7080_v19 = vunpack.i.h.bf16 %v7078_v9  ;;  %v7088_v3 = vpop.permute.xlu0 %7087  ;;  %7187 = vrot.lane.b32.xlu1 %v7186_v7, %s8158_s29  ;;  %v10381_v24 = vld [vmem:[#allocation21_spill] sm:$0xff] }
 0x25a   : > { %v7079_v37 = vunpack.i.l.bf16 %v7078_v9  ;;  %v7095_v59 = vunpack.i.h.bf16 %v7093_v32  ;;  %v7094_v47 = vunpack.i.l.bf16 %v7093_v32  ;;  %v7084_v57 = vunpack.i.l.bf16 %v7083_v31  ;;  %v10379_v32 = vld [vmem:[#allocation19_spill] sm:$0xff] }
 0x25b   : > { %v7090_v45 = vunpack.i.h.bf16 %v7088_v3  ;;  %v7089_v1 = vunpack.i.l.bf16 %v7088_v3  ;;  %v7196_v56 = vpack.i.bf16 %v1754_v39, %v1750_v53  ;;  %v10372_v17 = vmax.f32 %v8797_v43, 0.0  ;;  %v7098_v18 = vpop.permute.xlu1 %7097 }
 0x25c   : > { %v10373_v49 = vmax.f32 %v8841_v0, 0.0  ;;  %v10374_v21 = vmax.f32 %v8857_v26, 0.0  ;;  %v1760_v34 = vmax.f32 %v1708_v63, %v1712_v29  ;;  %v1587_v22 = vsel %vm791_vm1, %v7069_v25, %v7070_v51 }
 0x25d   : > { %v1711_v10 = vmax.f32 %v10372_v17, %v1592_v42  ;;  %v1598_v40 = vsel %vm791_vm1, %v7094_v47, %v7095_v59  ;;  %7197 = vrot.lane.b32.xlu0 %v7196_v56, %s8159_s20  ;;  %v7100_v54 = vunpack.i.h.bf16 %v7098_v18  ;;  %v1590_v12 = vsel %vm791_vm1, %v7079_v37, %v7080_v19  ;;  %v9180_v0 = vpop.permute.xlu0 %7102  ;;  %v10383_v42 = vld [vmem:[#allocation15_spill] sm:$0xff] }
 0x25e   : > { %v1716_v30 = vmax.f32 %v10373_v49, %v7085_v52  ;;  %v1720_v11 = vmax.f32 %v10374_v21, %v7095_v59  ;;  %v1593_v43 = vsel %vm791_vm1, %v7089_v1, %v7090_v45  ;;  %v7099_v14 = vunpack.i.l.bf16 %v7098_v18  ;;  %v10391_v49 = vld [vmem:[#allocation20_spill] sm:$0xff] }
 0x25f   : > { %v1588_v26 = vsel %vm791_vm1, %v7070_v51, %v7064_v33  ;;  %v1591_v9 = vsel %vm791_vm1, %v7080_v19, %v7074_v58  ;;  %v1595_v5 = vsel %vm791_vm1, %v7084_v57, %v7085_v52  ;;  %v1597_v46 = vsel %vm791_vm1, %v7100_v54, %v7094_v47  ;;  %v9190_v53 = vpop.permute.xlu1 %7112  ;;  %v10377_v33 = vld [vmem:[#allocation16_spill] sm:$0xff]  ;;  %v10385_v19 = vld [vmem:[#allocation17_spill] sm:$0xff]  ;;  %v10387_v47 = vld [vmem:[#allocation18_spill] sm:$0xff] }
 0x260   : > { %v1764_v48 = vmax.f32 %v1716_v30, %v1720_v11  ;;  %v10375_v13 = vmax.f32 %v8849_v44, 0.0  ;;  %v1594_v31 = vsel %vm791_vm1, %v7090_v45, %v7084_v57  ;;  %v1596_v36 = vsel %vm791_vm1, %v7099_v14, %v7100_v54  ;;  %v10389_v57 = vld [vmem:[#allocation22_spill] sm:$0xff] }
 0x261   : > { %v10376_v28 = vmax.f32 %v8782_v50, 0.0  ;;  %v10378_v15 = vmax.f32 %v10377_v33, 0.0  ;;  %v10380_v52 = vmax.f32 %v10379_v32, 0.0  ;;  %v10382_v29 = vmax.f32 %v10381_v24, 0.0  ;;  %7202 = vrot.lane.b32.xlu0 %v7196_v56, %s8160_s26  ;;  %v9210_v17 = vpop.permute.xlu0 %7107 }
 0x262   : > { %v1719_v62 = vmax.f32 %v10375_v13, %v1598_v40  ;;  %v7206_v39 = vpack.i.bf16 %v1764_v48, %v1760_v34  ;;  %v10384_v51 = vmax.f32 %v10383_v42, 0.0  ;;  %v10386_v37 = vmax.f32 %v10385_v19, 0.0 }
 0x263   : > { %v1705_v63 = vmax.f32 %v10376_v28, %v1587_v22  ;;  %v1709_v58 = vmax.f32 %v10378_v15, %v1590_v12  ;;  %v1713_v7 = vmax.f32 %v10380_v52, %v1593_v43  ;;  %v1717_v44 = vmax.f32 %v10382_v29, %v1596_v36  ;;  %v7118_v40 = vpop.permute.xlu1 %7117  ;;  %v10397_v52 = vld [vmem:[#allocation23_spill] sm:$0xff] }
 0x264   : > { %v1706_v25 = vmax.f32 %v10384_v51, %v1588_v26  ;;  %v1710_v59 = vmax.f32 %v10386_v37, %v1591_v9  ;;  %v10388_v50 = vmax.f32 %v10387_v47, 0.0  ;;  %v10390_v45 = vmax.f32 %v10389_v57, 0.0  ;;  %7207 = vrot.lane.b32.xlu1 %v7206_v39, %s8159_s20  ;;  %v10401_v57 = vld [vmem:[#allocation33_spill] sm:$0xff] }
 0x265   : > { %v10392_v30 = vmax.f32 %v10391_v49, 0.0  ;;  %v7105_v56 = vunpack.i.h.bf16 %v9180_v0  ;;  %v7104_v11 = vunpack.i.l.bf16 %v9180_v0  ;;  %v9216_v18 = vmax.f32 %v1713_v7, %v1717_v44  ;;  %v7123_v48 = vpop.permute.xlu0 %7122  ;;  %v10423_v0 = vld [vmem:[#allocation26_spill] sm:$0xff] }
 0x266   : > { %v1715_v3 = vmax.f32 %v10388_v50, %v1595_v5  ;;  %v1718_v1 = vmax.f32 %v10390_v45, %v1597_v46  ;;  %v7115_v34 = vunpack.i.h.bf16 %v9190_v53  ;;  %v7114_v22 = vunpack.i.l.bf16 %v9190_v53 }
 0x267   : > { %v1714_v21 = vmax.f32 %v10392_v30, %v1594_v31  ;;  %v9222_v12 = vmax.f32 %v1705_v63, %v1709_v58  ;;  %v9226_v43 = vmax.f32 %v9160_v38, %v1711_v10  ;;  %v1758_v14 = vmax.f32 %v1706_v25, %v1710_v59  ;;  %v7133_v53 = vpop.permute.xlu1 %7132  ;;  %v10393_v10 = vld [vmem:[#allocation25_spill] sm:$0xff]  ;;  %v10399_v25 = vld [vmem:[#allocation27_spill] sm:$0xff] }
 0x268   : > { %v9220_v54 = vmax.f32 %v1715_v3, %v1719_v62  ;;  %7212 = vrot.lane.b32.xlu1 %v7206_v39, %s8160_s26  ;;  %v1601_v9 = vsel %vm791_vm1, %v7104_v11, %v7105_v56  ;;  %v7125_v5 = vunpack.i.h.bf16 %v7123_v48  ;;  %v7124_v46 = vunpack.i.l.bf16 %v7123_v48  ;;  %v10395_v63 = vld [vmem:[#allocation29_spill] sm:$0xff]  ;;  %v10405_v48 = vld [vmem:[#allocation35_spill] sm:$0xff] }
 0x269   : > { %v1762_v26 = vmax.f32 %v1714_v21, %v1718_v1  ;;  %v7221_v13 = vpack.i.bf16 %v9216_v18, %v9222_v12  ;;  %v1604_v62 = vsel %vm791_vm1, %v7114_v22, %v7115_v34  ;;  %v7120_v31 = vunpack.i.h.bf16 %v7118_v40  ;;  %v7128_v42 = vpop.permute.xlu0 %7127 }
 0x26a   : > { %v7119_v36 = vunpack.i.l.bf16 %v7118_v40  ;;  %v7216_v38 = vpack.i.bf16 %v9220_v54, %v9226_v43  ;;  %v10394_v39 = vmax.f32 %v10393_v10, 0.0  ;;  %v10396_v33 = vmax.f32 %v10395_v63, 0.0 }
 0x26b   : > { %v7110_v58 = vunpack.i.h.bf16 %v9210_v17  ;;  %v7109_v32 = vunpack.i.l.bf16 %v9210_v17  ;;  %7222 = vrot.lane.b32.xlu0 %v7221_v13, %s8158_s29  ;;  %v10398_v7 = vmax.f32 %v10397_v52, 0.0  ;;  %v7135_v29 = vunpack.i.h.bf16 %v7133_v53  ;;  %v10403_v17 = vld [vmem:[#allocation37_spill] sm:$0xff]  ;;  %v10407_v13 = vld [vmem:[#allocation31_spill] sm:$0xff] }
 0x26c   : > { %v1724_v28 = vmax.f32 %v10394_v39, %v7105_v56  ;;  %v1728_v15 = vmax.f32 %v10396_v33, %v7115_v34  ;;  %v7134_v44 = vunpack.i.l.bf16 %v7133_v53  ;;  %7217 = vrot.lane.b32.xlu1 %v7216_v38, %s8158_s29  ;;  %v7226_v51 = vpack.i.bf16 %v1762_v26, %v1758_v14  ;;  %v7138_v56 = vpop.permute.xlu1 %7137  ;;  %v10409_v39 = vld [vmem:[#allocation28_spill] sm:$0xff] }
 0x26d   : > { %v1723_v24 = vmax.f32 %v10398_v7, %v1601_v9  ;;  %v10400_v19 = vmax.f32 %v10399_v25, 0.0  ;;  %v1607_v59 = vsel %vm791_vm1, %v7124_v46, %v7125_v5  ;;  %v7130_v47 = vunpack.i.h.bf16 %v7128_v42 }
 0x26e   : > { %v7129_v50 = vunpack.i.l.bf16 %v7128_v42  ;;  %v1602_v3 = vsel %vm791_vm1, %v7119_v36, %v7120_v31  ;;  %v10402_v45 = vmax.f32 %v10401_v57, 0.0  ;;  %v10404_v49 = vmax.f32 %v10403_v17, 0.0  ;;  %v10415_v57 = vld [vmem:[#allocation36_spill] sm:$0xff] }
 0x26f   : > { %v1727_v37 = vmax.f32 %v10400_v19, %v1604_v62  ;;  %v1610_v21 = vsel %vm791_vm1, %v7134_v44, %v7135_v29  ;;  %v1768_v34 = vmax.f32 %v1724_v28, %v1728_v15  ;;  %v1599_v40 = vsel %vm791_vm1, %v7109_v32, %v7110_v58  ;;  %7227 = vrot.lane.b32.xlu0 %v7226_v51, %s8159_s20  ;;  %v10413_v19 = vld [vmem:[#allocation32_spill] sm:$0xff] }
 0x270   : > { %v1732_v1 = vmax.f32 %v10402_v45, %v7125_v5  ;;  %v1736_v30 = vmax.f32 %v10404_v49, %v7135_v29  ;;  %v10406_v14 = vmax.f32 %v10405_v48, 0.0  ;;  %v7140_v9 = vunpack.i.h.bf16 %v7138_v56  ;;  %v10411_v29 = vld [vmem:[#allocation24_spill] sm:$0xff]  ;;  %v10417_v45 = vld [vmem:[#allocation38_spill] sm:$0xff] }
 0x271   : > { %v10408_v62 = vmax.f32 %v10407_v13, 0.0  ;;  %v1605_v5 = vsel %vm791_vm1, %v7129_v50, %v7130_v47  ;;  %v7139_v38 = vunpack.i.l.bf16 %v7138_v56  ;;  %v1603_v10 = vsel %vm791_vm1, %v7120_v31, %v7114_v22 }
 0x272   : > { %v1735_v26 = vmax.f32 %v10406_v14, %v1610_v21  ;;  %v1772_v53 = vmax.f32 %v1732_v1, %v1736_v30  ;;  %v10410_v63 = vmax.f32 %v10409_v39, 0.0  ;;  %v1609_v33 = vsel %vm791_vm1, %v7140_v9, %v7134_v44  ;;  %v10421_v30 = vld [vmem:[#allocation34_spill] sm:$0xff] }
 0x273   : > { %v1731_v36 = vmax.f32 %v10408_v62, %v1607_v59  ;;  %v1606_v15 = vsel %vm791_vm1, %v7130_v47, %v7124_v46  ;;  %v1608_v32 = vsel %vm791_vm1, %v7139_v38, %v7140_v9  ;;  %v10412_v42 = vmax.f32 %v10411_v29, 0.0  ;;  %7232 = vrot.lane.b32.xlu0 %v7226_v51, %s8160_s26  ;;  %v10419_v47 = vld [vmem:[#allocation30_spill] sm:$0xff] }
 0x274   : > { %v1725_v28 = vmax.f32 %v10410_v63, %v1602_v3  ;;  %v7236_v52 = vpack.i.bf16 %v1772_v53, %v1768_v34  ;;  %v10414_v59 = vmax.f32 %v10413_v19, 0.0  ;;  %v10416_v22 = vmax.f32 %v10415_v57, 0.0 }
 0x275   : > { %v9268_v7 = vmax.f32 %v1731_v36, %v1735_v26  ;;  %v1721_v25 = vmax.f32 %v10412_v42, %v1599_v40  ;;  %v10418_v3 = vmax.f32 %v10417_v45, 0.0  ;;  %v1600_v46 = vsel %vm791_vm1, %v7110_v58, %v7104_v11 }
 0x276   : > { %v1729_v50 = vmax.f32 %v10414_v59, %v1605_v5  ;;  %v1733_v31 = vmax.f32 %v10416_v22, %v1608_v32  ;;  %7237 = vrot.lane.b32.xlu1 %v7236_v52, %s8159_s20  ;;  %v9283_v44 = vmax.f32 %v1723_v24, %v1727_v37  ;;  %v10420_v17 = vmax.f32 %v10419_v47, 0.0  ;;  %v7531_v22 = vld [vmem:[#allocation3 + $0x200] ss:$16 sps:$4 sm:$0xff]   ;;  %v7542_v47 = vld [vmem:[#allocation3 + $0x22c] ss:$16 sps:$4 sm:$0xff]  }
 0x277   : > { %v1734_v1 = vmax.f32 %v10418_v3, %v1609_v33  ;;  %v10422_v21 = vmax.f32 %v10421_v30, 0.0  ;;  %v9289_v34 = vmax.f32 %v1721_v25, %v1725_v28  ;;  %v10424_v48 = vmax.f32 %v10423_v0, 0.0 }
 0x278   : > { %v1726_v49 = vmax.f32 %v10420_v17, %v1603_v10  ;;  %v9291_v40 = vmax.f32 %v1729_v50, %v1733_v31  ;;  %v7241_v51 = vpack.i.bf16 %v9268_v7, %v9283_v44  ;;  %v7534_v31 = vld [vmem:[#allocation3 + $0x208] ss:$16 sps:$4 sm:$0xff]  }
 0x279   : > { %v1730_v56 = vmax.f32 %v10422_v21, %v1606_v15  ;;  %v1722_v11 = vmax.f32 %v10424_v48, %v1600_v46  ;;  %v7539_v46 = vld [vmem:[#allocation3 + $0x224] ss:$16 sps:$4 sm:$0xff]   ;;  %v10425_v48 = vmax.f32 %v9007_v41, 0.0 }
 0x27a   : > { %v7251_v58 = vpack.i.bf16 %v9291_v40, %v9289_v34  ;;  %7242 = vrot.lane.b32.xlu1 %v7241_v51, %s8158_s29  ;;  %v7540_v51 = vld [vmem:[#allocation3 + $0x228] ss:$16 sps:$4 sm:$0xff]  }
 0x27b   : > { %v1770_v24 = vmax.f32 %v1730_v56, %v1734_v1  ;;  %v1766_v37 = vmax.f32 %v1722_v11, %v1726_v49  ;;  %v7537_v56 = vld [vmem:[#allocation3 + $0x220] ss:$16 sps:$4 sm:$0xff]  }
 0x27c   : > { %7252 = vrot.lane.b32.xlu0 %v7251_v58, %s8158_s29 }
 0x27d   : > { %v7256_v14 = vpack.i.bf16 %v1770_v24, %v1766_v37 }
 0x27e   : > { %7247 = vrot.lane.b32.xlu1 %v7236_v52, %s8160_s26 }
 0x280   : > { %7257 = vrot.lane.b32.xlu0 %v7256_v14, %s8159_s20 }
 0x284   : > { %7262 = vrot.lane.b32.xlu0 %v7256_v14, %s8160_s26  ;;  %v7545_v14 = vld [vmem:[#allocation3 + $0x244] ss:$16 sps:$4 sm:$0xff]  }
 0x2b7   : > { %v7148_v26 = vpop.permute.xlu1 %7147 }
 0x2b8   : > { %v7143_v9 = vpop.permute.xlu0 %7142  ;;  %v7150_v53 = vunpack.i.h.bf16 %v7148_v26  ;;  %v7149_v5 = vunpack.i.l.bf16 %v7148_v26  ;;  %v7548_v26 = vld [vmem:[#allocation3 + $0x24c] ss:$16 sps:$4 sm:$0xff]  }
 0x2b9   : > { %v7145_v13 = vunpack.i.h.bf16 %v7143_v9  ;;  %v7144_v62 = vunpack.i.l.bf16 %v7143_v9  ;;  %v10426_v9 = vmax.f32 %v8990_v8, 0.0 }
 0x2bb   : > { %v9304_v36 = vpop.permute.xlu1 %7157  ;;  %v1954_v38 = vsel %vm1953_vm3, %v9051_v4, %v7145_v13  ;;  %v1979_v10 = vsel %vm1953_vm3, %v9057_v16, %v7144_v62  ;;  %v10267_v16 = vmov 0.0   ;;  %v10427_v62 = vmax.f32 %v9004_v61, 0.0 }
 0x2bc   : > { %v7153_v39 = vpop.permute.xlu0 %7152  ;;  %v1963_v15 = vsel %vm1962_vm4, %v1954_v38, %v7150_v53  ;;  %v1987_v32 = vsel %vm1962_vm4, %v1979_v10, %v7149_v5  ;;  %v7160_v52 = vunpack.i.h.bf16 %v9304_v36  ;;  %v7159_v29 = vunpack.i.l.bf16 %v9304_v36 }
 0x2bd   : > { %v7155_v63 = vunpack.i.h.bf16 %v7153_v39  ;;  %v7154_v28 = vunpack.i.l.bf16 %v7153_v39  ;;  %v10428_v53 = vmax.f32 %v9014_v55, 0.0  ;;  %v10429_v10 = vmax.f32 %v9011_v2, 0.0  ;;  %v10432_v55 = vld [vmem:[#allocation39_spill] sm:$0xff] }
 0x2be   : > { %v1613_v17 = vsel %vm791_vm1, %v7159_v29, %v7160_v52 }
 0x2bf   : > { %v7173_v33 = vpop.permute.xlu1 %7172  ;;  %v9315_v42 = vsel %vm791_vm1, %v1963_v15, %v7155_v63  ;;  %v9318_v4 = vsel %vm791_vm1, %v1987_v32, %v7154_v28  ;;  %v1739_v13 = vmax.f32 %v10426_v9, %v1613_v17  ;;  %v10430_v63 = vmax.f32 %v8998_v23, 0.0  ;;  %v7543_v15 = vld [vmem:[#allocation3 + $0x240] ss:$16 sps:$4 sm:$0xff]   ;;  %v7546_v32 = vld [vmem:[#allocation3 + $0x248] ss:$16 sps:$4 sm:$0xff]  }
 0x2c0   : > { %v2003_v25 = vpack.c.bf16 %v9315_v42, %v10267_v16  ;;  %v7175_v19 = vunpack.i.h.bf16 %v7173_v33  ;;  %v7174_v59 = vunpack.i.l.bf16 %v7173_v33  ;;  %v7163_v50 = vpop.permute.xlu0 %7162  ;;  %v2004_v57 = vpack.c.bf16 %v9318_v4, %v10267_v16  ;;  %v7551_v23 = vld [vmem:[#allocation3 + $0x264] ss:$16 sps:$4 sm:$0xff]  }
 0x2c1   : > { %v7165_v45 = vunpack.i.h.bf16 %v7163_v50  ;;  %v7164_v3 = vunpack.i.l.bf16 %v7163_v50  ;;  %v10431_v33 = vmax.f32 %v8987_v27, 0.0  ;;  %v7554_v50 = vld [vmem:[#allocation3 + $0x26c] ss:$16 sps:$4 sm:$0xff]  }
 0x2c2   : > { %3227 = vmatprep.mubr.bf16.mxu0 %v2004_v57  ;;  %3446 = vmatprep.mubr.bf16.mxu1 %v2004_v57  ;;  %v1614_v30 = vsel %vm791_vm1, %v7174_v59, %v7175_v19 }
 0x2c3   : > { %v9324_v1 = vpop.permute.xlu1 %7177  ;;  %v1616_v49 = vsel %vm791_vm1, %v7164_v3, %v7165_v45  ;;  %3228 = vmatmul.mubr.bf16.vlgmr.msra.gmra.mrb[32].mxu0 %v2003_v25  ;;  %3447 = vmatmul.mubr.bf16.vlgmr.msra.gmra.mrb[32].mxu1 %v2003_v25  ;;  %v1615_v0 = vsel %vm791_vm1, %v7175_v19, %v7164_v3  ;;  %v1741_v36 = vmax.f32 %v10427_v62, %v1614_v30  ;;  %v10433_v25 = vmax.f32 %v10432_v55, 0.0  ;;  %v7572_v55 = vld [vmem:[#allocation3 + $0x2cc] ss:$16 sps:$4 sm:$0xff]  }
 0x2c4   : > { %3269 = vmatpush1.bf16.msra.mxu0 %v7531_v22  ;;  %3488 = vmatpush1.bf16.msra.mxu1 %v7534_v31  ;;  %v7168_v21 = vpop.permute.xlu0 %7167  ;;  %v1743_v11 = vmax.f32 %v10425_v48, %v1616_v49  ;;  %v1744_v5 = vmax.f32 %v10428_v53, %v7165_v45  ;;  %v1742_v39 = vmax.f32 %v10429_v10, %v1615_v0  ;;  %v7179_v3 = vunpack.i.l.bf16 %v9324_v1  ;;  %v7563_v10 = vld [vmem:[#allocation3 + $0x2a4] ss:$16 sps:$4 sm:$0xff]  }
 0x2c5   : > { %v7170_v58 = vunpack.i.h.bf16 %v7168_v21  ;;  %v7169_v24 = vunpack.i.l.bf16 %v7168_v21  ;;  %3270 = vmatprep.subr.bf16.mxu0 %v7539_v46  ;;  %3489 = vmatprep.subr.bf16.mxu1 %v7542_v47  ;;  %v1740_v19 = vmax.f32 %v10433_v25, %v7160_v52 }
 0x2c6   : > { %v9349_v59 = vmax.f32 %v1739_v13, %v1743_v11  ;;  %v7552_v11 = vld [vmem:[#allocation3 + $0x268] ss:$16 sps:$4 sm:$0xff]   ;;  %v7555_v13 = vld [vmem:[#allocation3 + $0x280] ss:$16 sps:$4 sm:$0xff]  }
 0x2c7   : > { %v7183_v37 = vpop.permute.xlu1 %7182  ;;  %v1612_v38 = vsel %vm791_vm1, %v7170_v58, %v7159_v29  ;;  %v1611_v41 = vsel %vm791_vm1, %v7169_v24, %v7170_v58  ;;  %v7180_v29 = vunpack.i.h.bf16 %v9324_v1  ;;  %v1776_v45 = vmax.f32 %v1740_v19, %v1744_v5  ;;  %v7557_v58 = vld [vmem:[#allocation3 + $0x284] ss:$16 sps:$4 sm:$0xff]   ;;  %v7567_v19 = vld [vmem:[#allocation3 + $0x2c0] ss:$16 sps:$4 sm:$0xff]  }
 0x2c8   : > { %v1738_v28 = vmax.f32 %v10430_v63, %v1612_v38  ;;  %v1737_v8 = vmax.f32 %v10431_v33, %v1611_v41  ;;  %3271 = vmatpush1.bf16.msra.mxu0 %v7537_v56  ;;  %3490 = vmatpush1.bf16.msra.mxu1 %v7540_v51  ;;  %v7185_v46 = vunpack.i.h.bf16 %v7183_v37  ;;  %v7184_v47 = vunpack.i.l.bf16 %v7183_v37  ;;  %v7549_v56 = vld [vmem:[#allocation3 + $0x260] ss:$16 sps:$4 sm:$0xff]   ;;  %v7558_v38 = vld [vmem:[#allocation3 + $0x288] ss:$16 sps:$4 sm:$0xff]  }
 0x2c9   : > { %3272 = vmatprep.subr.bf16.mxu0 %v7545_v14  ;;  %3491 = vmatprep.subr.bf16.mxu1 %v7548_v26 }
 0x2ca   : > { %v7193_v61 = vpop.permute.xlu0 %7192  ;;  %v9351_v22 = vmax.f32 %v1737_v8, %v1741_v36  ;;  %v1774_v31 = vmax.f32 %v1738_v28, %v1742_v39  ;;  %v7561_v8 = vld [vmem:[#allocation3 + $0x2a0] ss:$16 sps:$4 sm:$0xff]  }
 0x2cb   : > { %v7188_v2 = vpop.permute.xlu1 %7187  ;;  %v7195_v52 = vunpack.i.h.bf16 %v7193_v61  ;;  %v7194_v51 = vunpack.i.l.bf16 %v7193_v61  ;;  %v7564_v61 = vld [vmem:[#allocation3 + $0x2a8] ss:$16 sps:$4 sm:$0xff]  }
 0x2cc   : > { %v7190_v57 = vunpack.i.h.bf16 %v7188_v2  ;;  %v7189_v27 = vunpack.i.l.bf16 %v7188_v2  ;;  %3273 = vmatpush1.bf16.msra.mxu0 %v7543_v15  ;;  %3492 = vmatpush1.bf16.msra.mxu1 %v7546_v32  ;;  %v7266_v21 = vpack.i.bf16 %v9351_v22, %v9349_v59  ;;  %v7569_v32 = vld [vmem:[#allocation3 + $0x2c4] ss:$16 sps:$4 sm:$0xff]  }
 0x2cd   : > { %3274 = vmatprep.subr.bf16.mxu0 %v7551_v23  ;;  %3493 = vmatprep.subr.bf16.mxu1 %v7554_v50  ;;  %v1956_v62 = vsel %vm1953_vm3, %v9136_v35, %v7195_v52  ;;  %v1955_v36 = vsel %vm1953_vm3, %v9140_v6, %v7194_v51  ;;  %v7566_v6 = vld [vmem:[#allocation3 + $0x2ac] ss:$16 sps:$4 sm:$0xff]   ;;  %v7575_v23 = vld [vmem:[#allocation3 + $0x2e4] ss:$16 sps:$4 sm:$0xff]  }
 0x2ce   : > { %v1981_v17 = vsel %vm1953_vm3, %v9142_v60, %v7190_v57  ;;  %v1980_v49 = vsel %vm1953_vm3, %v9152_v20, %v7189_v27  ;;  %7267 = vrot.lane.b32.xlu1 %v7266_v21, %s8158_s29  ;;  %v7271_v60 = vpack.i.bf16 %v1774_v31, %v1776_v45  ;;  %v7560_v20 = vld [vmem:[#allocation3 + $0x28c] ss:$16 sps:$4 sm:$0xff]  }
 0x2cf   : > { %v7198_v30 = vpop.permute.xlu0 %7197  ;;  %v1988_v0 = vsel %vm1962_vm4, %v1980_v49, %v7179_v3  ;;  %v1989_v1 = vsel %vm1962_vm4, %v1981_v17, %v7180_v29  ;;  %v7570_v29 = vld [vmem:[#allocation3 + $0x2c8] ss:$16 sps:$4 sm:$0xff]   ;;  %v7578_v27 = vld [vmem:[#allocation3 + $0x2ec] ss:$16 sps:$4 sm:$0xff]   ;;  %v7573_v49 = vld [vmem:[#allocation3 + $0x2e0] ss:$16 sps:$4 sm:$0xff]  }
 0x2d0   : > { %v7200_v48 = vunpack.i.h.bf16 %v7198_v30  ;;  %v7199_v24 = vunpack.i.l.bf16 %v7198_v30  ;;  %v9364_v37 = vsel %vm791_vm1, %v1988_v0, %v7184_v47  ;;  %v9367_v14 = vsel %vm791_vm1, %v1989_v1, %v7185_v46  ;;  %7272 = vrot.lane.b32.xlu0 %v7271_v60, %s8159_s20  ;;  %3275 = vmatpush1.bf16.msra.mxu0 %v7549_v56  ;;  %v7576_v0 = vld [vmem:[#allocation3 + $0x2e8] ss:$16 sps:$4 sm:$0xff]   ;;  %v7581_v1 = vld [vmem:[#allocation3 + $0x304] ss:$16 sps:$4 sm:$0xff]  }
 0x2d1   : > { %v9371_v26 = vpack.c.bf16 %v9367_v14, %v9364_v37  ;;  %3494 = vmatpush1.bf16.msra.mxu1 %v7552_v11  ;;  %3276 = vmatprep.subr.bf16.mxu0 %v7557_v58 }
 0x2d2   : > { %v1964_v39 = vsel %vm1962_vm4, %v1955_v36, %v7199_v24  ;;  %v1965_v63 = vsel %vm1962_vm4, %v1956_v62, %v7200_v48  ;;  %7277 = vrot.lane.b32.xlu1 %v7271_v60, %s8160_s26  ;;  %3495 = vmatprep.subr.bf16.mxu1 %v7560_v20  ;;  %v7579_v20 = vld [vmem:[#allocation3 + $0x300] ss:$16 sps:$4 sm:$0xff]  }
 0x2d3   : > { %v7203_v9 = vpop.permute.xlu0 %7202  ;;  %3237 = vmatprep.mubr.bf16.mxu0 %v9371_v26  ;;  %3456 = vmatprep.mubr.bf16.mxu1 %v9371_v26 }
 0x2d4   : > { %v7205_v53 = vunpack.i.h.bf16 %v7203_v9  ;;  %v7204_v5 = vunpack.i.l.bf16 %v7203_v9  ;;  %3277 = vmatpush1.bf16.msra.mxu0 %v7555_v13 }
 0x2d5   : > { %3496 = vmatpush1.bf16.msra.mxu1 %v7558_v38  ;;  %3278 = vmatprep.subr.bf16.mxu0 %v7563_v10  ;;  %v7587_v38 = vld [vmem:[#allocation3 + $0x324] ss:$16 sps:$4 sm:$0xff]  }
 0x2d6   : > { %v7208_v41 = vpop.permute.xlu1 %7207  ;;  %v9382_v28 = vsel %vm791_vm1, %v1964_v39, %v7204_v5  ;;  %v9385_v35 = vsel %vm791_vm1, %v1965_v63, %v7205_v53  ;;  %3497 = vmatprep.subr.bf16.mxu1 %v7566_v6  ;;  %v7582_v53 = vld [vmem:[#allocation3 + $0x308] ss:$16 sps:$4 sm:$0xff]   ;;  %v7585_v6 = vld [vmem:[#allocation3 + $0x320] ss:$16 sps:$4 sm:$0xff]  }
 0x2d7   : > { %v9391_v33 = vpack.c.bf16 %v9385_v35, %v9382_v28  ;;  %v7210_v31 = vunpack.i.h.bf16 %v7208_v41  ;;  %v7209_v45 = vunpack.i.l.bf16 %v7208_v41 }
 0x2d8   : > { %3279 = vmatpush1.bf16.msra.mxu0 %v7561_v8  ;;  %v7588_v8 = vld [vmem:[#allocation3 + $0x328] ss:$16 sps:$4 sm:$0xff]  }
 0x2d9   : > { %3238 = vmatmul.mubr.bf16.gmra.mrb[36].mxu0 %v9391_v33  ;;  %3457 = vmatmul.mubr.bf16.gmra.mrb[36].mxu1 %v9391_v33 }
 0x2da   : > { %v7213_v15 = vpop.permute.xlu1 %7212  ;;  %3498 = vmatpush1.bf16.msra.mxu1 %v7564_v61  ;;  %3280 = vmatprep.subr.bf16.mxu0 %v7569_v32 }
 0x2db   : > { %3499 = vmatprep.subr.bf16.mxu1 %v7572_v55  ;;  %v7215_v3 = vunpack.i.h.bf16 %v7213_v15  ;;  %v7214_v46 = vunpack.i.l.bf16 %v7213_v15  ;;  %v7593_v15 = vld [vmem:[#allocation3 + $0x344] ss:$16 sps:$4 sm:$0xff]  }
 0x2dc   : > { %3281 = vmatpush1.bf16.msra.mxu0 %v7567_v19  ;;  %v7596_v19 = vld [vmem:[#allocation3 + $0x34c] ss:$16 sps:$4 sm:$0xff]  }
 0x2dd   : > { %v7223_v25 = vpop.permute.xlu0 %7222  ;;  %3282 = vmatprep.subr.bf16.mxu0 %v7575_v23  ;;  %v7591_v23 = vld [vmem:[#allocation3 + $0x340] ss:$16 sps:$4 sm:$0xff]  }
 0x2de   : > { %v7218_v2 = vpop.permute.xlu1 %7217  ;;  %v7225_v30 = vunpack.i.h.bf16 %v7223_v25  ;;  %v7224_v21 = vunpack.i.l.bf16 %v7223_v25  ;;  %3500 = vmatpush1.bf16.msra.mxu1 %v7570_v29 }
 0x2df   : > { %v7220_v50 = vunpack.i.h.bf16 %v7218_v2  ;;  %v7219_v57 = vunpack.i.l.bf16 %v7218_v2  ;;  %3501 = vmatprep.subr.bf16.mxu1 %v7578_v27  ;;  %v7594_v27 = vld [vmem:[#allocation3 + $0x348] ss:$16 sps:$4 sm:$0xff]  }
 0x2e0   : > { %3283 = vmatpush1.bf16.msra.mxu0 %v7573_v49  ;;  %v1958_v9 = vsel %vm1953_vm3, %v9216_v18, %v7225_v30  ;;  %v1957_v13 = vsel %vm1953_vm3, %v9222_v12, %v7224_v21  ;;  %v7590_v12 = vld [vmem:[#allocation3 + $0x32c] ss:$16 sps:$4 sm:$0xff]  }
 0x2e1   : > { %v1983_v47 = vsel %vm1953_vm3, %v9220_v54, %v7220_v50  ;;  %v1982_v52 = vsel %vm1953_vm3, %v9226_v43, %v7219_v57  ;;  %v7228_v17 = vpop.permute.xlu0 %7227  ;;  %v7584_v54 = vld [vmem:[#allocation3 + $0x30c] ss:$16 sps:$4 sm:$0xff]   ;;  %3284 = vmatprep.subr.bf16.mxu0 %v7581_v1 }
 0x2e2   : > { %v1990_v56 = vsel %vm1962_vm4, %v1982_v52, %v7209_v45  ;;  %v1991_v51 = vsel %vm1962_vm4, %v1983_v47, %v7210_v31  ;;  %v7230_v48 = vunpack.i.h.bf16 %v7228_v17  ;;  %v7229_v11 = vunpack.i.l.bf16 %v7228_v17  ;;  %3502 = vmatpush1.bf16.msra.mxu1 %v7576_v0  ;;  %v7599_v45 = vld [vmem:[#allocation3 + $0x364] ss:$16 sps:$4 sm:$0xff]   ;;  %v7602_v52 = vld [vmem:[#allocation3 + $0x36c] ss:$16 sps:$4 sm:$0xff]   ;;  %v7597_v0 = vld [vmem:[#allocation3 + $0x360] ss:$16 sps:$4 sm:$0xff]  }
 0x2e3   : > { %v9402_v58 = vsel %vm791_vm1, %v1990_v56, %v7214_v46  ;;  %v9405_v43 = vsel %vm791_vm1, %v1991_v51, %v7215_v3  ;;  %3503 = vmatprep.subr.bf16.mxu1 %v7584_v54 }
 0x2e4   : > { %v9409_v24 = vpack.c.bf16 %v9405_v43, %v9402_v58  ;;  %v1966_v41 = vsel %vm1962_vm4, %v1957_v13, %v7229_v11  ;;  %v1967_v10 = vsel %vm1962_vm4, %v1958_v9, %v7230_v48  ;;  %3285 = vmatpush1.bf16.msra.mxu0 %v7579_v20  ;;  %v7600_v48 = vld [vmem:[#allocation3 + $0x368] ss:$16 sps:$4 sm:$0xff]   ;;  %v7605_v11 = vld [vmem:[#allocation3 + $0x384] ss:$16 sps:$4 sm:$0xff]  }
 0x2e5   : > { %v7233_v60 = vpop.permute.xlu0 %7232  ;;  %3286 = vmatprep.subr.bf16.mxu0 %v7587_v38 }
 0x2e6   : > { %v7235_v62 = vunpack.i.h.bf16 %v7233_v60  ;;  %v7234_v36 = vunpack.i.l.bf16 %v7233_v60  ;;  %3247 = vmatprep.mubr.bf16.mxu0 %v9409_v24  ;;  %3466 = vmatprep.mubr.bf16.mxu1 %v9409_v24  ;;  %v7608_v60 = vld [vmem:[#allocation3 + $0x38c] ss:$16 sps:$4 sm:$0xff]  }
 0x2e7   : > { %3504 = vmatpush1.bf16.msra.mxu1 %v7582_v53 }
 0x2e8   : > { %v7238_v5 = vpop.permute.xlu1 %7237  ;;  %v9419_v39 = vsel %vm791_vm1, %v1966_v41, %v7234_v36  ;;  %v9422_v18 = vsel %vm791_vm1, %v1967_v10, %v7235_v62  ;;  %3505 = vmatprep.subr.bf16.mxu1 %v7590_v12  ;;  %3287 = vmatpush1.bf16.msra.mxu0 %v7585_v6  ;;  %v7611_v10 = vld [vmem:[#allocation3 + $0x3a4] ss:$16 sps:$4 sm:$0xff]   ;;  %v7614_v12 = vld [vmem:[#allocation3 + $0x3ac] ss:$16 sps:$4 sm:$0xff]   ;;  %v7609_v6 = vld [vmem:[#allocation3 + $0x3a0] ss:$16 sps:$4 sm:$0xff]  }
 0x2e9   : > { %v9427_v63 = vpack.c.bf16 %v9422_v18, %v9419_v39  ;;  %v7240_v50 = vunpack.i.h.bf16 %v7238_v5  ;;  %v7239_v57 = vunpack.i.l.bf16 %v7238_v5  ;;  %3288 = vmatprep.subr.bf16.mxu0 %v7593_v15  ;;  %v7603_v5 = vld [vmem:[#allocation3 + $0x380] ss:$16 sps:$4 sm:$0xff]   ;;  %v7617_v15 = vld [vmem:[#allocation3 + $0x3c4] ss:$16 sps:$4 sm:$0xff]  }
 0x2eb   : > { %3248 = vmatmul.mubr.bf16.gmra.mrb[40].mxu0 %v9427_v63  ;;  %3467 = vmatmul.mubr.bf16.gmra.mrb[40].mxu1 %v9427_v63 }
 0x2ec   : > { %v7243_v61 = vpop.permute.xlu1 %7242  ;;  %3506 = vmatpush1.bf16.msra.mxu1 %v7588_v8  ;;  %3289 = vmatpush1.bf16.msra.mxu0 %v7591_v23  ;;  %v7612_v8 = vld [vmem:[#allocation3 + $0x3a8] ss:$16 sps:$4 sm:$0xff]  }
 0x2ed   : > { %v7245_v32 = vunpack.i.h.bf16 %v7243_v61  ;;  %v7244_v55 = vunpack.i.l.bf16 %v7243_v61  ;;  %3507 = vmatprep.subr.bf16.mxu1 %v7596_v19  ;;  %3290 = vmatprep.subr.bf16.mxu0 %v7599_v45  ;;  %v2006_v61 = vpack.c.bf16 %v9364_v37, %v9318_v4  ;;  %v7623_v19 = vld [vmem:[#allocation3 + $0x3e4] ss:$16 sps:$4 sm:$0xff]   ;;  %v7624_v23 = vld [vmem:[#allocation3 + $0x3e8] ss:$16 sps:$4 sm:$0xff]   ;;  %v7632_v37 = vld [vmem:[#allocation3 + $0x40c] ss:$16 sps:$4 sm:$0xff]  }
 0x2ee   : > { %v7253_v25 = vpop.permute.xlu0 %7252  ;;  %v7629_v4 = vld [vmem:[#allocation3 + $0x404] ss:$16 sps:$4 sm:$0xff]  }
 0x2ef   : > { %v1985_v29 = vsel %vm1953_vm3, %v9268_v7, %v7245_v32  ;;  %v1984_v2 = vsel %vm1953_vm3, %v9283_v44, %v7244_v55  ;;  %v7255_v17 = vunpack.i.h.bf16 %v7253_v25  ;;  %v7254_v49 = vunpack.i.l.bf16 %v7253_v25  ;;  %v7620_v32 = vld [vmem:[#allocation3 + $0x3cc] ss:$16 sps:$4 sm:$0xff]   ;;  %v7615_v55 = vld [vmem:[#allocation3 + $0x3c0] ss:$16 sps:$4 sm:$0xff]   ;;  %v7618_v25 = vld [vmem:[#allocation3 + $0x3c8] ss:$16 sps:$4 sm:$0xff]  }
 0x2f0   : > { %v7248_v31 = vpop.permute.xlu1 %7247  ;;  %v1992_v7 = vsel %vm1962_vm4, %v1984_v2, %v7239_v57  ;;  %v1993_v44 = vsel %vm1962_vm4, %v1985_v29, %v7240_v50  ;;  %3508 = vmatpush1.bf16.msra.mxu1 %v7594_v27  ;;  %3291 = vmatpush1.bf16.msra.mxu0 %v7597_v0  ;;  %v7626_v29 = vld [vmem:[#allocation3 + $0x3ec] ss:$16 sps:$4 sm:$0xff]   ;;  %v7621_v2 = vld [vmem:[#allocation3 + $0x3e0] ss:$16 sps:$4 sm:$0xff]   ;;  %v2005_v50 = vpack.c.bf16 %v9382_v28, %v9315_v42  ;;  %v7635_v45 = vld [vmem:[#allocation3 + $0x424] ss:$16 sps:$4 sm:$0xff]  }
 0x2f1   : > { %v7250_v3 = vunpack.i.h.bf16 %v7248_v31  ;;  %v7249_v46 = vunpack.i.l.bf16 %v7248_v31  ;;  %3509 = vmatprep.subr.bf16.mxu1 %v7602_v52  ;;  %v1960_v20 = vsel %vm1953_vm3, %v9291_v40, %v7255_v17  ;;  %v1959_v9 = vsel %vm1953_vm3, %v9289_v34, %v7254_v49  ;;  %3292 = vmatprep.subr.bf16.mxu0 %v7605_v11  ;;  %v7606_v34 = vld [vmem:[#allocation3 + $0x388] ss:$16 sps:$4 sm:$0xff]   ;;  %v7627_v57 = vld [vmem:[#allocation3 + $0x400] ss:$16 sps:$4 sm:$0xff]   ;;  %v7641_v42 = vld [vmem:[#allocation3 + $0x444] ss:$16 sps:$4 sm:$0xff]  }
 0x2f2   : > { %v7258_v47 = vpop.permute.xlu0 %7257  ;;  %v2010_v27 = vpack.c.bf16 %v9402_v58, %v9367_v14  ;;  %v7630_v31 = vld [vmem:[#allocation3 + $0x408] ss:$16 sps:$4 sm:$0xff]   ;;  %v7644_v28 = vld [vmem:[#allocation3 + $0x44c] ss:$16 sps:$4 sm:$0xff]   ;;  %v2009_v52 = vpack.c.bf16 %v9419_v39, %v9385_v35  ;;  %v7639_v14 = vld [vmem:[#allocation3 + $0x440] ss:$16 sps:$4 sm:$0xff]  }
 0x2f3   : > { %v9438_v30 = vsel %vm791_vm1, %v1992_v7, %v7249_v46  ;;  %v9441_v21 = vsel %vm791_vm1, %v1993_v44, %v7250_v3  ;;  %v7260_v56 = vunpack.i.h.bf16 %v7258_v47  ;;  %v7259_v51 = vunpack.i.l.bf16 %v7258_v47  ;;  %v7638_v3 = vld [vmem:[#allocation3 + $0x42c] ss:$16 sps:$4 sm:$0xff]   ;;  %v7633_v46 = vld [vmem:[#allocation3 + $0x420] ss:$16 sps:$4 sm:$0xff]   ;;  %v7636_v47 = vld [vmem:[#allocation3 + $0x428] ss:$16 sps:$4 sm:$0xff]  }
 0x2f4   : > { %v9445_v1 = vpack.c.bf16 %v9441_v21, %v9438_v30  ;;  %3510 = vmatpush1.bf16.msra.mxu1 %v7600_v48  ;;  %3293 = vmatpush1.bf16.msra.mxu0 %v7603_v5  ;;  %v2014_v58 = vpack.c.bf16 %v9438_v30, %v9405_v43  ;;  %v7642_v17 = vld [vmem:[#allocation3 + $0x448] ss:$16 sps:$4 sm:$0xff]   ;;  %v7647_v49 = vld [vmem:[#allocation3 + $0x464] ss:$16 sps:$4 sm:$0xff]   ;;  %v7650_v7 = vld [vmem:[#allocation3 + $0x46c] ss:$16 sps:$4 sm:$0xff]  }
 0x2f5   : > { %v1968_v36 = vsel %vm1962_vm4, %v1959_v9, %v7259_v51  ;;  %v1969_v53 = vsel %vm1962_vm4, %v1960_v20, %v7260_v56  ;;  %3511 = vmatprep.subr.bf16.mxu1 %v7608_v60  ;;  %3294 = vmatprep.subr.bf16.mxu0 %v7611_v10  ;;  %v7645_v44 = vld [vmem:[#allocation3 + $0x460] ss:$16 sps:$4 sm:$0xff]   ;;  %v7648_v35 = vld [vmem:[#allocation3 + $0x468] ss:$16 sps:$4 sm:$0xff]   ;;  %v7653_v39 = vld [vmem:[#allocation3 + $0x484] ss:$16 sps:$4 sm:$0xff]  }
 0x2f6   : > { %v7263_v54 = vpop.permute.xlu0 %7262  ;;  %3257 = vmatprep.mubr.bf16.mxu0 %v9445_v1  ;;  %3476 = vmatprep.mubr.bf16.mxu1 %v9445_v1  ;;  %v7656_v56 = vld [vmem:[#allocation3 + $0x48c] ss:$16 sps:$4 sm:$0xff]   ;;  %v7651_v30 = vld [vmem:[#allocation3 + $0x480] ss:$16 sps:$4 sm:$0xff]   ;;  %v7654_v51 = vld [vmem:[#allocation3 + $0x488] ss:$16 sps:$4 sm:$0xff]  }
 0x2f7   : > { %v7265_v13 = vunpack.i.h.bf16 %v7263_v54  ;;  %v7264_v62 = vunpack.i.l.bf16 %v7263_v54  ;;  %v7659_v0 = vld [vmem:[#allocation3 + $0x4a4] ss:$16 sps:$4 sm:$0xff]   ;;  %v7662_v48 = vld [vmem:[#allocation3 + $0x4ac] ss:$16 sps:$4 sm:$0xff]   ;;  %v7657_v11 = vld [vmem:[#allocation3 + $0x4a0] ss:$16 sps:$4 sm:$0xff]  }
 0x2f8   : > { %3512 = vmatpush1.bf16.msra.mxu1 %v7606_v34  ;;  %3295 = vmatpush1.bf16.msra.mxu0 %v7609_v6  ;;  %v7660_v54 = vld [vmem:[#allocation3 + $0x4a8] ss:$16 sps:$4 sm:$0xff]   ;;  %v7665_v60 = vld [vmem:[#allocation3 + $0x4c4] ss:$16 sps:$4 sm:$0xff]   ;;  %v7668_v20 = vld [vmem:[#allocation3 + $0x4cc] ss:$16 sps:$4 sm:$0xff]  }
 0x2f9   : > { %v9456_v38 = vsel %vm791_vm1, %v1968_v36, %v7264_v62  ;;  %v9459_v40 = vsel %vm791_vm1, %v1969_v53, %v7265_v13  ;;  %3513 = vmatprep.subr.bf16.mxu1 %v7614_v12  ;;  %3296 = vmatprep.subr.bf16.mxu0 %v7617_v15  ;;  %v7666_v9 = vld [vmem:[#allocation3 + $0x4c8] ss:$16 sps:$4 sm:$0xff]   ;;  %v7671_v13 = vld [vmem:[#allocation3 + $0x4e4] ss:$16 sps:$4 sm:$0xff]   ;;  %v7674_v62 = vld [vmem:[#allocation3 + $0x4ec] ss:$16 sps:$4 sm:$0xff]  }
 0x2fa   : > { %v9463_v41 = vpack.c.bf16 %v9459_v40, %v9456_v38  ;;  %v2013_v43 = vpack.c.bf16 %v9456_v38, %v9422_v18  ;;  %v7663_v18 = vld [vmem:[#allocation3 + $0x4c0] ss:$16 sps:$4 sm:$0xff]   ;;  %v7672_v53 = vld [vmem:[#allocation3 + $0x4e8] ss:$16 sps:$4 sm:$0xff]   ;;  %v7677_v5 = vld [vmem:[#allocation3 + $0x504] ss:$16 sps:$4 sm:$0xff]  }
 0x2fb   : > { %v7669_v36 = vld [vmem:[#allocation3 + $0x4e0] ss:$16 sps:$4 sm:$0xff]   ;;  %v7680_v38 = vld [vmem:[#allocation3 + $0x50c] ss:$16 sps:$4 sm:$0xff]   ;;  %v7678_v10 = vld [vmem:[#allocation3 + $0x508] ss:$16 sps:$4 sm:$0xff]  }
 0x2fc   : > { %3477 = vmatmul.mubr.bf16.gmra.mrb[44].mxu1 %v9463_v41  ;;  %3258 = vmatmul.mubr.bf16.gmra.mrb[44].mxu0 %v9463_v41  ;;  %v7675_v34 = vld [vmem:[#allocation3 + $0x500] ss:$16 sps:$4 sm:$0xff]   ;;  %v7683_v12 = vld [vmem:[#allocation3 + $0x524] ss:$16 sps:$4 sm:$0xff]   ;;  %v7686_v6 = vld [vmem:[#allocation3 + $0x52c] ss:$16 sps:$4 sm:$0xff]  }
 0x2fd   : > { %3300 = vmatprep.mubr.bf16.mxu0 %v2006_v61  ;;  %3519 = vmatprep.mubr.bf16.mxu1 %v2006_v61  ;;  %v7684_v61 = vld [vmem:[#allocation3 + $0x528] ss:$16 sps:$4 sm:$0xff]   ;;  %v7689_v15 = vld [vmem:[#allocation3 + $0x544] ss:$16 sps:$4 sm:$0xff]  }
 0x2fe   : > { %3514 = vmatpush1.bf16.msra.mxu1 %v7612_v8  ;;  %3297 = vmatpush1.bf16.msra.mxu0 %v7615_v55  ;;  %v7681_v8 = vld [vmem:[#allocation3 + $0x520] ss:$16 sps:$4 sm:$0xff]  }
 0x2ff   : > { %3515 = vmatprep.subr.bf16.mxu1 %v7620_v32  ;;  %3298 = vmatprep.subr.bf16.mxu0 %v7623_v19  ;;  %v7692_v32 = vld [vmem:[#allocation3 + $0x54c] ss:$16 sps:$4 sm:$0xff]   ;;  %v7687_v55 = vld [vmem:[#allocation3 + $0x540] ss:$16 sps:$4 sm:$0xff]   ;;  %v7695_v19 = vld [vmem:[#allocation3 + $0x564] ss:$16 sps:$4 sm:$0xff]  }
 0x302   : > { %3516 = vmatpush1.bf16.msra.mxu1 %v7618_v25  ;;  %3299 = vmatpush1.bf16.msra.mxu0 %v7621_v2  ;;  %v7690_v25 = vld [vmem:[#allocation3 + $0x548] ss:$16 sps:$4 sm:$0xff]   ;;  %v7693_v2 = vld [vmem:[#allocation3 + $0x560] ss:$16 sps:$4 sm:$0xff]  }
 0x303   : > { %3517 = vmatprep.subr.bf16.mxu1 %v7626_v29  ;;  %3341 = vmatprep.subr.bf16.mxu0 %v7629_v4  ;;  %v7698_v29 = vld [vmem:[#allocation3 + $0x56c] ss:$16 sps:$4 sm:$0xff]   ;;  %v7701_v4 = vld [vmem:[#allocation3 + $0x584] ss:$16 sps:$4 sm:$0xff]  }
 0x305   : > { %3301 = vmatmul.mubr.bf16.vlgmr.msra.gmra.mrb[32].mxu0 %v2005_v50 }
 0x306   : > { %3518 = vmatpush1.bf16.msra.mxu1 %v7624_v23  ;;  %3310 = vmatprep.mubr.bf16.mxu0 %v2010_v27  ;;  %v7696_v23 = vld [vmem:[#allocation3 + $0x568] ss:$16 sps:$4 sm:$0xff]  }
 0x307   : > { %3560 = vmatprep.subr.bf16.mxu1 %v7632_v37  ;;  %3342 = vmatpush1.bf16.msra.mxu0 %v7627_v57  ;;  %v7704_v37 = vld [vmem:[#allocation3 + $0x58c] ss:$16 sps:$4 sm:$0xff]   ;;  %v7702_v57 = vld [vmem:[#allocation3 + $0x588] ss:$16 sps:$4 sm:$0xff]  }
 0x308   : > { %3343 = vmatprep.subr.bf16.mxu0 %v7635_v45  ;;  %v7705_v45 = vld [vmem:[#allocation3 + $0x5a0] ss:$16 sps:$4 sm:$0xff]  }
 0x309   : > { %3520 = vmatmul.mubr.bf16.vlgmr.msra.gmra.mrb[32].mxu1 %v2005_v50  ;;  %v7699_v50 = vld [vmem:[#allocation3 + $0x580] ss:$16 sps:$4 sm:$0xff]  }
 0x30a   : > { %3529 = vmatprep.mubr.bf16.mxu1 %v2010_v27  ;;  %3561 = vmatpush1.bf16.msra.mxu1 %v7630_v31  ;;  %v7707_v27 = vld [vmem:[#allocation3 + $0x5a4] ss:$16 sps:$4 sm:$0xff]   ;;  %v7710_v31 = vld [vmem:[#allocation3 + $0x5ac] ss:$16 sps:$4 sm:$0xff]  }
 0x30b   : > { %3562 = vmatprep.subr.bf16.mxu1 %v7638_v3  ;;  %3344 = vmatpush1.bf16.msra.mxu0 %v7633_v46  ;;  %v7708_v3 = vld [vmem:[#allocation3 + $0x5a8] ss:$16 sps:$4 sm:$0xff]   ;;  %v7713_v46 = vld [vmem:[#allocation3 + $0x5c4] ss:$16 sps:$4 sm:$0xff]  }
 0x30c   : > { %3345 = vmatprep.subr.bf16.mxu0 %v7641_v42  ;;  %v7711_v42 = vld [vmem:[#allocation3 + $0x5c0] ss:$16 sps:$4 sm:$0xff]  }
 0x30d   : > { %3311 = vmatmul.mubr.bf16.gmra.mrb[36].mxu0 %v2009_v52 }
 0x30e   : > { %3563 = vmatpush1.bf16.msra.mxu1 %v7636_v47  ;;  %3320 = vmatprep.mubr.bf16.mxu0 %v2014_v58  ;;  %v7716_v47 = vld [vmem:[#allocation3 + $0x5cc] ss:$16 sps:$4 sm:$0xff]  }
 0x30f   : > { %3564 = vmatprep.subr.bf16.mxu1 %v7644_v28  ;;  %3346 = vmatpush1.bf16.msra.mxu0 %v7639_v14  ;;  %v7714_v28 = vld [vmem:[#allocation3 + $0x5c8] ss:$16 sps:$4 sm:$0xff]   ;;  %v7722_v14 = vld [vmem:[#allocation3 + $0x5ec] ss:$16 sps:$4 sm:$0xff]  }
 0x310   : > { %3347 = vmatprep.subr.bf16.mxu0 %v7647_v49 }
 0x311   : > { %3530 = vmatmul.mubr.bf16.gmra.mrb[36].mxu1 %v2009_v52  ;;  %v7719_v52 = vld [vmem:[#allocation3 + $0x5e4] ss:$16 sps:$4 sm:$0xff]  }
 0x312   : > { %3539 = vmatprep.mubr.bf16.mxu1 %v2014_v58  ;;  %3565 = vmatpush1.bf16.msra.mxu1 %v7642_v17  ;;  %v7717_v58 = vld [vmem:[#allocation3 + $0x5e0] ss:$16 sps:$4 sm:$0xff]   ;;  %v7720_v17 = vld [vmem:[#allocation3 + $0x5e8] ss:$16 sps:$4 sm:$0xff]  }
 0x313   : > { %3566 = vmatprep.subr.bf16.mxu1 %v7650_v7  ;;  %3348 = vmatpush1.bf16.msra.mxu0 %v7645_v44 }
 0x314   : > { %3349 = vmatprep.subr.bf16.mxu0 %v7653_v39 }
 0x315   : > { %3321 = vmatmul.mubr.bf16.gmra.mrb[40].mxu0 %v2013_v43 }
 0x316   : > { %3567 = vmatpush1.bf16.msra.mxu1 %v7648_v35 }
 0x317   : > { %3568 = vmatprep.subr.bf16.mxu1 %v7656_v56  ;;  %3350 = vmatpush1.bf16.msra.mxu0 %v7651_v30 }
 0x318   : > { %3351 = vmatprep.subr.bf16.mxu0 %v7659_v0 }
 0x319   : > { %3540 = vmatmul.mubr.bf16.gmra.mrb[40].mxu1 %v2013_v43 }
 0x31a   : > { %3569 = vmatpush1.bf16.msra.mxu1 %v7654_v51 }
 0x31b   : > { %3570 = vmatprep.subr.bf16.mxu1 %v7662_v48  ;;  %3352 = vmatpush1.bf16.msra.mxu0 %v7657_v11 }
 0x31c   : > { %3353 = vmatprep.subr.bf16.mxu0 %v7665_v60 }
 0x31e   : > { %3571 = vmatpush1.bf16.msra.mxu1 %v7660_v54 }
 0x31f   : > { %3572 = vmatprep.subr.bf16.mxu1 %v7668_v20  ;;  %3354 = vmatpush1.bf16.msra.mxu0 %v7663_v18 }
 0x320   : > { %3355 = vmatprep.subr.bf16.mxu0 %v7671_v13 }
 0x322   : > { %3573 = vmatpush1.bf16.msra.mxu1 %v7666_v9 }
 0x323   : > { %3574 = vmatprep.subr.bf16.mxu1 %v7674_v62  ;;  %3356 = vmatpush1.bf16.msra.mxu0 %v7669_v36 }
 0x324   : > { %3357 = vmatprep.subr.bf16.mxu0 %v7677_v5 }
 0x326   : > { %3575 = vmatpush1.bf16.msra.mxu1 %v7672_v53 }
 0x327   : > { %3576 = vmatprep.subr.bf16.mxu1 %v7680_v38  ;;  %3358 = vmatpush1.bf16.msra.mxu0 %v7675_v34 }
 0x328   : > { %3359 = vmatprep.subr.bf16.mxu0 %v7683_v12 }
 0x32a   : > { %3577 = vmatpush1.bf16.msra.mxu1 %v7678_v10 }
 0x32b   : > { %3578 = vmatprep.subr.bf16.mxu1 %v7686_v6  ;;  %3360 = vmatpush1.bf16.msra.mxu0 %v7681_v8 }
 0x32c   : > { %3361 = vmatprep.subr.bf16.mxu0 %v7689_v15 }
 0x32e   : > { %3579 = vmatpush1.bf16.msra.mxu1 %v7684_v61 }
 0x32f   : > { %3580 = vmatprep.subr.bf16.mxu1 %v7692_v32  ;;  %3362 = vmatpush1.bf16.msra.mxu0 %v7687_v55 }
 0x330   : > { %3363 = vmatprep.subr.bf16.mxu0 %v7695_v19 }
 0x332   : > { %3581 = vmatpush1.bf16.msra.mxu1 %v7690_v25 }
 0x333   : > { %3582 = vmatprep.subr.bf16.mxu1 %v7698_v29  ;;  %3364 = vmatpush1.bf16.msra.mxu0 %v7693_v2 }
 0x334   : > { %3365 = vmatprep.subr.bf16.mxu0 %v7701_v4 }
 0x336   : > { %3583 = vmatpush1.bf16.msra.mxu1 %v7696_v23 }
 0x337   : > { %3584 = vmatprep.subr.bf16.mxu1 %v7704_v37  ;;  %3366 = vmatpush1.bf16.msra.mxu0 %v7699_v50 }
 0x338   : > { %3367 = vmatprep.subr.bf16.mxu0 %v7707_v27 }
 0x33a   : > { %3585 = vmatpush1.bf16.msra.mxu1 %v7702_v57 }
 0x33b   : > { %3586 = vmatprep.subr.bf16.mxu1 %v7710_v31  ;;  %3368 = vmatpush1.bf16.msra.mxu0 %v7705_v45 }
 0x33c   : > { %3369 = vmatprep.subr.bf16.mxu0 %v7713_v46 }
 0x33e   : > { %3587 = vmatpush1.bf16.msra.mxu1 %v7708_v3 }
 0x33f   : > { %3588 = vmatprep.subr.bf16.mxu1 %v7716_v47  ;;  %3370 = vmatpush1.bf16.msra.mxu0 %v7711_v42 }
 0x340   : > { %3371 = vmatprep.subr.bf16.mxu0 %v7719_v52  ;;  %v7268_v49 = vpop.permute.xlu1 %7267 }
 0x341   : > { %v7270_v7 = vunpack.i.h.bf16 %v7268_v49  ;;  %v7269_v44 = vunpack.i.l.bf16 %v7268_v49 }
 0x342   : > { %3589 = vmatpush1.bf16.msra.mxu1 %v7714_v28  ;;  %v7273_v35 = vpop.permute.xlu0 %7272 }
 0x343   : > { %3590 = vmatprep.subr.bf16.mxu1 %v7722_v14  ;;  %3372 = vmatpush1.bf16.msra.mxu0 %v7717_v58  ;;  %v1961_v39 = vsel %vm1953_vm3, %v9351_v22, %v7270_v7  ;;  %v1986_v56 = vsel %vm1953_vm3, %v9349_v59, %v7269_v44  ;;  %v7275_v43 = vunpack.i.h.bf16 %v7273_v35  ;;  %v7274_v30 = vunpack.i.l.bf16 %v7273_v35 }
 0x344   : > { %v7278_v51 = vpop.permute.xlu1 %7277 }
 0x345   : > { %v7280_v0 = vunpack.i.h.bf16 %v7278_v51  ;;  %v7279_v48 = vunpack.i.l.bf16 %v7278_v51  ;;  %v1970_v11 = vsel %vm1962_vm4, %v1961_v39, %v7275_v43  ;;  %v1994_v54 = vsel %vm1962_vm4, %v1986_v56, %v7274_v30  ;;  %v10437_v30 = vld [vmem:[#allocation11_spill] sm:$0xff] }
 0x346   : > { %3591 = vmatpush1.bf16.msra.mxu1 %v7720_v17 }
 0x347   : > { %v2002_v60 = vsel %vm791_vm1, %v1994_v54, %v7279_v48  ;;  %v1978_v20 = vsel %vm791_vm1, %v1970_v11, %v7280_v0 }
 0x348   : > { %v2018_v18 = vpack.c.bf16 %v2002_v60, %v9441_v21  ;;  %v2017_v22 = vpack.c.bf16 %v1978_v20, %v9459_v40  ;;  %v2020_v59 = vpack.c.bf16 %v10267_v16, %v2002_v60  ;;  %v10435_v21 = vld [vmem:[#allocation13_spill] sm:$0xff]  ;;  %v10436_v40 = vld [vmem:[#allocation14_spill] sm:$0xff] }
 0x34a   : > { %3330 = vmatprep.mubr.bf16.mxu0 %v2018_v18  ;;  %3549 = vmatprep.mubr.bf16.mxu1 %v2018_v18 }
 0x34b   : > { %3331 = vmatmul.mubr.bf16.gmra.mrb[44].mxu0 %v2017_v22  ;;  %3550 = vmatmul.mubr.bf16.gmra.mrb[44].mxu1 %v2017_v22 }
 0x34c   : > { %3373 = vmatprep.mubr.bf16.mxu0 %v9371_v26  ;;  %3592 = vmatprep.mubr.bf16.mxu1 %v9371_v26  ;;  %v2019_v26 = vpack.c.bf16 %v10267_v16, %v1978_v20 }
 0x353   : > { %3374 = vmatmul.mubr.bf16.vlgmr.msra.gmra.mrb[32].mxu0 %v9391_v33  ;;  %3593 = vmatmul.mubr.bf16.vlgmr.msra.gmra.mrb[32].mxu1 %v9391_v33  ;;  %v2213_v33 = vld [vmem:[%s10163_s5] sm:$0xf] }
 0x354   : > { %3383 = vmatprep.mubr.bf16.mxu0 %v9409_v24  ;;  %3602 = vmatprep.mubr.bf16.mxu1 %v9409_v24  ;;  %v10434_v24 = vld [vmem:[#allocation12_spill] sm:$0xff]  ;;  %v9513_v9 = vrot.slane %v2213_v33, %v10436_v40  ;;  %v2218_v51 = vrot.slane %v2213_v33, %v10437_v30 }
 0x35b   : > { %3384 = vmatmul.mubr.bf16.gmra.mrb[36].mxu0 %v9427_v63  ;;  %3603 = vmatmul.mubr.bf16.gmra.mrb[36].mxu1 %v9427_v63  ;;  %v9507_v63 = vrot.slane %v2213_v33, %v10434_v24 }
 0x35c   : > { %3393 = vmatprep.mubr.bf16.mxu0 %v9445_v1  ;;  %3612 = vmatprep.mubr.bf16.mxu1 %v9445_v1  ;;  %v9510_v1 = vrot.slane %v2213_v33, %v10435_v21 }
 0x363   : > { %3394 = vmatmul.mubr.bf16.gmra.mrb[40].mxu0 %v9463_v41  ;;  %3613 = vmatmul.mubr.bf16.gmra.mrb[40].mxu1 %v9463_v41 }
 0x364   : > { %3403 = vmatprep.mubr.bf16.mxu0 %v2020_v59  ;;  %3622 = vmatprep.mubr.bf16.mxu1 %v2020_v59 }
 0x36b   : > { %3404 = vmatmul.mubr.bf16.gmra.mrb[44].mxu0 %v2019_v26  ;;  %3623 = vmatmul.mubr.bf16.gmra.mrb[44].mxu1 %v2019_v26 }
 0x426   : > { %v9515_v41 = vpop.f32.mrb[32].mxu0  ;;  %v3594_v13 = vpop.f32.mrb[32].mxu1 }
 0x427   : > { %v9518_v62 = vadd.f32 %v3594_v13, %v9507_v63  ;;  %v3377_v36 = vpop.f32.mrb[33].mxu0  ;;  %v3596_v53 = vpop.f32.mrb[33].mxu1 }
 0x428   : > { %v9521_v5 = vadd.f32 %v3377_v36, %v9510_v1  ;;  %v9524_v38 = vadd.f32 %v3596_v53, %v9513_v9  ;;  %v3379_v34 = vpop.f32.mrb[34].mxu0  ;;  %v3598_v10 = vpop.f32.mrb[34].mxu1 }
 0x429   : > { %v3635_v12 = vmax.f32 %v9518_v62, 0.0  ;;  %v9528_v6 = vadd.f32 %v3598_v10, %v9507_v63  ;;  %v3381_v8 = vpop.f32.mrb[35].mxu0  ;;  %v3600_v61 = vpop.f32.mrb[35].mxu1 }
 0x42a   : > { %v3634_v15 = vmax.f32 %v9521_v5, 0.0  ;;  %v9532_v32 = vadd.f32 %v3381_v8, %v9510_v1  ;;  %v9535_v55 = vadd.f32 %v3600_v61, %v9513_v9  ;;  %v3636_v25 = vmax.f32 %v9524_v38, 0.0 }
 0x42b   : > { %v3639_v29 = vmax.f32 %v9528_v6, 0.0 }
 0x42c   : > { %v7281_v19 = vpack.i.bf16 %v3635_v12, %v3634_v15  ;;  %v3638_v2 = vmax.f32 %v9532_v32, 0.0  ;;  %v3640_v23 = vmax.f32 %v9535_v55, 0.0 }
 0x42e   : > { %v7286_v4 = vpack.i.bf16 %v3638_v2, %v3636_v25  ;;  %v9549_v37 = vpop.f32.mrb[36].mxu0  ;;  %v3604_v50 = vpop.f32.mrb[36].mxu1  ;;  %7282 = vrot.lane.b32.xlu0 %v7281_v19, %s8159_s20  ;;  %v7291_v45 = vpack.i.bf16 %v3640_v23, %v3639_v29  ;;  %v9614_v19 = vadd.f32 %v3379_v34, %v2218_v51 }
 0x42f   : > { %v9553_v57 = vadd.f32 %v3604_v50, %v9507_v63  ;;  %v3387_v27 = vpop.f32.mrb[37].mxu0  ;;  %v3606_v31 = vpop.f32.mrb[37].mxu1 }
 0x430   : > { %v9560_v3 = vadd.f32 %v3387_v27, %v9510_v1  ;;  %v9563_v46 = vadd.f32 %v3606_v31, %v9513_v9  ;;  %v3389_v47 = vpop.f32.mrb[38].mxu0  ;;  %v3608_v42 = vpop.f32.mrb[38].mxu1  ;;  %7287 = vrot.lane.b32.xlu1 %v7286_v4, %s8159_s20  ;;  %v9625_v31 = vadd.f32 %v9515_v41, %v2218_v51 }
 0x431   : > { %v3643_v28 = vmax.f32 %v9553_v57, 0.0  ;;  %v9568_v52 = vadd.f32 %v3608_v42, %v9507_v63  ;;  %v3391_v14 = vpop.f32.mrb[39].mxu0  ;;  %v3610_v58 = vpop.f32.mrb[39].mxu1 }
 0x432   : > { %v3642_v17 = vmax.f32 %v9560_v3, 0.0  ;;  %v9572_v49 = vadd.f32 %v3391_v14, %v9510_v1  ;;  %v9575_v7 = vadd.f32 %v3610_v58, %v9513_v9  ;;  %7292 = vrot.lane.b32.xlu0 %v7291_v45, %s8159_s20  ;;  %v10283_v44 = vmax.f32 %v9563_v46, 0.0 }
 0x433   : > { %v3647_v39 = vmax.f32 %v9568_v52, 0.0 }
 0x434   : > { %v7296_v35 = vpack.i.bf16 %v3643_v28, %v3642_v17  ;;  %v10269_v56 = vmax.f32 %v9572_v49, 0.0  ;;  %v3648_v43 = vmax.f32 %v9575_v7, 0.0 }
 0x436   : > { %v7301_v0 = vpack.i.bf16 %v10269_v56, %v10283_v44  ;;  %v3395_v48 = vpop.f32.mrb[40].mxu0  ;;  %v3614_v11 = vpop.f32.mrb[40].mxu1  ;;  %7297 = vrot.lane.b32.xlu1 %v7296_v35, %s8159_s20  ;;  %v7306_v22 = vpack.i.bf16 %v3648_v43, %v3647_v39  ;;  %v10275_v35 = vmax.f32 %v9614_v19, 0.0 }
 0x437   : > { %v9592_v54 = vadd.f32 %v3395_v48, %v2218_v51  ;;  %v9595_v60 = vadd.f32 %v3614_v11, %v9507_v63  ;;  %v3397_v20 = vpop.f32.mrb[41].mxu0  ;;  %v3616_v18 = vpop.f32.mrb[41].mxu1 }
 0x438   : > { %v9602_v59 = vadd.f32 %v3397_v20, %v9510_v1  ;;  %v9605_v26 = vadd.f32 %v3616_v18, %v9513_v9  ;;  %v3399_v33 = vpop.f32.mrb[42].mxu0  ;;  %v3618_v13 = vpop.f32.mrb[42].mxu1  ;;  %7302 = vrot.lane.b32.xlu0 %v7301_v0, %s8159_s20  ;;  %v9636_v0 = vadd.f32 %v3389_v47, %v2218_v51  ;;  %v9650_v47 = vadd.f32 %v9549_v37, %v2218_v51 }
 0x439   : > { %v10272_v36 = vmax.f32 %v9595_v60, 0.0  ;;  %v9609_v53 = vadd.f32 %v3399_v33, %v2218_v51  ;;  %v9612_v10 = vadd.f32 %v3618_v13, %v9507_v63  ;;  %v3401_v8 = vpop.f32.mrb[43].mxu0  ;;  %v3620_v61 = vpop.f32.mrb[43].mxu1  ;;  %v10274_v13 = vmax.f32 %v9625_v31, 0.0 }
 0x43a   : > { %v10281_v4 = vmax.f32 %v9602_v59, 0.0  ;;  %v9618_v50 = vadd.f32 %v3401_v8, %v9510_v1  ;;  %v9621_v27 = vadd.f32 %v3620_v61, %v9513_v9  ;;  %7307 = vrot.lane.b32.xlu1 %v7306_v22, %s8159_s20  ;;  %v10280_v45 = vmax.f32 %v9605_v26, 0.0 }
 0x43b   : > { %v10271_v42 = vmax.f32 %v9612_v10, 0.0  ;;  %v10286_v6 = vmax.f32 %v9592_v54, 0.0  ;;  %v10439_v3 = vmax.f32 %v9602_v59, 0.0 }
 0x43c   : > { %v7311_v34 = vpack.i.bf16 %v10272_v36, %v10281_v4  ;;  %v10270_v14 = vmax.f32 %v9618_v50, 0.0  ;;  %v10273_v58 = vmax.f32 %v9621_v27, 0.0  ;;  %v7821_v4 = vld [vmem:[#allocation5 + $0x204] ss:$16 sps:$4 sm:$0xff]  }
 0x43e   : > { %v7316_v41 = vpack.i.bf16 %v10270_v14, %v10280_v45  ;;  %v3405_v48 = vpop.f32.mrb[44].mxu0  ;;  %v3624_v11 = vpop.f32.mrb[44].mxu1  ;;  %7312 = vrot.lane.b32.xlu0 %v7311_v34, %s8159_s20  ;;  %v7321_v8 = vpack.i.bf16 %v10273_v58, %v10271_v42  ;;  %v7723_v14 = vld [vmem:[#allocation5] ss:$16 sps:$4 sm:$0xff]   ;;  %v7326_v42 = vpack.i.bf16 %v10275_v35, %v10274_v13  ;;  %v7731_v13 = vld [vmem:[#allocation5 + $0x24] ss:$16 sps:$4 sm:$0xff]  }
 0x43f   : > { %v9643_v20 = vadd.f32 %v3405_v48, %v2218_v51  ;;  %v9646_v18 = vadd.f32 %v3624_v11, %v9507_v63  ;;  %v3407_v22 = vpop.f32.mrb[45].mxu0  ;;  %v3626_v33 = vpop.f32.mrb[45].mxu1  ;;  %v7732_v35 = vld [vmem:[#allocation5 + $0x28] ss:$16 sps:$4 sm:$0xff]  }
 0x440   : > { %v9657_v61 = vadd.f32 %v3407_v22, %v9510_v1  ;;  %v3409_v34 = vpop.f32.mrb[46].mxu0  ;;  %v3628_v48 = vpop.f32.mrb[46].mxu1  ;;  %7317 = vrot.lane.b32.xlu1 %v7316_v41, %s8159_s20  ;;  %v10277_v22 = vmax.f32 %v9636_v0, 0.0  ;;  %v9679_v58 = vadd.f32 %v3626_v33, %v9513_v9  ;;  %v7740_v33 = vld [vmem:[#allocation5 + $0x4c] ss:$16 sps:$4 sm:$0xff]  }
 0x441   : > { %v9660_v11 = vadd.f32 %v3409_v34, %v2218_v51  ;;  %v9663_v16 = vadd.f32 %v3628_v48, %v9507_v63  ;;  %v3411_v56 = vpop.f32.mrb[47].mxu0  ;;  %v3630_v37 = vpop.f32.mrb[47].mxu1  ;;  %v7725_v63 = vld [vmem:[#allocation5 + $0x4] ss:$16 sps:$4 sm:$0xff]   ;;  %v7726_v51 = vld [vmem:[#allocation5 + $0x8] ss:$16 sps:$4 sm:$0xff]  }
 0x442   : > { %v9671_v36 = vadd.f32 %v3411_v56, %v9510_v1  ;;  %v9674_v41 = vadd.f32 %v3630_v37, %v9513_v9  ;;  %7322 = vrot.lane.b32.xlu0 %v7321_v8, %s8159_s20  ;;  %v7728_v34 = vld [vmem:[#allocation5 + $0xc] ss:$16 sps:$4 sm:$0xff]   ;;  %v10276_v48 = vmax.f32 %v9650_v47, 0.0  ;;  %5089 = vmatprep.subr.bf16.mxu0 %v7725_v63  ;;  %v7729_v1 = vld [vmem:[#allocation5 + $0x20] ss:$16 sps:$4 sm:$0xff]  }
 0x443   : > { %5248 = vmatprep.subr.bf16.mxu1 %v7728_v34  ;;  %5090 = vmatpush1.bf16.msra.mxu0 %v7723_v14  ;;  %v7734_v56 = vld [vmem:[#allocation5 + $0x2c] ss:$16 sps:$4 sm:$0xff]   ;;  %v7737_v9 = vld [vmem:[#allocation5 + $0x44] ss:$16 sps:$4 sm:$0xff]   ;;  %v7735_v14 = vld [vmem:[#allocation5 + $0x40] ss:$16 sps:$4 sm:$0xff]  }
 0x444   : > { %7327 = vrot.lane.b32.xlu1 %v7326_v42, %s8159_s20  ;;  %v7336_v8 = vpack.i.bf16 %v10277_v22, %v10276_v48  ;;  %v10278_v37 = vmax.f32 %v9671_v36, 0.0  ;;  %5249 = vmatpush1.bf16.msra.mxu1 %v7726_v51  ;;  %v10279_v42 = vmax.f32 %v9679_v58, 0.0  ;;  %v7738_v34 = vld [vmem:[#allocation5 + $0x48] ss:$16 sps:$4 sm:$0xff]   ;;  %v7743_v51 = vld [vmem:[#allocation5 + $0x64] ss:$16 sps:$4 sm:$0xff]  }
 0x445   : > { %5091 = vmatprep.subr.bf16.mxu0 %v7731_v13  ;;  %5250 = vmatprep.subr.bf16.mxu1 %v7734_v56  ;;  %v7746_v13 = vld [vmem:[#allocation5 + $0x6c] ss:$16 sps:$4 sm:$0xff]   ;;  %v7741_v56 = vld [vmem:[#allocation5 + $0x60] ss:$16 sps:$4 sm:$0xff]  }
 0x446   : > { %v7351_v63 = vpack.i.bf16 %v10278_v37, %v10279_v42  ;;  %v7752_v48 = vld [vmem:[#allocation5 + $0x8c] ss:$16 sps:$4 sm:$0xff]   ;;  %v7747_v22 = vld [vmem:[#allocation5 + $0x80] ss:$16 sps:$4 sm:$0xff]  }
 0x447   : > { %5092 = vmatpush1.bf16.msra.mxu0 %v7729_v1  ;;  %v7749_v1 = vld [vmem:[#allocation5 + $0x84] ss:$16 sps:$4 sm:$0xff]   ;;  %v7758_v37 = vld [vmem:[#allocation5 + $0xac] ss:$16 sps:$4 sm:$0xff]  }
 0x448   : > { %7337 = vrot.lane.b32.xlu1 %v7336_v8, %s8159_s20  ;;  %5251 = vmatpush1.bf16.msra.mxu1 %v7732_v35  ;;  %v7744_v8 = vld [vmem:[#allocation5 + $0x68] ss:$16 sps:$4 sm:$0xff]  }
 0x449   : > { %5093 = vmatprep.subr.bf16.mxu0 %v7737_v9  ;;  %5252 = vmatprep.subr.bf16.mxu1 %v7740_v33  ;;  %v7750_v35 = vld [vmem:[#allocation5 + $0x88] ss:$16 sps:$4 sm:$0xff]   ;;  %v7755_v9 = vld [vmem:[#allocation5 + $0xa4] ss:$16 sps:$4 sm:$0xff]   ;;  %v7753_v33 = vld [vmem:[#allocation5 + $0xa0] ss:$16 sps:$4 sm:$0xff]  }
 0x44b   : > { %5094 = vmatpush1.bf16.msra.mxu0 %v7735_v14  ;;  %v7756_v14 = vld [vmem:[#allocation5 + $0xa8] ss:$16 sps:$4 sm:$0xff]  }
 0x44c   : > { %7352 = vrot.lane.b32.xlu1 %v7351_v63, %s8159_s20  ;;  %5253 = vmatpush1.bf16.msra.mxu1 %v7738_v34  ;;  %v7761_v63 = vld [vmem:[#allocation5 + $0xc4] ss:$16 sps:$4 sm:$0xff]   ;;  %v7764_v34 = vld [vmem:[#allocation5 + $0xcc] ss:$16 sps:$4 sm:$0xff]  }
 0x44d   : > { %5095 = vmatprep.subr.bf16.mxu0 %v7743_v51  ;;  %5254 = vmatprep.subr.bf16.mxu1 %v7746_v13  ;;  %v7759_v51 = vld [vmem:[#allocation5 + $0xc0] ss:$16 sps:$4 sm:$0xff]   ;;  %v7762_v13 = vld [vmem:[#allocation5 + $0xc8] ss:$16 sps:$4 sm:$0xff]  }
 0x44f   : > { %5096 = vmatpush1.bf16.msra.mxu0 %v7741_v56  ;;  %v7767_v56 = vld [vmem:[#allocation5 + $0xe4] ss:$16 sps:$4 sm:$0xff]  }
 0x450   : > { %5255 = vmatpush1.bf16.msra.mxu1 %v7744_v8  ;;  %5097 = vmatprep.subr.bf16.mxu0 %v7749_v1  ;;  %v7770_v8 = vld [vmem:[#allocation5 + $0xec] ss:$16 sps:$4 sm:$0xff]   ;;  %v7765_v1 = vld [vmem:[#allocation5 + $0xe0] ss:$16 sps:$4 sm:$0xff]  }
 0x451   : > { %5256 = vmatprep.subr.bf16.mxu1 %v7752_v48  ;;  %v7773_v48 = vld [vmem:[#allocation5 + $0x104] ss:$16 sps:$4 sm:$0xff]  }
 0x453   : > { %5098 = vmatpush1.bf16.msra.mxu0 %v7747_v22  ;;  %v7768_v22 = vld [vmem:[#allocation5 + $0xe8] ss:$16 sps:$4 sm:$0xff]  }
 0x454   : > { %5257 = vmatpush1.bf16.msra.mxu1 %v7750_v35  ;;  %5099 = vmatprep.subr.bf16.mxu0 %v7755_v9  ;;  %v7776_v35 = vld [vmem:[#allocation5 + $0x10c] ss:$16 sps:$4 sm:$0xff]   ;;  %v7771_v9 = vld [vmem:[#allocation5 + $0x100] ss:$16 sps:$4 sm:$0xff]  }
 0x455   : > { %5258 = vmatprep.subr.bf16.mxu1 %v7758_v37  ;;  %v7774_v37 = vld [vmem:[#allocation5 + $0x108] ss:$16 sps:$4 sm:$0xff]  }
 0x457   : > { %5100 = vmatpush1.bf16.msra.mxu0 %v7753_v33  ;;  %v7779_v33 = vld [vmem:[#allocation5 + $0x124] ss:$16 sps:$4 sm:$0xff]  }
 0x458   : > { %5259 = vmatpush1.bf16.msra.mxu1 %v7756_v14  ;;  %5101 = vmatprep.subr.bf16.mxu0 %v7761_v63  ;;  %v7782_v14 = vld [vmem:[#allocation5 + $0x12c] ss:$16 sps:$4 sm:$0xff]   ;;  %v7777_v63 = vld [vmem:[#allocation5 + $0x120] ss:$16 sps:$4 sm:$0xff]  }
 0x459   : > { %5260 = vmatprep.subr.bf16.mxu1 %v7764_v34  ;;  %v7780_v34 = vld [vmem:[#allocation5 + $0x128] ss:$16 sps:$4 sm:$0xff]  }
 0x45b   : > { %5102 = vmatpush1.bf16.msra.mxu0 %v7759_v51  ;;  %v7785_v51 = vld [vmem:[#allocation5 + $0x144] ss:$16 sps:$4 sm:$0xff]  }
 0x45c   : > { %5261 = vmatpush1.bf16.msra.mxu1 %v7762_v13  ;;  %5103 = vmatprep.subr.bf16.mxu0 %v7767_v56  ;;  %v7788_v13 = vld [vmem:[#allocation5 + $0x14c] ss:$16 sps:$4 sm:$0xff]   ;;  %v7783_v56 = vld [vmem:[#allocation5 + $0x140] ss:$16 sps:$4 sm:$0xff]  }
 0x45d   : > { %5262 = vmatprep.subr.bf16.mxu1 %v7770_v8  ;;  %v7786_v8 = vld [vmem:[#allocation5 + $0x148] ss:$16 sps:$4 sm:$0xff]  }
 0x45f   : > { %5104 = vmatpush1.bf16.msra.mxu0 %v7765_v1  ;;  %v7791_v1 = vld [vmem:[#allocation5 + $0x164] ss:$16 sps:$4 sm:$0xff]  }
 0x460   : > { %5263 = vmatpush1.bf16.msra.mxu1 %v7768_v22  ;;  %5105 = vmatprep.subr.bf16.mxu0 %v7773_v48  ;;  %v7794_v22 = vld [vmem:[#allocation5 + $0x16c] ss:$16 sps:$4 sm:$0xff]   ;;  %v7789_v48 = vld [vmem:[#allocation5 + $0x160] ss:$16 sps:$4 sm:$0xff]  }
 0x461   : > { %5264 = vmatprep.subr.bf16.mxu1 %v7776_v35  ;;  %v7792_v35 = vld [vmem:[#allocation5 + $0x168] ss:$16 sps:$4 sm:$0xff]  }
 0x463   : > { %5106 = vmatpush1.bf16.msra.mxu0 %v7771_v9  ;;  %v7797_v9 = vld [vmem:[#allocation5 + $0x184] ss:$16 sps:$4 sm:$0xff]  }
 0x464   : > { %5265 = vmatpush1.bf16.msra.mxu1 %v7774_v37  ;;  %5107 = vmatprep.subr.bf16.mxu0 %v7779_v33  ;;  %v7800_v37 = vld [vmem:[#allocation5 + $0x18c] ss:$16 sps:$4 sm:$0xff]   ;;  %v7795_v33 = vld [vmem:[#allocation5 + $0x180] ss:$16 sps:$4 sm:$0xff]  }
 0x465   : > { %5266 = vmatprep.subr.bf16.mxu1 %v7782_v14  ;;  %v7798_v14 = vld [vmem:[#allocation5 + $0x188] ss:$16 sps:$4 sm:$0xff]  }
 0x467   : > { %5108 = vmatpush1.bf16.msra.mxu0 %v7777_v63  ;;  %v7803_v63 = vld [vmem:[#allocation5 + $0x1a4] ss:$16 sps:$4 sm:$0xff]  }
 0x468   : > { %5267 = vmatpush1.bf16.msra.mxu1 %v7780_v34  ;;  %5109 = vmatprep.subr.bf16.mxu0 %v7785_v51  ;;  %v7806_v34 = vld [vmem:[#allocation5 + $0x1ac] ss:$16 sps:$4 sm:$0xff]   ;;  %v7801_v51 = vld [vmem:[#allocation5 + $0x1a0] ss:$16 sps:$4 sm:$0xff]  }
 0x469   : > { %5268 = vmatprep.subr.bf16.mxu1 %v7788_v13  ;;  %v7804_v13 = vld [vmem:[#allocation5 + $0x1a8] ss:$16 sps:$4 sm:$0xff]  }
 0x46b   : > { %5110 = vmatpush1.bf16.msra.mxu0 %v7783_v56  ;;  %v7809_v56 = vld [vmem:[#allocation5 + $0x1c4] ss:$16 sps:$4 sm:$0xff]  }
 0x46c   : > { %5269 = vmatpush1.bf16.msra.mxu1 %v7786_v8  ;;  %5111 = vmatprep.subr.bf16.mxu0 %v7791_v1  ;;  %v7812_v8 = vld [vmem:[#allocation5 + $0x1cc] ss:$16 sps:$4 sm:$0xff]   ;;  %v7807_v1 = vld [vmem:[#allocation5 + $0x1c0] ss:$16 sps:$4 sm:$0xff]  }
 0x46d   : > { %5270 = vmatprep.subr.bf16.mxu1 %v7794_v22  ;;  %v7810_v22 = vld [vmem:[#allocation5 + $0x1c8] ss:$16 sps:$4 sm:$0xff]  }
 0x46f   : > { %5112 = vmatpush1.bf16.msra.mxu0 %v7789_v48 }
 0x470   : > { %5271 = vmatpush1.bf16.msra.mxu1 %v7792_v35  ;;  %5113 = vmatprep.subr.bf16.mxu0 %v7797_v9 }
 0x471   : > { %5272 = vmatprep.subr.bf16.mxu1 %v7800_v37 }
 0x473   : > { %5114 = vmatpush1.bf16.msra.mxu0 %v7795_v33  ;;  %v7815_v33 = vld [vmem:[#allocation5 + $0x1e4] ss:$16 sps:$4 sm:$0xff]  }
 0x474   : > { %5273 = vmatpush1.bf16.msra.mxu1 %v7798_v14  ;;  %5115 = vmatprep.subr.bf16.mxu0 %v7803_v63  ;;  %v7818_v14 = vld [vmem:[#allocation5 + $0x1ec] ss:$16 sps:$4 sm:$0xff]  }
 0x475   : > { %5274 = vmatprep.subr.bf16.mxu1 %v7806_v34 }
 0x477   : > { %5116 = vmatpush1.bf16.msra.mxu0 %v7801_v51  ;;  %v7813_v51 = vld [vmem:[#allocation5 + $0x1e0] ss:$16 sps:$4 sm:$0xff]  }
 0x478   : > { %5275 = vmatpush1.bf16.msra.mxu1 %v7804_v13  ;;  %5117 = vmatprep.subr.bf16.mxu0 %v7809_v56  ;;  %v7816_v13 = vld [vmem:[#allocation5 + $0x1e8] ss:$16 sps:$4 sm:$0xff]  }
 0x479   : > { %5276 = vmatprep.subr.bf16.mxu1 %v7812_v8 }
 0x47b   : > { %5118 = vmatpush1.bf16.msra.mxu0 %v7807_v1 }
 0x47c   : > { %5277 = vmatpush1.bf16.msra.mxu1 %v7810_v22  ;;  %5119 = vmatprep.subr.bf16.mxu0 %v7815_v33 }
 0x47d   : > { %5278 = vmatprep.subr.bf16.mxu1 %v7818_v14 }
 0x47f   : > { %5120 = vmatpush1.bf16.msra.mxu0 %v7813_v51 }
 0x480   : > { %5279 = vmatpush1.bf16.msra.mxu1 %v7816_v13  ;;  %5142 = vmatprep.subr.bf16.mxu0 %v7821_v4  ;;  %v10285_v13 = vmax.f32 %v9657_v61, 0.0 }
 0x4a0   : > { %v9694_v48 = vpop.permute.xlu0 %7282 }
 0x4a1   : > { %v7285_v35 = vunpack.i.h.bf16 %v9694_v48  ;;  %v10282_v9 = vunpack.i.l.bf16 %v9694_v48 }
 0x4a2   : > { %v9698_v37 = vpop.permute.xlu1 %7287 }
 0x4a3   : > { %v3762_v63 = vsel %vm1962_vm4, %v10282_v9, %v7285_v35  ;;  %v7289_v34 = vunpack.i.l.bf16 %v9698_v37  ;;  %v7290_v8 = vunpack.i.h.bf16 %v9698_v37  ;;  %v7824_v9 = vld [vmem:[#allocation5 + $0x20c] ss:$16 sps:$4 sm:$0xff]  }
 0x4a4   : > { %v7293_v56 = vpop.permute.xlu0 %7292  ;;  %v3818_v45 = vmax.f32 %v3634_v15, %v3762_v63  ;;  %5301 = vmatprep.subr.bf16.mxu1 %v7824_v9 }
 0x4a5   : > { %v3763_v1 = vsel %vm1962_vm4, %v7285_v35, %v7289_v34  ;;  %v7295_v22 = vunpack.i.h.bf16 %v7293_v56  ;;  %v7294_v42 = vunpack.i.l.bf16 %v7293_v56  ;;  %v3820_v44 = vmax.f32 %v3636_v25, %v7289_v34 }
 0x4a6   : > { %v9718_v51 = vmax.f32 %v3635_v12, %v3763_v1  ;;  %v10287_v12 = vmax.f32 %v9609_v53, 0.0  ;;  %v10284_v34 = vmax.f32 %v9646_v18, 0.0  ;;  %v10290_v1 = vmax.f32 %v9663_v16, 0.0 }
 0x4a7   : > { %v3824_v33 = vmax.f32 %v3640_v23, %v7295_v22  ;;  %v3765_v14 = vsel %vm1962_vm4, %v7290_v8, %v7294_v42  ;;  %v3766_v35 = vsel %vm1962_vm4, %v7294_v42, %v7295_v22  ;;  %v3664_v22 = vmax.f32 %v9674_v41, 0.0  ;;  %v7840_v41 = vld [vmem:[#allocation5 + $0x268] ss:$16 sps:$4 sm:$0xff]  }
 0x4a8   : > { %v3822_v5 = vmax.f32 %v3638_v2, %v3765_v14  ;;  %v9724_v38 = vmax.f32 %v3639_v29, %v3766_v35  ;;  %v9726_v15 = vpop.permute.xlu1 %7297  ;;  %v7346_v52 = vpack.i.bf16 %v10284_v34, %v10285_v13  ;;  %v10438_v25 = vmax.f32 %v9563_v46, 0.0 }
 0x4a9   : > { %v3852_v55 = vmax.f32 %v3820_v44, %v3824_v33  ;;  %v7300_v32 = vunpack.i.h.bf16 %v9726_v15  ;;  %v10289_v4 = vunpack.i.l.bf16 %v9726_v15 }
 0x4aa   : > { %v9730_v23 = vpop.permute.xlu0 %7302  ;;  %v3850_v62 = vmax.f32 %v3818_v45, %v3822_v5  ;;  %v7341_v45 = vpack.i.bf16 %v10287_v12, %v10286_v6 }
 0x4ab   : > { %v7304_v2 = vunpack.i.l.bf16 %v9730_v23  ;;  %v3768_v5 = vsel %vm1962_vm4, %v10289_v4, %v7300_v32 }
 0x4ac   : > { %v7308_v29 = vpop.permute.xlu1 %7307  ;;  %v7331_v42 = vpack.i.bf16 %v3850_v62, %v3852_v55 }
 0x4ad   : > { %v3769_v44 = vsel %vm1962_vm4, %v7300_v32, %v7304_v2  ;;  %v7310_v9 = vunpack.i.h.bf16 %v7308_v29  ;;  %v7309_v63 = vunpack.i.l.bf16 %v7308_v29  ;;  %v3657_v29 = vmax.f32 %v9643_v20, 0.0 }
 0x4ae   : > { %7332 = vrot.lane.b32.xlu0 %v7331_v42, %s8159_s20  ;;  %v9750_v33 = vmax.f32 %v3643_v28, %v3769_v44  ;;  %v7356_v44 = vpack.i.bf16 %v3664_v22, %v10290_v1  ;;  %v3828_v4 = vmax.f32 %v10438_v25, %v7304_v2  ;;  %v10442_v2 = vmax.f32 %v9595_v60, 0.0 }
 0x4af   : > { %v3772_v56 = vsel %vm1962_vm4, %v7309_v63, %v7310_v9  ;;  %v3832_v57 = vmax.f32 %v3648_v43, %v7310_v9  ;;  %v10441_v43 = vmax.f32 %v9621_v27, 0.0 }
 0x4b0   : > { %v9754_v14 = vmax.f32 %v3647_v39, %v3772_v56  ;;  %v9756_v35 = vpop.permute.xlu0 %7312  ;;  %v3661_v39 = vmax.f32 %v9660_v11, 0.0  ;;  %v7305_v56 = vunpack.i.h.bf16 %v9730_v23  ;;  %v10440_v23 = vmax.f32 %v9605_v26, 0.0 }
 0x4b1   : > { %v7315_v55 = vunpack.i.h.bf16 %v9756_v35  ;;  %v10288_v62 = vunpack.i.l.bf16 %v9756_v35  ;;  %v10443_v26 = vmax.f32 %v9618_v50, 0.0  ;;  %v10446_v50 = vmax.f32 %v9614_v19, 0.0 }
 0x4b2   : > { %v9766_v28 = vpop.permute.xlu1 %7317  ;;  %7342 = vrot.lane.b32.xlu0 %v7341_v45, %s8159_s20  ;;  %v3826_v45 = vmax.f32 %v3642_v17, %v3768_v5  ;;  %v3771_v1 = vsel %vm1962_vm4, %v7305_v56, %v7309_v63  ;;  %v7371_v19 = vpack.i.bf16 %v3661_v39, %v3657_v29 }
 0x4b3   : > { %v3774_v32 = vsel %vm1962_vm4, %v10288_v62, %v7315_v55  ;;  %v7319_v42 = vunpack.i.l.bf16 %v9766_v28  ;;  %v7320_v13 = vunpack.i.h.bf16 %v9766_v28 }
 0x4b4   : > { %v7323_v34 = vpop.permute.xlu0 %7322  ;;  %v3834_v17 = vmax.f32 %v10439_v3, %v3774_v32  ;;  %v10445_v32 = vmax.f32 %v9572_v49, 0.0  ;;  %v3856_v3 = vmax.f32 %v3828_v4, %v3832_v57  ;;  %v10448_v4 = vmax.f32 %v9625_v31, 0.0 }
 0x4b5   : > { %v3775_v6 = vsel %vm1962_vm4, %v7315_v55, %v7319_v42  ;;  %v7325_v12 = vunpack.i.h.bf16 %v7323_v34  ;;  %v7324_v62 = vunpack.i.l.bf16 %v7323_v34  ;;  %v3836_v5 = vmax.f32 %v10440_v23, %v7319_v42 }
 0x4b6   : > { %7347 = vrot.lane.b32.xlu0 %v7346_v52, %s8159_s20  ;;  %v7328_v7 = vpop.permute.xlu1 %7327  ;;  %v9805_v59 = vmax.f32 %v10442_v2, %v3775_v6  ;;  %v10444_v55 = vmax.f32 %v9612_v10, 0.0  ;;  %v3830_v42 = vmax.f32 %v10445_v32, %v3771_v1  ;;  %v10447_v10 = vunpack.i.l.bf16 %v9694_v48 }
 0x4b7   : > { %v3840_v9 = vmax.f32 %v10441_v43, %v7325_v12  ;;  %v3777_v34 = vsel %vm1962_vm4, %v7320_v13, %v7324_v62  ;;  %v3778_v46 = vsel %vm1962_vm4, %v7324_v62, %v7325_v12  ;;  %v7330_v25 = vunpack.i.h.bf16 %v7328_v7 }
 0x4b8   : > { %v3838_v63 = vmax.f32 %v10443_v26, %v3777_v34  ;;  %v9811_v52 = vmax.f32 %v10444_v55, %v3778_v46  ;;  %v7329_v27 = vunpack.i.l.bf16 %v7328_v7  ;;  %v10449_v43 = vunpack.i.l.bf16 %v9726_v15 }
 0x4b9   : > { %v3860_v23 = vmax.f32 %v3836_v5, %v3840_v9  ;;  %v3764_v12 = vsel %vm1962_vm4, %v7330_v25, %v7290_v8  ;;  %v10450_v31 = vmax.f32 %v9636_v0, 0.0  ;;  %v10451_v34 = vmax.f32 %v9650_v47, 0.0 }
 0x4ba   : > { %v3859_v60 = vmax.f32 %v9805_v59, %v9811_v52  ;;  %v3821_v6 = vmax.f32 %v10446_v50, %v3764_v12  ;;  %v3761_v62 = vsel %vm1962_vm4, %v7329_v27, %v10447_v10  ;;  %7357 = vrot.lane.b32.xlu0 %v7356_v44, %s8159_s20  ;;  %v7338_v49 = vpop.permute.xlu1 %7337  ;;  %v3858_v1 = vmax.f32 %v3834_v17, %v3838_v63  ;;  %v7830_v12 = vld [vmem:[#allocation5 + $0x22c] ss:$16 sps:$4 sm:$0xff]  }
 0x4bb   : > { %v3817_v57 = vmax.f32 %v10448_v4, %v3761_v62  ;;  %v7340_v37 = vunpack.i.h.bf16 %v7338_v49  ;;  %v7339_v5 = vunpack.i.l.bf16 %v7338_v49  ;;  %v7361_v8 = vpack.i.bf16 %v3860_v23, %v3856_v3  ;;  %v7822_v3 = vld [vmem:[#allocation5 + $0x208] ss:$16 sps:$4 sm:$0xff]   ;;  %v7827_v23 = vld [vmem:[#allocation5 + $0x224] ss:$16 sps:$4 sm:$0xff]  }
 0x4bc   : > { %v3854_v17 = vmax.f32 %v3826_v45, %v3830_v42  ;;  %v10452_v0 = vmax.f32 %v9718_v51, %v9724_v38  ;;  %v10453_v63 = vmov 0.0   ;;  %v7819_v42 = vld [vmem:[#allocation5 + $0x200] ss:$16 sps:$4 sm:$0xff]   ;;  %v7828_v62 = vld [vmem:[#allocation5 + $0x228] ss:$16 sps:$4 sm:$0xff]  }
 0x4bd   : > { %v3849_v7 = vmax.f32 %v3817_v57, %v3821_v6  ;;  %v3770_v48 = vsel %vm1962_vm4, %v7340_v37, %v7305_v56  ;;  %v3767_v44 = vsel %vm1962_vm4, %v7339_v5, %v10449_v43  ;;  %7362 = vrot.lane.b32.xlu1 %v7361_v8, %s8159_s20  ;;  %v7825_v38 = vld [vmem:[#allocation5 + $0x220] ss:$16 sps:$4 sm:$0xff]   ;;  %v7833_v4 = vld [vmem:[#allocation5 + $0x244] ss:$16 sps:$4 sm:$0xff]   ;;  %v7836_v57 = vld [vmem:[#allocation5 + $0x24c] ss:$16 sps:$4 sm:$0xff]   ;;  %v10454_v8 = vunpack.i.l.bf16 %v9756_v35 }
 0x4be   : > { %v9839_v9 = vmax.f32 %v10450_v31, %v3770_v48  ;;  %v9843_v46 = vmax.f32 %v10451_v34, %v3767_v44  ;;  %7372 = vrot.lane.b32.xlu0 %v7371_v19, %s8159_s20  ;;  %v7366_v25 = vpack.i.bf16 %v3858_v1, %v3854_v17  ;;  %v9862_v10 = vpop.permute.xlu1 %7352  ;;  %v7831_v17 = vld [vmem:[#allocation5 + $0x240] ss:$16 sps:$4 sm:$0xff]   ;;  %v7834_v31 = vld [vmem:[#allocation5 + $0x248] ss:$16 sps:$4 sm:$0xff]   ;;  %v10455_v34 = vmax.f32 %v9609_v53, 0.0 }
 0x4bf   : > { %v7354_v37 = vunpack.i.l.bf16 %v9862_v10  ;;  %v7355_v48 = vunpack.i.h.bf16 %v9862_v10 }
 0x4c0   : > { %v3853_v56 = vmax.f32 %v9843_v46, %v9839_v9  ;;  %v7857_v9 = vld [vmem:[#allocation5 + $0x2c4] ss:$16 sps:$4 sm:$0xff]   ;;  %v7860_v46 = vld [vmem:[#allocation5 + $0x2cc] ss:$16 sps:$4 sm:$0xff]  }
 0x4c1   : > { %7367 = vrot.lane.b32.xlu1 %v7366_v25, %s8159_s20 }
 0x520   : > { %v7333_v15 = vpop.permute.xlu0 %7332 }
 0x521   : > { %v7335_v2 = vunpack.i.h.bf16 %v7333_v15  ;;  %v7334_v26 = vunpack.i.l.bf16 %v7333_v15 }
 0x523   : > { %v9850_v45 = vsel %vm1962_vm4, %v3849_v7, %v7335_v2  ;;  %v9856_v47 = vsel %vm1962_vm4, %v10452_v0, %v7334_v26  ;;  %v7839_v2 = vld [vmem:[#allocation5 + $0x264] ss:$16 sps:$4 sm:$0xff]   ;;  %v7842_v26 = vld [vmem:[#allocation5 + $0x26c] ss:$16 sps:$4 sm:$0xff]   ;;  %v10457_v0 = vmax.f32 %v9679_v58, 0.0  ;;  %v10461_v58 = vmax.f32 %v9663_v16, 0.0 }
 0x524   : > { %v3905_v55 = vpack.c.bf16 %v9850_v45, %v10453_v63  ;;  %v7343_v27 = vpop.permute.xlu0 %7342  ;;  %v3906_v32 = vpack.c.bf16 %v9856_v47, %v10453_v63 }
 0x525   : > { %v7345_v50 = vunpack.i.h.bf16 %v7343_v27  ;;  %v7344_v6 = vunpack.i.l.bf16 %v7343_v27  ;;  %v10458_v27 = vmax.f32 %v9657_v61, 0.0 }
 0x526   : > { %5121 = vmatprep.mubr.bf16.mxu0 %v3906_v32  ;;  %5280 = vmatprep.mubr.bf16.mxu1 %v3906_v32 }
 0x527   : > { %5122 = vmatmul.mubr.bf16.vlgmr.msra.gmra.mrb[48].mxu0 %v3905_v55  ;;  %5281 = vmatmul.mubr.bf16.vlgmr.msra.gmra.mrb[48].mxu1 %v3905_v55  ;;  %v3776_v5 = vsel %vm1962_vm4, %v7345_v50, %v7320_v13  ;;  %v3773_v19 = vsel %vm1962_vm4, %v7344_v6, %v10454_v8  ;;  %v10456_v13 = vmax.f32 %v9592_v54, 0.0  ;;  %v3844_v55 = vmax.f32 %v10457_v0, %v7354_v37  ;;  %v7845_v8 = vld [vmem:[#allocation5 + $0x284] ss:$16 sps:$4 sm:$0xff]  }
 0x528   : > { %5143 = vmatpush1.bf16.msra.mxu0 %v7819_v42  ;;  %5302 = vmatpush1.bf16.msra.mxu1 %v7822_v3  ;;  %v7348_v51 = vpop.permute.xlu0 %7347  ;;  %v3837_v28 = vmax.f32 %v10455_v34, %v3776_v5  ;;  %v10459_v42 = vmax.f32 %v9646_v18, 0.0  ;;  %v10460_v50 = vmax.f32 %v9671_v36, 0.0  ;;  %v7846_v34 = vld [vmem:[#allocation5 + $0x288] ss:$16 sps:$4 sm:$0xff]   ;;  %v7869_v0 = vld [vmem:[#allocation5 + $0x304] ss:$16 sps:$4 sm:$0xff]  }
 0x529   : > { %v7350_v49 = vunpack.i.h.bf16 %v7348_v51  ;;  %v7349_v1 = vunpack.i.l.bf16 %v7348_v51  ;;  %5144 = vmatprep.subr.bf16.mxu0 %v7827_v23  ;;  %5303 = vmatprep.subr.bf16.mxu1 %v7830_v12  ;;  %v3833_v25 = vmax.f32 %v10456_v13, %v3773_v19  ;;  %v7848_v19 = vld [vmem:[#allocation5 + $0x28c] ss:$16 sps:$4 sm:$0xff]   ;;  %v7849_v13 = vld [vmem:[#allocation5 + $0x2a0] ss:$16 sps:$4 sm:$0xff]  }
 0x52b   : > { %v3780_v7 = vsel %vm1962_vm4, %v7349_v1, %v7350_v49  ;;  %v3781_v43 = vsel %vm1962_vm4, %v7350_v49, %v7354_v37 }
 0x52c   : > { %5145 = vmatpush1.bf16.msra.mxu0 %v7825_v38  ;;  %5304 = vmatpush1.bf16.msra.mxu1 %v7828_v62  ;;  %v7358_v44 = vpop.permute.xlu0 %7357  ;;  %v3842_v32 = vmax.f32 %v10458_v27, %v3780_v7  ;;  %v9884_v3 = vmax.f32 %v10459_v42, %v3781_v43  ;;  %v7837_v38 = vld [vmem:[#allocation5 + $0x260] ss:$16 sps:$4 sm:$0xff]   ;;  %v7875_v42 = vld [vmem:[#allocation5 + $0x324] ss:$16 sps:$4 sm:$0xff]  }
 0x52d   : > { %v7360_v35 = vunpack.i.h.bf16 %v7358_v44  ;;  %v7359_v15 = vunpack.i.l.bf16 %v7358_v44  ;;  %5146 = vmatprep.subr.bf16.mxu0 %v7833_v4  ;;  %5305 = vmatprep.subr.bf16.mxu1 %v7836_v57  ;;  %v10462_v57 = vmax.f32 %v9750_v33, %v9754_v14  ;;  %v7867_v27 = vld [vmem:[#allocation5 + $0x300] ss:$16 sps:$4 sm:$0xff]  }
 0x52f   : > { %v3848_v54 = vmax.f32 %v3664_v22, %v7360_v35  ;;  %v3783_v53 = vsel %vm1962_vm4, %v7355_v48, %v7359_v15  ;;  %v3784_v23 = vsel %vm1962_vm4, %v7359_v15, %v7360_v35  ;;  %v7363_v12 = vpop.permute.xlu1 %7362  ;;  %v3857_v22 = vmax.f32 %v3833_v25, %v3837_v28  ;;  %v7854_v28 = vld [vmem:[#allocation5 + $0x2ac] ss:$16 sps:$4 sm:$0xff]   ;;  %v7852_v25 = vld [vmem:[#allocation5 + $0x2a8] ss:$16 sps:$4 sm:$0xff]   ;;  %v7863_v35 = vld [vmem:[#allocation5 + $0x2e4] ss:$16 sps:$4 sm:$0xff]  }
 0x530   : > { %v3846_v6 = vmax.f32 %v10460_v50, %v3783_v53  ;;  %v9894_v10 = vmax.f32 %v10461_v58, %v3784_v23  ;;  %v7365_v61 = vunpack.i.h.bf16 %v7363_v12  ;;  %v7364_v51 = vunpack.i.l.bf16 %v7363_v12  ;;  %5147 = vmatpush1.bf16.msra.mxu0 %v7831_v17  ;;  %5306 = vmatpush1.bf16.msra.mxu1 %v7834_v31  ;;  %v7373_v18 = vpop.permute.xlu0 %7372  ;;  %v7843_v31 = vld [vmem:[#allocation5 + $0x280] ss:$16 sps:$4 sm:$0xff]   ;;  %v7866_v15 = vld [vmem:[#allocation5 + $0x2ec] ss:$16 sps:$4 sm:$0xff]   ;;  %v7876_v23 = vld [vmem:[#allocation5 + $0x328] ss:$16 sps:$4 sm:$0xff]  }
 0x531   : > { %v3864_v62 = vmax.f32 %v3844_v55, %v3848_v54  ;;  %v7375_v49 = vunpack.i.h.bf16 %v7373_v18  ;;  %v7374_v4 = vunpack.i.l.bf16 %v7373_v18  ;;  %5148 = vmatprep.subr.bf16.mxu0 %v7839_v2  ;;  %5307 = vmatprep.subr.bf16.mxu1 %v7842_v26  ;;  %v7861_v2 = vld [vmem:[#allocation5 + $0x2e0] ss:$16 sps:$4 sm:$0xff]   ;;  %v7864_v26 = vld [vmem:[#allocation5 + $0x2e8] ss:$16 sps:$4 sm:$0xff]   ;;  %v7872_v55 = vld [vmem:[#allocation5 + $0x30c] ss:$16 sps:$4 sm:$0xff]  }
 0x532   : > { %v3863_v36 = vmax.f32 %v9884_v3, %v9894_v10  ;;  %v9902_v16 = vsel %vm1962_vm4, %v3859_v60, %v7365_v61  ;;  %v3902_v37 = vsel %vm1962_vm4, %v10462_v57, %v7364_v51  ;;  %v3862_v5 = vmax.f32 %v3842_v32, %v3846_v6  ;;  %v7870_v32 = vld [vmem:[#allocation5 + $0x308] ss:$16 sps:$4 sm:$0xff]   ;;  %v7878_v54 = vld [vmem:[#allocation5 + $0x32c] ss:$16 sps:$4 sm:$0xff]   ;;  %v7873_v53 = vld [vmem:[#allocation5 + $0x320] ss:$16 sps:$4 sm:$0xff]  }
 0x533   : > { %v9909_v7 = vpack.c.bf16 %v9902_v16, %v3902_v37  ;;  %v3779_v43 = vsel %vm1962_vm4, %v7374_v4, %v7349_v1  ;;  %v3782_v44 = vsel %vm1962_vm4, %v7375_v49, %v7355_v48  ;;  %v7368_v17 = vpop.permute.xlu1 %7367  ;;  %v3908_v59 = vpack.c.bf16 %v3902_v37, %v9856_v47  ;;  %v7881_v12 = vld [vmem:[#allocation5 + $0x344] ss:$16 sps:$4 sm:$0xff]   ;;  %v7884_v50 = vld [vmem:[#allocation5 + $0x34c] ss:$16 sps:$4 sm:$0xff]   ;;  %v7879_v6 = vld [vmem:[#allocation5 + $0x340] ss:$16 sps:$4 sm:$0xff]  }
 0x534   : > { %v9916_v52 = vmax.f32 %v3657_v29, %v3779_v43  ;;  %v9920_v33 = vmax.f32 %v3661_v39, %v3782_v44  ;;  %v7370_v14 = vunpack.i.h.bf16 %v7368_v17  ;;  %v7369_v60 = vunpack.i.l.bf16 %v7368_v17  ;;  %5149 = vmatpush1.bf16.msra.mxu0 %v7837_v38  ;;  %5308 = vmatpush1.bf16.msra.mxu1 %v7840_v41  ;;  %v7851_v39 = vld [vmem:[#allocation5 + $0x2a4] ss:$16 sps:$4 sm:$0xff]   ;;  %v7882_v58 = vld [vmem:[#allocation5 + $0x348] ss:$16 sps:$4 sm:$0xff]   ;;  %v7890_v51 = vld [vmem:[#allocation5 + $0x36c] ss:$16 sps:$4 sm:$0xff]  }
 0x535   : > { %5131 = vmatprep.mubr.bf16.mxu0 %v9909_v7  ;;  %5290 = vmatprep.mubr.bf16.mxu1 %v9909_v7  ;;  %v7376_v1 = vpack.i.bf16 %v3862_v5, %v3864_v62  ;;  %v7887_v61 = vld [vmem:[#allocation5 + $0x364] ss:$16 sps:$4 sm:$0xff]   ;;  %v7885_v18 = vld [vmem:[#allocation5 + $0x360] ss:$16 sps:$4 sm:$0xff]   ;;  %v7888_v38 = vld [vmem:[#allocation5 + $0x368] ss:$16 sps:$4 sm:$0xff]  }
 0x536   : > { %v3861_v20 = vmax.f32 %v9916_v52, %v9920_v33  ;;  %v9927_v29 = vsel %vm1962_vm4, %v3857_v22, %v7370_v14  ;;  %v3898_v11 = vsel %vm1962_vm4, %v3853_v56, %v7369_v60  ;;  %5150 = vmatprep.subr.bf16.mxu0 %v7845_v8  ;;  %5309 = vmatprep.subr.bf16.mxu1 %v7848_v19  ;;  %v7855_v56 = vld [vmem:[#allocation5 + $0x2c0] ss:$16 sps:$4 sm:$0xff]   ;;  %v7893_v41 = vld [vmem:[#allocation5 + $0x384] ss:$16 sps:$4 sm:$0xff]   ;;  %v7896_v22 = vld [vmem:[#allocation5 + $0x38c] ss:$16 sps:$4 sm:$0xff]  }
 0x537   : > { %v9934_v47 = vpack.c.bf16 %v3898_v11, %v9850_v45  ;;  %v9937_v48 = vpack.c.bf16 %v9927_v29, %v3898_v11  ;;  %7377 = vrot.lane.b32.xlu1 %v7376_v1, %s8159_s20  ;;  %v7858_v45 = vld [vmem:[#allocation5 + $0x2c8] ss:$16 sps:$4 sm:$0xff]   ;;  %v7891_v62 = vld [vmem:[#allocation5 + $0x380] ss:$16 sps:$4 sm:$0xff]   ;;  %v7899_v4 = vld [vmem:[#allocation5 + $0x3a4] ss:$16 sps:$4 sm:$0xff]  }
 0x538   : > { %5151 = vmatpush1.bf16.msra.mxu0 %v7843_v31  ;;  %5310 = vmatpush1.bf16.msra.mxu1 %v7846_v34  ;;  %v7894_v49 = vld [vmem:[#allocation5 + $0x388] ss:$16 sps:$4 sm:$0xff]   ;;  %v7902_v57 = vld [vmem:[#allocation5 + $0x3ac] ss:$16 sps:$4 sm:$0xff]   ;;  %v7897_v37 = vld [vmem:[#allocation5 + $0x3a0] ss:$16 sps:$4 sm:$0xff]  }
 0x539   : > { %5132 = vmatmul.mubr.bf16.gmra.mrb[52].mxu0 %v9937_v48  ;;  %5291 = vmatmul.mubr.bf16.gmra.mrb[52].mxu1 %v9937_v48  ;;  %v7900_v5 = vld [vmem:[#allocation5 + $0x3a8] ss:$16 sps:$4 sm:$0xff]   ;;  %v7905_v8 = vld [vmem:[#allocation5 + $0x3c4] ss:$16 sps:$4 sm:$0xff]   ;;  %v7908_v19 = vld [vmem:[#allocation5 + $0x3cc] ss:$16 sps:$4 sm:$0xff]  }
 0x53a   : > { %5152 = vmatprep.subr.bf16.mxu0 %v7851_v39  ;;  %5174 = vmatprep.mubr.bf16.mxu0 %v3908_v59  ;;  %v7903_v43 = vld [vmem:[#allocation5 + $0x3c0] ss:$16 sps:$4 sm:$0xff]   ;;  %v7906_v44 = vld [vmem:[#allocation5 + $0x3c8] ss:$16 sps:$4 sm:$0xff]   ;;  %v7911_v17 = vld [vmem:[#allocation5 + $0x3e4] ss:$16 sps:$4 sm:$0xff]  }
 0x53b   : > { %5311 = vmatprep.subr.bf16.mxu1 %v7854_v28  ;;  %5333 = vmatprep.mubr.bf16.mxu1 %v3908_v59  ;;  %v7914_v59 = vld [vmem:[#allocation5 + $0x3ec] ss:$16 sps:$4 sm:$0xff]   ;;  %v7909_v14 = vld [vmem:[#allocation5 + $0x3e0] ss:$16 sps:$4 sm:$0xff]   ;;  %v7912_v60 = vld [vmem:[#allocation5 + $0x3e8] ss:$16 sps:$4 sm:$0xff]  }
 0x53c   : > { %5153 = vmatpush1.bf16.msra.mxu0 %v7849_v13  ;;  %5312 = vmatpush1.bf16.msra.mxu1 %v7852_v25  ;;  %v7917_v31 = vld [vmem:[#allocation5 + $0x404] ss:$16 sps:$4 sm:$0xff]   ;;  %v7920_v34 = vld [vmem:[#allocation5 + $0x40c] ss:$16 sps:$4 sm:$0xff]   ;;  %v7915_v1 = vld [vmem:[#allocation5 + $0x400] ss:$16 sps:$4 sm:$0xff]  }
 0x53d   : > { %5154 = vmatprep.subr.bf16.mxu0 %v7857_v9  ;;  %5313 = vmatprep.subr.bf16.mxu1 %v7860_v46  ;;  %v7918_v11 = vld [vmem:[#allocation5 + $0x408] ss:$16 sps:$4 sm:$0xff]   ;;  %v7923_v39 = vld [vmem:[#allocation5 + $0x424] ss:$16 sps:$4 sm:$0xff]   ;;  %v7926_v28 = vld [vmem:[#allocation5 + $0x42c] ss:$16 sps:$4 sm:$0xff]  }
 0x53e   : > { %v7921_v13 = vld [vmem:[#allocation5 + $0x420] ss:$16 sps:$4 sm:$0xff]   ;;  %v7924_v25 = vld [vmem:[#allocation5 + $0x428] ss:$16 sps:$4 sm:$0xff]   ;;  %v7929_v9 = vld [vmem:[#allocation5 + $0x444] ss:$16 sps:$4 sm:$0xff]  }
 0x53f   : > { %v7932_v46 = vld [vmem:[#allocation5 + $0x44c] ss:$16 sps:$4 sm:$0xff]   ;;  %v8012_v3 = vld [vmem:[%s10166_s8] sm:$0xff]   ;;  %s10463_s20 = sld [smem:[#allocation42_spill]] }
 0x540   : > { %5155 = vmatpush1.bf16.msra.mxu0 %v7855_v56  ;;  %5314 = vmatpush1.bf16.msra.mxu1 %v7858_v45  ;;  %v7927_v56 = vld [vmem:[#allocation5 + $0x440] ss:$16 sps:$4 sm:$0xff]   ;;  %v7930_v45 = vld [vmem:[#allocation5 + $0x448] ss:$16 sps:$4 sm:$0xff]  }
 0x541   : > { %5156 = vmatprep.subr.bf16.mxu0 %v7863_v35  ;;  %5315 = vmatprep.subr.bf16.mxu1 %v7866_v15  ;;  %v7935_v35 = vld [vmem:[#allocation5 + $0x464] ss:$16 sps:$4 sm:$0xff]   ;;  %v7938_v15 = vld [vmem:[#allocation5 + $0x46c] ss:$16 sps:$4 sm:$0xff]  }
 0x542   : > { %v8017_v10 = vld [vmem:[%s10166_s8 + $0x80] sm:$0xff]   ;;  %v8019_v52 = vld [vmem:[%s10166_s8 + $0xc8] sm:$0xff]  }
 0x543   : > { %v8021_v33 = vld [vmem:[%s10166_s8 + $0x88] sm:$0xff]  }
 0x544   : > { %5157 = vmatpush1.bf16.msra.mxu0 %v7861_v2  ;;  %5316 = vmatpush1.bf16.msra.mxu1 %v7864_v26  ;;  %v7933_v2 = vld [vmem:[#allocation5 + $0x460] ss:$16 sps:$4 sm:$0xff]   ;;  %v7941_v26 = vld [vmem:[#allocation5 + $0x484] ss:$16 sps:$4 sm:$0xff]  }
 0x545   : > { %5158 = vmatprep.subr.bf16.mxu0 %v7869_v0  ;;  %5317 = vmatprep.subr.bf16.mxu1 %v7872_v55  ;;  %v7944_v0 = vld [vmem:[#allocation5 + $0x48c] ss:$16 sps:$4 sm:$0xff]   ;;  %v7939_v55 = vld [vmem:[#allocation5 + $0x480] ss:$16 sps:$4 sm:$0xff]   ;;  %s10464_s26 = smov %s10463_s20 }
 0x548   : > { %5159 = vmatpush1.bf16.msra.mxu0 %v7867_v27  ;;  %5318 = vmatpush1.bf16.msra.mxu1 %v7870_v32  ;;  %v7942_v27 = vld [vmem:[#allocation5 + $0x488] ss:$16 sps:$4 sm:$0xff]   ;;  %v7947_v32 = vld [vmem:[#allocation5 + $0x4a4] ss:$16 sps:$4 sm:$0xff]  }
 0x549   : > { %5160 = vmatprep.subr.bf16.mxu0 %v7875_v42  ;;  %5319 = vmatprep.subr.bf16.mxu1 %v7878_v54  ;;  %v7950_v42 = vld [vmem:[#allocation5 + $0x4ac] ss:$16 sps:$4 sm:$0xff]   ;;  %v7945_v54 = vld [vmem:[#allocation5 + $0x4a0] ss:$16 sps:$4 sm:$0xff]  }
 0x54c   : > { %5161 = vmatpush1.bf16.msra.mxu0 %v7873_v53  ;;  %5320 = vmatpush1.bf16.msra.mxu1 %v7876_v23  ;;  %v7948_v53 = vld [vmem:[#allocation5 + $0x4a8] ss:$16 sps:$4 sm:$0xff]   ;;  %v7953_v23 = vld [vmem:[#allocation5 + $0x4c4] ss:$16 sps:$4 sm:$0xff]  }
 0x54d   : > { %5162 = vmatprep.subr.bf16.mxu0 %v7881_v12  ;;  %5321 = vmatprep.subr.bf16.mxu1 %v7884_v50  ;;  %v7956_v12 = vld [vmem:[#allocation5 + $0x4cc] ss:$16 sps:$4 sm:$0xff]   ;;  %v7951_v50 = vld [vmem:[#allocation5 + $0x4c0] ss:$16 sps:$4 sm:$0xff]  }
 0x550   : > { %5163 = vmatpush1.bf16.msra.mxu0 %v7879_v6  ;;  %5322 = vmatpush1.bf16.msra.mxu1 %v7882_v58  ;;  %v7954_v6 = vld [vmem:[#allocation5 + $0x4c8] ss:$16 sps:$4 sm:$0xff]   ;;  %v7959_v58 = vld [vmem:[#allocation5 + $0x4e4] ss:$16 sps:$4 sm:$0xff]  }
 0x551   : > { %5164 = vmatprep.subr.bf16.mxu0 %v7887_v61  ;;  %5323 = vmatprep.subr.bf16.mxu1 %v7890_v51  ;;  %v7962_v61 = vld [vmem:[#allocation5 + $0x4ec] ss:$16 sps:$4 sm:$0xff]   ;;  %v7957_v51 = vld [vmem:[#allocation5 + $0x4e0] ss:$16 sps:$4 sm:$0xff]  }
 0x554   : > { %5165 = vmatpush1.bf16.msra.mxu0 %v7885_v18  ;;  %5324 = vmatpush1.bf16.msra.mxu1 %v7888_v38  ;;  %v7960_v18 = vld [vmem:[#allocation5 + $0x4e8] ss:$16 sps:$4 sm:$0xff]   ;;  %v7965_v38 = vld [vmem:[#allocation5 + $0x504] ss:$16 sps:$4 sm:$0xff]  }
 0x555   : > { %5166 = vmatprep.subr.bf16.mxu0 %v7893_v41  ;;  %5325 = vmatprep.subr.bf16.mxu1 %v7896_v22  ;;  %v7968_v41 = vld [vmem:[#allocation5 + $0x50c] ss:$16 sps:$4 sm:$0xff]   ;;  %v7963_v22 = vld [vmem:[#allocation5 + $0x500] ss:$16 sps:$4 sm:$0xff]  }
 0x558   : > { %5167 = vmatpush1.bf16.msra.mxu0 %v7891_v62  ;;  %5326 = vmatpush1.bf16.msra.mxu1 %v7894_v49  ;;  %v7966_v62 = vld [vmem:[#allocation5 + $0x508] ss:$16 sps:$4 sm:$0xff]   ;;  %v7971_v49 = vld [vmem:[#allocation5 + $0x524] ss:$16 sps:$4 sm:$0xff]  }
 0x559   : > { %5168 = vmatprep.subr.bf16.mxu0 %v7899_v4  ;;  %5327 = vmatprep.subr.bf16.mxu1 %v7902_v57  ;;  %v7974_v4 = vld [vmem:[#allocation5 + $0x52c] ss:$16 sps:$4 sm:$0xff]   ;;  %v7969_v57 = vld [vmem:[#allocation5 + $0x520] ss:$16 sps:$4 sm:$0xff]  }
 0x55c   : > { %5169 = vmatpush1.bf16.msra.mxu0 %v7897_v37  ;;  %5328 = vmatpush1.bf16.msra.mxu1 %v7900_v5  ;;  %v7972_v37 = vld [vmem:[#allocation5 + $0x528] ss:$16 sps:$4 sm:$0xff]   ;;  %v7977_v5 = vld [vmem:[#allocation5 + $0x544] ss:$16 sps:$4 sm:$0xff]  }
 0x55d   : > { %5170 = vmatprep.subr.bf16.mxu0 %v7905_v8  ;;  %5329 = vmatprep.subr.bf16.mxu1 %v7908_v19  ;;  %v7980_v8 = vld [vmem:[#allocation5 + $0x54c] ss:$16 sps:$4 sm:$0xff]   ;;  %v7975_v19 = vld [vmem:[#allocation5 + $0x540] ss:$16 sps:$4 sm:$0xff]  }
 0x560   : > { %5171 = vmatpush1.bf16.msra.mxu0 %v7903_v43  ;;  %5330 = vmatpush1.bf16.msra.mxu1 %v7906_v44  ;;  %v7978_v43 = vld [vmem:[#allocation5 + $0x548] ss:$16 sps:$4 sm:$0xff]   ;;  %v7983_v44 = vld [vmem:[#allocation5 + $0x564] ss:$16 sps:$4 sm:$0xff]  }
 0x561   : > { %5172 = vmatprep.subr.bf16.mxu0 %v7911_v17  ;;  %5331 = vmatprep.subr.bf16.mxu1 %v7914_v59  ;;  %v7986_v17 = vld [vmem:[#allocation5 + $0x56c] ss:$16 sps:$4 sm:$0xff]   ;;  %v7981_v59 = vld [vmem:[#allocation5 + $0x560] ss:$16 sps:$4 sm:$0xff]  }
 0x564   : > { %5173 = vmatpush1.bf16.msra.mxu0 %v7909_v14  ;;  %5332 = vmatpush1.bf16.msra.mxu1 %v7912_v60  ;;  %v7984_v14 = vld [vmem:[#allocation5 + $0x568] ss:$16 sps:$4 sm:$0xff]   ;;  %v7989_v60 = vld [vmem:[#allocation5 + $0x584] ss:$16 sps:$4 sm:$0xff]  }
 0x565   : > { %5195 = vmatprep.subr.bf16.mxu0 %v7917_v31  ;;  %5354 = vmatprep.subr.bf16.mxu1 %v7920_v34  ;;  %v7992_v31 = vld [vmem:[#allocation5 + $0x58c] ss:$16 sps:$4 sm:$0xff]   ;;  %v7987_v34 = vld [vmem:[#allocation5 + $0x580] ss:$16 sps:$4 sm:$0xff]  }
 0x567   : > { %5175 = vmatmul.mubr.bf16.vlgmr.msra.gmra.mrb[48].mxu0 %v9934_v47  ;;  %5334 = vmatmul.mubr.bf16.vlgmr.msra.gmra.mrb[48].mxu1 %v9934_v47  ;;  %v7936_v47 = vld [vmem:[#allocation5 + $0x468] ss:$16 sps:$4 sm:$0xff]  }
 0x568   : > { %5196 = vmatpush1.bf16.msra.mxu0 %v7915_v1  ;;  %5355 = vmatpush1.bf16.msra.mxu1 %v7918_v11  ;;  %v7990_v1 = vld [vmem:[#allocation5 + $0x588] ss:$16 sps:$4 sm:$0xff]   ;;  %v7995_v11 = vld [vmem:[#allocation5 + $0x5a4] ss:$16 sps:$4 sm:$0xff]  }
 0x569   : > { %5197 = vmatprep.subr.bf16.mxu0 %v7923_v39  ;;  %5356 = vmatprep.subr.bf16.mxu1 %v7926_v28  ;;  %v7998_v39 = vld [vmem:[#allocation5 + $0x5ac] ss:$16 sps:$4 sm:$0xff]   ;;  %v7993_v28 = vld [vmem:[#allocation5 + $0x5a0] ss:$16 sps:$4 sm:$0xff]  }
 0x56c   : > { %5198 = vmatpush1.bf16.msra.mxu0 %v7921_v13  ;;  %5357 = vmatpush1.bf16.msra.mxu1 %v7924_v25  ;;  %v7996_v13 = vld [vmem:[#allocation5 + $0x5a8] ss:$16 sps:$4 sm:$0xff]   ;;  %v8001_v25 = vld [vmem:[#allocation5 + $0x5c4] ss:$16 sps:$4 sm:$0xff]  }
 0x56d   : > { %5199 = vmatprep.subr.bf16.mxu0 %v7929_v9  ;;  %5358 = vmatprep.subr.bf16.mxu1 %v7932_v46  ;;  %v8004_v9 = vld [vmem:[#allocation5 + $0x5cc] ss:$16 sps:$4 sm:$0xff]   ;;  %v7999_v46 = vld [vmem:[#allocation5 + $0x5c0] ss:$16 sps:$4 sm:$0xff]  }
 0x570   : > { %5200 = vmatpush1.bf16.msra.mxu0 %v7927_v56  ;;  %5359 = vmatpush1.bf16.msra.mxu1 %v7930_v45  ;;  %v8002_v56 = vld [vmem:[#allocation5 + $0x5c8] ss:$16 sps:$4 sm:$0xff]   ;;  %v8007_v45 = vld [vmem:[#allocation5 + $0x5e4] ss:$16 sps:$4 sm:$0xff]  }
 0x571   : > { %5201 = vmatprep.subr.bf16.mxu0 %v7935_v35  ;;  %5360 = vmatprep.subr.bf16.mxu1 %v7938_v15  ;;  %v8010_v35 = vld [vmem:[#allocation5 + $0x5ec] ss:$16 sps:$4 sm:$0xff]   ;;  %v8005_v15 = vld [vmem:[#allocation5 + $0x5e0] ss:$16 sps:$4 sm:$0xff]  }
 0x574   : > { %5202 = vmatpush1.bf16.msra.mxu0 %v7933_v2  ;;  %5361 = vmatpush1.bf16.msra.mxu1 %v7936_v47  ;;  %v8008_v2 = vld [vmem:[#allocation5 + $0x5e8] ss:$16 sps:$4 sm:$0xff]   ;;  %v8011_v47 = vld [vmem:[%s10166_s8 + $0x40] sm:$0xff]  }
 0x575   : > { %5203 = vmatprep.subr.bf16.mxu0 %v7941_v26  ;;  %5362 = vmatprep.subr.bf16.mxu1 %v7944_v0  ;;  %v8015_v26 = vld [vmem:[%s10166_s8 + $0xc0] sm:$0xff]  }
 0x578   : > { %5204 = vmatpush1.bf16.msra.mxu0 %v7939_v55  ;;  %5363 = vmatpush1.bf16.msra.mxu1 %v7942_v27 }
 0x579   : > { %5205 = vmatprep.subr.bf16.mxu0 %v7947_v32  ;;  %5364 = vmatprep.subr.bf16.mxu1 %v7950_v42 }
 0x57c   : > { %5206 = vmatpush1.bf16.msra.mxu0 %v7945_v54  ;;  %5365 = vmatpush1.bf16.msra.mxu1 %v7948_v53 }
 0x57d   : > { %5207 = vmatprep.subr.bf16.mxu0 %v7953_v23  ;;  %5366 = vmatprep.subr.bf16.mxu1 %v7956_v12  ;;  %v8018_v23 = vld [vmem:[%s10166_s8 + $0x10] sm:$0xff]  }
 0x57e   : > { %v8025_v12 = vld [vmem:[%s10166_s8 + $0x90] sm:$0xff]  }
 0x580   : > { %5208 = vmatpush1.bf16.msra.mxu0 %v7951_v50  ;;  %5367 = vmatpush1.bf16.msra.mxu1 %v7954_v6  ;;  %v8020_v50 = vld [vmem:[%s10166_s8 + $0x58] sm:$0xff]  }
 0x581   : > { %5209 = vmatprep.subr.bf16.mxu0 %v7959_v58  ;;  %5368 = vmatprep.subr.bf16.mxu1 %v7962_v61  ;;  %v8022_v6 = vld [vmem:[%s10166_s8 + $0x18] sm:$0xff]   ;;  %v8024_v58 = vld [vmem:[%s10166_s8 + $0x60] sm:$0xff]  }
 0x582   : > { %v8026_v61 = vld [vmem:[%s10166_s8 + $0x20] sm:$0xff]  }
 0x584   : > { %5210 = vmatpush1.bf16.msra.mxu0 %v7957_v51  ;;  %5369 = vmatpush1.bf16.msra.mxu1 %v7960_v18  ;;  %v8027_v51 = vld [vmem:[%s10166_s8 + $0xd8] sm:$0xff]   ;;  %v8028_v18 = vld [vmem:[%s10166_s8 + $0x68] sm:$0xff]  }
 0x585   : > { %5211 = vmatprep.subr.bf16.mxu0 %v7965_v38  ;;  %5370 = vmatprep.subr.bf16.mxu1 %v7968_v41  ;;  %v8029_v38 = vld [vmem:[%s10166_s8 + $0x98] sm:$0xff]   ;;  %v8030_v41 = vld [vmem:[%s10166_s8 + $0x28] sm:$0xff]  }
 0x588   : > { %5212 = vmatpush1.bf16.msra.mxu0 %v7963_v22  ;;  %5371 = vmatpush1.bf16.msra.mxu1 %v7966_v62  ;;  %v8031_v22 = vld [vmem:[%s10166_s8 + $0xe0] sm:$0xff]   ;;  %v8032_v62 = vld [vmem:[%s10166_s8 + $0x70] sm:$0xff]  }
 0x589   : > { %5213 = vmatprep.subr.bf16.mxu0 %v7971_v49  ;;  %5372 = vmatprep.subr.bf16.mxu1 %v7974_v4  ;;  %v8033_v49 = vld [vmem:[%s10166_s8 + $0xa0] sm:$0xff]   ;;  %v8034_v4 = vld [vmem:[%s10166_s8 + $0x30] sm:$0xff]  }
 0x58c   : > { %5214 = vmatpush1.bf16.msra.mxu0 %v7969_v57  ;;  %5373 = vmatpush1.bf16.msra.mxu1 %v7972_v37  ;;  %v8035_v57 = vld [vmem:[%s10166_s8 + $0xe8] sm:$0xff]   ;;  %v8036_v37 = vld [vmem:[%s10166_s8 + $0x78] sm:$0xff]  }
 0x58d   : > { %5215 = vmatprep.subr.bf16.mxu0 %v7977_v5  ;;  %5374 = vmatprep.subr.bf16.mxu1 %v7980_v8  ;;  %v8037_v5 = vld [vmem:[%s10166_s8 + $0xa8] sm:$0xff]   ;;  %v8038_v8 = vld [vmem:[%s10166_s8 + $0x38] sm:$0xff]  }
 0x590   : > { %5216 = vmatpush1.bf16.msra.mxu0 %v7975_v19  ;;  %5375 = vmatpush1.bf16.msra.mxu1 %v7978_v43  ;;  %v8039_v19 = vld [vmem:[%s10166_s8 + $0xf0] sm:$0xff]  }
 0x591   : > { %5217 = vmatprep.subr.bf16.mxu0 %v7983_v44  ;;  %5376 = vmatprep.subr.bf16.mxu1 %v7986_v17  ;;  %v8040_v43 = vld [vmem:[%s10166_s8 + $0xb0] sm:$0xff]   ;;  %v8041_v44 = vld [vmem:[%s10166_s8 + $0xf8] sm:$0xff]  }
 0x592   : > { %v8042_v17 = vld [vmem:[%s10166_s8 + $0xb8] sm:$0xff]  }
 0x594   : > { %5218 = vmatpush1.bf16.msra.mxu0 %v7981_v59  ;;  %5377 = vmatpush1.bf16.msra.mxu1 %v7984_v14  ;;  %v4107_v59 = vld [vmem:[%s10165_s7] sm:$0xf] }
 0x595   : > { %5219 = vmatprep.subr.bf16.mxu0 %v7989_v60  ;;  %5378 = vmatprep.subr.bf16.mxu1 %v7992_v31  ;;  %v4112_v14 = vrot.slane %v4107_v59, %v10437_v30  ;;  %v4120_v60 = vrot.slane %v4107_v59, %v10434_v24  ;;  %v4116_v31 = vrot.slane %v4107_v59, %v10435_v21 }
 0x598   : > { %5220 = vmatpush1.bf16.msra.mxu0 %v7987_v34  ;;  %5379 = vmatpush1.bf16.msra.mxu1 %v7990_v1  ;;  %v4124_v34 = vrot.slane %v4107_v59, %v10436_v40 }
 0x599   : > { %5221 = vmatprep.subr.bf16.mxu0 %v7995_v11  ;;  %5380 = vmatprep.subr.bf16.mxu1 %v7998_v39 }
 0x59c   : > { %5222 = vmatpush1.bf16.msra.mxu0 %v7993_v28  ;;  %5381 = vmatpush1.bf16.msra.mxu1 %v7996_v13 }
 0x59d   : > { %5223 = vmatprep.subr.bf16.mxu0 %v8001_v25  ;;  %5382 = vmatprep.subr.bf16.mxu1 %v8004_v9 }
 0x5a0   : > { %5224 = vmatpush1.bf16.msra.mxu0 %v7999_v46  ;;  %5383 = vmatpush1.bf16.msra.mxu1 %v8002_v56 }
 0x5a1   : > { %5225 = vmatprep.subr.bf16.mxu0 %v8007_v45  ;;  %5384 = vmatprep.subr.bf16.mxu1 %v8010_v35 }
 0x5a4   : > { %5226 = vmatpush1.bf16.msra.mxu0 %v8005_v15  ;;  %5385 = vmatpush1.bf16.msra.mxu1 %v8008_v2 }
 0x5a5   : > { %6624 = vmatprep.subr.bf16.mxu0 %v8011_v47  ;;  %6646 = vmatprep.subr.bf16.mxu1 %v8015_v26 }
 0x5a9   : > { %v7378_v0 = vpop.permute.xlu1 %7377 }
 0x5aa   : > { %v7380_v55 = vunpack.i.h.bf16 %v7378_v0  ;;  %v7379_v27 = vunpack.i.l.bf16 %v7378_v0 }
 0x5ac   : > { %v3904_v32 = vsel %vm1962_vm4, %v3863_v36, %v7379_v27  ;;  %v3900_v42 = vsel %vm1962_vm4, %v3861_v20, %v7380_v55  ;;  %v8016_v20 = vld [vmem:[%s10166_s8 + $0x50] sm:$0xff]  }
 0x5ad   : > { %v3912_v54 = vpack.c.bf16 %v3904_v32, %v9902_v16  ;;  %v3911_v53 = vpack.c.bf16 %v3900_v42, %v9927_v29  ;;  %v3914_v36 = vpack.c.bf16 %v10453_v63, %v3904_v32  ;;  %v8013_v16 = vld [vmem:[%s10166_s8 + $0x48] sm:$0xff]   ;;  %v8023_v29 = vld [vmem:[%s10166_s8 + $0xd0] sm:$0xff]  }
 0x5af   : > { %5184 = vmatprep.mubr.bf16.mxu0 %v3912_v54  ;;  %5343 = vmatprep.mubr.bf16.mxu1 %v3912_v54 }
 0x5b0   : > { %5185 = vmatmul.mubr.bf16.gmra.mrb[52].mxu0 %v3911_v53  ;;  %5344 = vmatmul.mubr.bf16.gmra.mrb[52].mxu1 %v3911_v53 }
 0x5b1   : > { %5227 = vmatprep.mubr.bf16.mxu0 %v9909_v7  ;;  %5386 = vmatprep.mubr.bf16.mxu1 %v9909_v7  ;;  %v8014_v7 = vld [vmem:[%s10166_s8 + $0x8] sm:$0xff]  }
 0x5b8   : > { %5228 = vmatmul.mubr.bf16.vlgmr.msra.gmra.mrb[48].mxu0 %v9937_v48  ;;  %5387 = vmatmul.mubr.bf16.vlgmr.msra.gmra.mrb[48].mxu1 %v9937_v48  ;;  %v3913_v48 = vpack.c.bf16 %v10453_v63, %v3900_v42 }
 0x5b9   : > { %5237 = vmatprep.mubr.bf16.mxu0 %v3914_v36  ;;  %5396 = vmatprep.mubr.bf16.mxu1 %v3914_v36 }
 0x5ba   : > { %6625 = vmatpush3.bf16.msra.mxu0 %v8012_v3  ;;  %6647 = vmatpush3.bf16.msra.mxu1 %v8017_v10 }
 0x5bb   : > { %6626 = vmatprep.subr.bf16.mxu0 %v8013_v16  ;;  %6648 = vmatprep.subr.bf16.mxu1 %v8019_v52 }
 0x5be   : > { %6627 = vmatpush3.bf16.msra.mxu0 %v8014_v7  ;;  %6649 = vmatpush3.bf16.msra.mxu1 %v8021_v33 }
 0x5bf   : > { %6628 = vmatprep.subr.bf16.mxu0 %v8016_v20  ;;  %6650 = vmatprep.subr.bf16.mxu1 %v8023_v29 }
 0x5c0   : > { %5238 = vmatmul.mubr.bf16.gmra.mrb[52].mxu0 %v3913_v48  ;;  %5397 = vmatmul.mubr.bf16.gmra.mrb[52].mxu1 %v3913_v48 }
 0x5c2   : > { %6629 = vmatpush3.bf16.msra.mxu0 %v8018_v23  ;;  %6651 = vmatpush3.bf16.msra.mxu1 %v8025_v12 }
 0x5c3   : > { %6630 = vmatprep.subr.bf16.mxu0 %v8020_v50  ;;  %6652 = vmatprep.subr.bf16.mxu1 %v8027_v51 }
 0x5c6   : > { %6631 = vmatpush3.bf16.msra.mxu0 %v8022_v6  ;;  %6653 = vmatpush3.bf16.msra.mxu1 %v8029_v38 }
 0x5c7   : > { %6632 = vmatprep.subr.bf16.mxu0 %v8024_v58  ;;  %6654 = vmatprep.subr.bf16.mxu1 %v8031_v22 }
 0x5ca   : > { %6633 = vmatpush3.bf16.msra.mxu0 %v8026_v61  ;;  %6655 = vmatpush3.bf16.msra.mxu1 %v8033_v49 }
 0x5cb   : > { %6634 = vmatprep.subr.bf16.mxu0 %v8028_v18  ;;  %6656 = vmatprep.subr.bf16.mxu1 %v8035_v57 }
 0x5ce   : > { %6635 = vmatpush3.bf16.msra.mxu0 %v8030_v41  ;;  %6657 = vmatpush3.bf16.msra.mxu1 %v8037_v5 }
 0x5cf   : > { %6636 = vmatprep.subr.bf16.mxu0 %v8032_v62  ;;  %6658 = vmatprep.subr.bf16.mxu1 %v8039_v19  ;;  %v8043_v19 = vld [vmem:[%s10170_s12] sm:$0xff]  }
 0x5d2   : > { %6637 = vmatpush3.bf16.msra.mxu0 %v8034_v4  ;;  %6659 = vmatpush3.bf16.msra.mxu1 %v8040_v43 }
 0x5d3   : > { %6638 = vmatprep.subr.bf16.mxu0 %v8036_v37  ;;  %6660 = vmatprep.subr.bf16.mxu1 %v8041_v44 }
 0x5d6   : > { %6639 = vmatpush3.bf16.msra.mxu0 %v8038_v8  ;;  %6661 = vmatpush3.bf16.msra.mxu1 %v8042_v17 }
 0x5d7   : > { %6702 = vmatprep.subr.bf16.mxu0 %v10453_v63  ;;  %6684 = vmatprep.subr.bf16.mxu1 %v10453_v63 }
 0x68b   : > { %v5229_v1 = vpop.f32.mrb[48].mxu0  ;;  %v5388_v11 = vpop.f32.mrb[48].mxu1 }
 0x68c   : > { %v6754_v39 = vadd.f32 %v5229_v1, %v4112_v14  ;;  %v6762_v28 = vadd.f32 %v5388_v11, %v4120_v60  ;;  %v5231_v13 = vpop.f32.mrb[49].mxu0  ;;  %v5390_v25 = vpop.f32.mrb[49].mxu1  ;;  %v5785_v11 = vld [vmem:[%s10168_s10] sm:$0x1] }
 0x68d   : > { %v6755_v9 = vadd.f32 %v5231_v13, %v4116_v31  ;;  %v6763_v46 = vadd.f32 %v5390_v25, %v4124_v34  ;;  %v5233_v56 = vpop.f32.mrb[50].mxu0  ;;  %v5392_v45 = vpop.f32.mrb[50].mxu1  ;;  %v5799_v13 = vsel %vm5797_vm6, %v5785_v11, 0  ;;  %v8045_v25 = vld [vmem:[%s10170_s12 + $0x10] sm:$0xff]  }
 0x68e   : > { %v5407_v35 = vmax.f32 %v6754_v39, 0.0  ;;  %v5409_v15 = vmax.f32 %v6762_v28, 0.0  ;;  %v6756_v2 = vadd.f32 %v5233_v56, %v4112_v14  ;;  %v6764_v30 = vadd.f32 %v5392_v45, %v4120_v60  ;;  %v5235_v47 = vpop.f32.mrb[51].mxu0  ;;  %v5394_v24 = vpop.f32.mrb[51].mxu1  ;;  %v8047_v45 = vld [vmem:[%s10170_s12 + $0x20] sm:$0xff]  }
 0x68f   : > { %v5408_v26 = vmax.f32 %v6755_v9, 0.0  ;;  %v5410_v21 = vmax.f32 %v6763_v46, 0.0  ;;  %v6757_v0 = vadd.f32 %v5235_v47, %v4116_v31  ;;  %v6765_v40 = vadd.f32 %v5394_v24, %v4124_v34  ;;  %v5783_v9 = vld [vmem:[%s637_s16] sm:$0xff]  ;;  %v8046_v46 = vld [vmem:[%s10170_s12 + $0x18] sm:$0xff]   ;;  %v8053_v24 = vld [vmem:[%s10464_s26 + $0x10] sm:$0xff]  }
 0x690   : > { %v5411_v55 = vmax.f32 %v6756_v2, 0.0  ;;  %v5413_v27 = vmax.f32 %v6764_v30, 0.0  ;;  %v5784_v56 = vpack.c.bf16 %v5783_v9, %v5783_v9  ;;  %v8050_v2 = vld [vmem:[%s10170_s12 + $0x30] sm:$0xff]   ;;  %v8051_v30 = vld [vmem:[%s10464_s26 + $0x8] sm:$0xff]   ;;  %v8052_v47 = vld [vmem:[%s10170_s12 + $0x38] sm:$0xff]  }
 0x691   : > { %v5423_v32 = vmax.f32 %v5407_v35, %v5408_v26  ;;  %v5424_v42 = vmax.f32 %v5409_v15, %v5410_v21  ;;  %v5412_v54 = vmax.f32 %v6757_v0, 0.0  ;;  %v5414_v53 = vmax.f32 %v6765_v40, 0.0  ;;  %v8048_v35 = vld [vmem:[%s10170_s12 + $0x28] sm:$0xff]   ;;  %v8049_v15 = vld [vmem:[%s10463_s20] sm:$0xff]   ;;  %v8054_v26 = vld [vmem:[%s10464_s26 + $0x18] sm:$0xff]   ;;  %s10466_s20 = sld [smem:[#allocation41_spill]] }
 0x693   : > { %v5425_v3 = vmax.f32 %v5411_v55, %v5412_v54  ;;  %v5426_v10 = vmax.f32 %v5413_v27, %v5414_v53  ;;  %v5239_v36 = vpop.f32.mrb[52].mxu0  ;;  %v5398_v16 = vpop.f32.mrb[52].mxu1 }
 0x694   : > { %v6758_v52 = vadd.f32 %v5239_v36, %v4112_v14  ;;  %v6766_v7 = vadd.f32 %v5398_v16, %v4120_v60  ;;  %v5241_v33 = vpop.f32.mrb[53].mxu0  ;;  %v5400_v20 = vpop.f32.mrb[53].mxu1 }
 0x695   : > { %v5431_v29 = vmax.f32 %v5423_v32, %v5425_v3  ;;  %v6759_v48 = vadd.f32 %v5241_v33, %v4116_v31  ;;  %v6767_v23 = vadd.f32 %v5400_v20, %v4124_v34  ;;  %v5243_v12 = vpop.f32.mrb[54].mxu0  ;;  %v5402_v50 = vpop.f32.mrb[54].mxu1  ;;  %v5432_v6 = vmax.f32 %v5424_v42, %v5426_v10  ;;  %v6573_v32 = vld [vmem:[%s10465_s30] ss:$0 sm:$0xff] }
 0x696   : > { %v5415_v58 = vmax.f32 %v6758_v52, 0.0  ;;  %v5417_v61 = vmax.f32 %v6766_v7, 0.0  ;;  %v6760_v51 = vadd.f32 %v5243_v12, %v4112_v14  ;;  %v6768_v18 = vadd.f32 %v5402_v50, %v4120_v60  ;;  %v5245_v38 = vpop.f32.mrb[55].mxu0  ;;  %v5404_v41 = vpop.f32.mrb[55].mxu1 }
 0x697   : > { %v5435_v22 = vpack.c.bf16 %v5431_v29, %v5431_v29  ;;  %v5416_v62 = vmax.f32 %v6759_v48, 0.0  ;;  %v5418_v49 = vmax.f32 %v6767_v23, 0.0  ;;  %v6761_v4 = vadd.f32 %v5245_v38, %v4116_v31  ;;  %v8044_v31 = vld [vmem:[%s10170_s12 + $0x8] sm:$0xff]   ;;  %v6606_v52 = vld [vmem:[%s10466_s20] ss:$0 sm:$0xff] }
 0x698   : > { %v5419_v57 = vmax.f32 %v6760_v51, 0.0  ;;  %v5421_v37 = vmax.f32 %v6768_v18, 0.0  ;;  %v6769_v5 = vadd.f32 %v5404_v41, %v4124_v34  ;;  %v5436_v8 = vpack.c.bf16 %v5432_v6, %v5432_v6  ;;  %v6621_v38 = vld [vmem:[%s10467_s23] ss:$0 sm:$0xff] }
 0x699   : > { %v5427_v43 = vmax.f32 %v5415_v58, %v5416_v62  ;;  %v5428_v44 = vmax.f32 %v5417_v61, %v5418_v49  ;;  %v5420_v17 = vmax.f32 %v6761_v4, 0.0 }
 0x69a   : > { %v5422_v59 = vmax.f32 %v6769_v5, 0.0  ;;  %5734 = vmatprep.mubr.bf16.mxu0 %v5436_v8 }
 0x69b   : > { %v5429_v14 = vmax.f32 %v5419_v57, %v5420_v17  ;;  %5735 = vmatmul.mubr.bf16.vlgmr.msra.gmra.mrb[56].mxu0 %v5435_v22 }
 0x69c   : > { %v5430_v60 = vmax.f32 %v5421_v37, %v5422_v59  ;;  %6703 = vmatpush3.bf16.msra.mxu0 %v8043_v19  ;;  %6718 = vmatprep.mubr.msk.bf16.mxu0 %vm8162_vm5, %v10453_v63 }
 0x69d   : > { %v5433_v34 = vmax.f32 %v5427_v43, %v5429_v14  ;;  %6704 = vmatprep.subr.bf16.mxu0 %v10453_v63 }
 0x69e   : > { %v5434_v1 = vmax.f32 %v5428_v44, %v5430_v60 }
 0x69f   : > { %v5437_v39 = vpack.c.bf16 %v5433_v34, %v5433_v34 }
 0x6a0   : > { %v5438_v28 = vpack.c.bf16 %v5434_v1, %v5434_v1  ;;  %6705 = vmatpush3.bf16.msra.mxu0 %v8044_v31 }
 0x6a1   : > { %6706 = vmatprep.subr.bf16.mxu0 %v10453_v63 }
 0x6a2   : > { %5774 = vmatprep.mubr.bf16.mxu1 %v5438_v28 }
 0x6a3   : > { %5775 = vmatmul.mubr.bf16.vlgmr.msra.gmra.mrb[56].mxu1 %v5437_v39 }
 0x6a4   : > { %6685 = vmatpush3.bf16.msra.mxu1 %v5799_v13  ;;  %6686 = vmatprep.mubr.msk.bf16.mxu1 %vm8162_vm5, %v10453_v63 }
 0x6a5   : > { %6707 = vmatpush3.bf16.msra.mxu0 %v8045_v25  ;;  %6690 = vmatprep.subr.bf16.mxu1 %v10453_v63 }
 0x6a6   : > { %6708 = vmatprep.subr.bf16.mxu0 %v10453_v63 }
 0x6a9   : > { %6709 = vmatpush3.bf16.msra.mxu0 %v8046_v46 }
 0x6aa   : > { %6710 = vmatprep.subr.bf16.mxu0 %v10453_v63 }
 0x6ab   : > { %6687 = vmatmul.mubr.msk.bf16.vlgmr.msra.gmra.mrb[60].mxu1 %vm5793_vm7, %v5784_v56 }
 0x6ac   : > { %6698 = vmatprep.mubr.msk.bf16.mxu1 %vm8162_vm5, %v10453_v63  ;;  %6691 = vmatpush3.bf16.msra.mxu1 %v8049_v15 }
 0x6ad   : > { %6711 = vmatpush3.bf16.msra.mxu0 %v8047_v45  ;;  %6692 = vmatprep.subr.bf16.mxu1 %v10453_v63 }
 0x6ae   : > { %6712 = vmatprep.subr.bf16.mxu0 %v10453_v63 }
 0x6b0   : > { %6693 = vmatpush3.bf16.msra.mxu1 %v8051_v30 }
 0x6b1   : > { %6713 = vmatpush3.bf16.msra.mxu0 %v8048_v35  ;;  %6694 = vmatprep.subr.bf16.mxu1 %v10453_v63 }
 0x6b2   : > { %6714 = vmatprep.subr.bf16.mxu0 %v10453_v63 }
 0x6b4   : > { %6695 = vmatpush3.bf16.msra.mxu1 %v8053_v24 }
 0x6b5   : > { %6715 = vmatpush3.bf16.msra.mxu0 %v8050_v2  ;;  %6696 = vmatprep.subr.bf16.mxu1 %v10453_v63 }
 0x6b6   : > { %6716 = vmatprep.subr.bf16.mxu0 %v10453_v63 }
 0x6b8   : > { %6697 = vmatpush3.bf16.msra.mxu1 %v8054_v26 }
 0x6b9   : > { %6717 = vmatpush3.bf16.msra.mxu0 %v8052_v47 }
 0x76e   : > { %v6640_v21 = vpop.f32.mrb[56].mxu0 }
 0x76f   : > { %v6641_v0 = vpop.f32.mrb[57].mxu0 }
 0x770   : > { %v6642_v40 = vadd.f32 %v6641_v0, %v6640_v21  ;;  %v6643_v55 = vpop.f32.mrb[58].mxu0 }
 0x771   : > { %v6644_v27 = vpop.f32.mrb[59].mxu0 }
 0x772   : > { %v5737_v53 = vadd.f32 %v6642_v40, %v6573_v32 }
 0x776   : > { %v6662_v42 = vpop.f32.mrb[56].mxu1 }
 0x777   : > { %v6663_v54 = vpop.f32.mrb[57].mxu1 }
 0x778   : > { %v6664_v3 = vadd.f32 %v6663_v54, %v6662_v42  ;;  %v6665_v10 = vpop.f32.mrb[58].mxu1 }
 0x779   : > { %v6666_v63 = vpop.f32.mrb[59].mxu1 }
 0x77a   : > { %v5777_v36 = vadd.f32 %v6664_v3, %v5737_v53 }
 0x77c   : > { %v5782_v16 = vmax.f32 %v5777_v36, 0.0 }
 0x77e   : > { %v5842_v7 = vpack.c.bf16 %v5782_v16, %v5782_v16  ;;  %v5835_v33 = vpop.f32.mrb[60].mxu1 }
 0x77f   : > { %v5836_v20 = vadd.f32 %v6606_v52, %v5835_v33  ;;  %v6688_v29 = vpop.f32.mrb[61].mxu1 }
 0x780   : > { %v5838_v48 = vpop.f32.mrb[62].mxu1  ;;  %6719 = vmatmul.mubr.bf16.vlgmr.msra.gmra.mrb[60].mxu0 %v5842_v7 }
 0x781   : > { %v5841_v23 = vmax.f32 %v5836_v20, 0.0  ;;  %v6689_v12 = vpop.f32.mrb[63].mxu1 }
 0x783   : > { %v5859_v50 = vpack.c.bf16 %v5841_v23, %v5841_v23 }
 0x785   : > { %6699 = vmatmul.mubr.msk.bf16.vlgmr.msra.gmra.mrb[64].mxu1 %vm1962_vm4, %v5859_v50 }
 0x853   : > { %v6017_v6 = vpop.f32.mrb[60].mxu0 }
 0x854   : > { %v6720_v58 = vpop.f32.mrb[61].mxu0 }
 0x855   : > { %v6020_v61 = vpop.f32.mrb[62].mxu0 }
 0x856   : > { %v6721_v51 = vpop.f32.mrb[63].mxu0 }
 0x858   : > { %v5929_v18 = vpop.f32.mrb[64].mxu1 }
 0x859   : > { %v6018_v41 = vadd.f32 %v6017_v6, %v5929_v18  ;;  %v6700_v22 = vpop.f32.mrb[65].mxu1 }
 0x85a   : > { %v5932_v62 = vpop.f32.mrb[66].mxu1 }
 0x85b   : > { %v6030_v49 = vadd.f32 %v6621_v38, %v6018_v41  ;;  %v6701_v4 = vpop.f32.mrb[67].mxu1 }
 0x85d   : > { %6031 = vst [vmem:[%s641_s11] sm:$0xff] %v6030_v49 }
 0x85e PF: > { %s10469_s20 = sld [smem:[#allocation9_spill]]  ;;  %s10470_s13 = sld [smem:[#allocation10_spill]] }
 0x85f   : > { %s10471_s18 = smov %s8147_s19 }
 0x864   : > { %p24_p0 = scmp.ge.s32.totalorder %s10469_s20, 4   ;;  %s10472_s19 = smov %s10470_s13 }
 0x866   :  { %26 = sbr.rel (!%p24_p0) target bundleno = 9 (0x9), region = 165 }
 0x86d   :  { %6051 = vsyncpa [#allocation4], 1 }
 0x86e   :  { %6053 = vsyncpa [#allocation4 + $0x1], 1 }
 0x86f   :  { %6054 = vsyncpa [#allocation6], 1 }

</bundles_post_ra>
